<compile_context>
chip_gen: v7x
topology: tpu7x:2x2x1
jax: 0.10.0
libtpu: 0.0.40
codegen_flags: <defaults>
</compile_context>

<pallas_src>
import jax
import jax.numpy as jnp
from jax.experimental import pallas as pl
from jax.experimental.pallas import tpu as pltpu

NP = 128                       # per-pool-position lane padding of Cout (128-aligned slices)
VMEM_LIMIT = 32 * 1024 * 1024  # safe on v5e/v6e/v7x; far above actual ~4 MiB need


def _round_up(x, m):
    return (x + m - 1) // m * m


# ----------------------------------------------------------------------------
# Kernel 1: fused 3x3 conv + bias + ReLU + 2x2 max-pool as ONE matmul.
# z rows = pooled output pixels; z cols = the 4x4xCin input patch covering the
# whole pool window.  w packs the conv weight for the 4 pool positions in 4
# adjacent 128-lane groups, so the pool-max is a max over aligned lane groups.
# relu(max_i(x_i @ W) + b) == max_i relu(x_i @ W + b) (bias const, ReLU monotone).
# ----------------------------------------------------------------------------
def _make_conv_kernel(cout):
    def kernel(z_ref, w_ref, b_ref, o_ref):
        y = jnp.dot(z_ref[...], w_ref[...], preferred_element_type=jnp.float32)
        m = jnp.maximum(jnp.maximum(y[:, 0 * NP:1 * NP], y[:, 1 * NP:2 * NP]),
                        jnp.maximum(y[:, 2 * NP:3 * NP], y[:, 3 * NP:4 * NP]))
        o_ref[...] = jnp.maximum(m[:, :cout] + b_ref[...], 0.0).astype(o_ref.dtype)
    return kernel


def _pool_im2col(x):
    """x: (B, H, W, Cin) -> Z: (B*Ho*Wo, 16*Cin); one 4x4 patch per pooled pixel."""
    B, H, W, Cin = x.shape
    Ho, Wo = H // 2, W // 2
    xp = jnp.pad(x, ((0, 0), (1, 1), (1, 1), (0, 0)))
    cols = [xp[:, ry:ry + 2 * Ho:2, rx:rx + 2 * Wo:2, :]
            for ry in range(4) for rx in range(4)]
    z = jnp.concatenate(cols, axis=-1)                    # (B, Ho, Wo, 16*Cin)
    return z.reshape(B * Ho * Wo, 16 * Cin)


def _pool_conv_weight(w_pt):
    """PyTorch conv weight (Cout, Cin, 3, 3) -> packed (16*Cin, 4*NP) bf16."""
    cout, cin = w_pt.shape[0], w_pt.shape[1]
    w = jnp.transpose(w_pt, (2, 3, 1, 0))                 # (ky, kx, cin, cout)
    wbig = jnp.zeros((4, 4, cin, 4, NP), jnp.float32)
    for dy in (0, 1):
        for dx in (0, 1):
            p = dy * 2 + dx
            wbig = wbig.at[dy:dy + 3, dx:dx + 3, :, p, :cout].set(w)
    return wbig.reshape(16 * cin, 4 * NP).astype(jnp.bfloat16)


def conv_relu_pool(x_nhwc, w_packed, b, *, tile_m=512):
    """x_nhwc: (B,H,W,Cin); returns (B,H/2,W/2,Cout) bf16."""
    B, H, W, Cin = x_nhwc.shape
    cout = b.shape[0]
    Ho, Wo = H // 2, W // 2
    K = 16 * Cin
    M = B * Ho * Wo

    z = _pool_im2col(x_nhwc.astype(jnp.bfloat16))
    tm = tile_m if M >= tile_m else M
    Mp = _round_up(M, tm)
    if Mp != M:
        z = jnp.pad(z, ((0, Mp - M), (0, 0)))

    out = pl.pallas_call(
        _make_conv_kernel(cout),
        out_shape=jax.ShapeDtypeStruct((Mp, cout), jnp.bfloat16),
        grid=(Mp // tm,),
        in_specs=[pl.BlockSpec((tm, K), lambda i: (i, 0)),
                  pl.BlockSpec((K, 4 * NP), lambda i: (0, 0)),
                  pl.BlockSpec((1, cout), lambda i: (0, 0))],
        out_specs=pl.BlockSpec((tm, cout), lambda i: (i, 0)),
        compiler_params=pltpu.CompilerParams(
            dimension_semantics=("parallel",),
            vmem_limit_bytes=VMEM_LIMIT),
    )(z, w_packed, b.reshape(1, cout).astype(jnp.float32))
    return out[:M].reshape(B, Ho, Wo, cout)


# ----------------------------------------------------------------------------
# Kernel 2: fused MLP head, tiled over batch.
# fc_image, fc_label, Linear(256,128) on the concat (split matmul), ReLU,
# BatchNorm(eval), Linear(128,64), ReLU, BatchNorm(eval), Linear(64,10),
# Softmax(dim=1).  Dropout is identity in eval.
# ----------------------------------------------------------------------------
def head_kernel(feat_ref, lab_ref, wimg_ref, bimg_ref, wlab_ref, blab_ref,
                w1a_ref, w1b_ref, b1_ref, s1_ref, t1_ref,
                w2_ref, b2_ref, s2_ref, t2_ref, w3_ref, b3_ref, o_ref):
    img = jnp.dot(feat_ref[...], wimg_ref[...],
                  preferred_element_type=jnp.float32) + bimg_ref[...]
    lab = jnp.dot(lab_ref[...], wlab_ref[...],
                  preferred_element_type=jnp.float32) + blab_ref[...]
    # Linear(256,128) on concat([img, lab], dim=1) == img@W1a + lab@W1b + b1
    h1 = (jnp.dot(img.astype(jnp.bfloat16), w1a_ref[...],
                  preferred_element_type=jnp.float32)
          + jnp.dot(lab.astype(jnp.bfloat16), w1b_ref[...],
                    preferred_element_type=jnp.float32)
          + b1_ref[...])
    h1 = jnp.maximum(h1, 0.0)
    h1 = h1 * s1_ref[...] + t1_ref[...]      # BatchNorm1d(128) eval; Dropout = id
    h2 = jnp.dot(h1.astype(jnp.bfloat16), w2_ref[...],
                 preferred_element_type=jnp.float32) + b2_ref[...]
    h2 = jnp.maximum(h2, 0.0)
    h2 = h2 * s2_ref[...] + t2_ref[...]      # BatchNorm1d(64) eval; Dropout = id
    logits = jnp.dot(h2.astype(jnp.bfloat16), w3_ref[...],
                     preferred_element_type=jnp.float32) + b3_ref[...]
    mx = jnp.max(logits, axis=-1, keepdims=True)
    e = jnp.exp(logits - mx)
    s = jnp.sum(e, axis=-1, keepdims=True)
    o_ref[...] = e * pl.reciprocal(s, approx=False)


# ----------------------------------------------------------------------------
# Parameters (deterministic synthetic init, PyTorch shapes).
# ----------------------------------------------------------------------------
def init_params(key):
    ks = jax.random.split(key, 14)

    def rnd(k, shape, scale=0.05):
        return jax.random.normal(k, shape, jnp.float32) * scale

    return {
        "conv1_w": rnd(ks[0], (32, 3, 3, 3)),
        "conv1_b": rnd(ks[1], (32,)),
        "conv2_w": rnd(ks[2], (64, 32, 3, 3)),
        "conv2_b": rnd(ks[3], (64,)),
        "fc_image_w": rnd(ks[4], (128, 64 * 8 * 8)),   # PyTorch (out, in)
        "fc_image_b": rnd(ks[5], (128,)),
        "fc_label_w": rnd(ks[6], (128, 10)),
        "fc_label_b": rnd(ks[7], (128,)),
        "fc1_w": rnd(ks[8], (128, 256)),
        "fc1_b": rnd(ks[9], (128,)),
        "fc2_w": rnd(ks[10], (64, 128)),
        "fc2_b": rnd(ks[11], (64,)),
        "fc3_w": rnd(ks[12], (10, 64)),
        "fc3_b": rnd(ks[13], (10,)),
        # BatchNorm1d defaults
        "bn1_gamma": jnp.ones((128,), jnp.float32),
        "bn1_beta": jnp.zeros((128,), jnp.float32),
        "bn1_mean": jnp.zeros((128,), jnp.float32),
        "bn1_var": jnp.ones((128,), jnp.float32),
        "bn2_gamma": jnp.ones((64,), jnp.float32),
        "bn2_beta": jnp.zeros((64,), jnp.float32),
        "bn2_mean": jnp.zeros((64,), jnp.float32),
        "bn2_var": jnp.ones((64,), jnp.float32),
    }


def forward(params, image_nchw, hard_label):
    B = image_nchw.shape[0]
    x = jnp.transpose(image_nchw, (0, 2, 3, 1))            # NCHW -> NHWC

    w1p = _pool_conv_weight(params["conv1_w"])
    w2p = _pool_conv_weight(params["conv2_w"])
    f1 = conv_relu_pool(x, w1p, params["conv1_b"])         # (B,16,16,32) bf16
    f2 = conv_relu_pool(f1, w2p, params["conv2_b"])        # (B, 8, 8,64) bf16

    # NHWC flatten consumed directly: fc_image weight rows are permuted instead
    # of transposing f2 back to the NCHW flatten order.
    feat = f2.reshape(B, 64 * 8 * 8)

    eps = 1e-5
    s1 = params["bn1_gamma"] / jnp.sqrt(params["bn1_var"] + eps)
    t1 = params["bn1_beta"] - params["bn1_mean"] * s1
    s2 = params["bn2_gamma"] / jnp.sqrt(params["bn2_var"] + eps)
    t2 = params["bn2_beta"] - params["bn2_mean"] * s2

    w_img = (params["fc_image_w"].reshape(128, 64, 8, 8)
             .transpose(0, 2, 3, 1).reshape(128, 64 * 8 * 8).T)   # NHWC row order
    w1 = params["fc1_w"].T                                        # (256, 128)

    bf = jnp.bfloat16
    tb = 128 if B >= 128 else B
    Bp = _round_up(B, tb)
    lab = hard_label.astype(bf)
    if Bp != B:
        feat = jnp.pad(feat, ((0, Bp - B), (0, 0)))
        lab = jnp.pad(lab, ((0, Bp - B), (0, 0)))

    row = lambda v: v.reshape(1, -1).astype(jnp.float32)
    weights = [
        w_img.astype(bf), row(params["fc_image_b"]),
        params["fc_label_w"].T.astype(bf), row(params["fc_label_b"]),
        w1[:128].astype(bf), w1[128:].astype(bf), row(params["fc1_b"]),
        row(s1), row(t1),
        params["fc2_w"].T.astype(bf), row(params["fc2_b"]), row(s2), row(t2),
        params["fc3_w"].T.astype(bf), row(params["fc3_b"]),
    ]

    def const_spec(a):
        nd = a.ndim
        return pl.BlockSpec(tuple(a.shape), lambda i, _nd=nd: (0,) * _nd)

    out = pl.pallas_call(
        head_kernel,
        out_shape=jax.ShapeDtypeStruct((Bp, 10), jnp.float32),
        grid=(Bp // tb,),
        in_specs=[pl.BlockSpec((tb, 64 * 8 * 8), lambda i: (i, 0)),
                  pl.BlockSpec((tb, 10), lambda i: (i, 0))]
                 + [const_spec(a) for a in weights],
        out_specs=pl.BlockSpec((tb, 10), lambda i: (i, 0)),
        compiler_params=pltpu.CompilerParams(
            dimension_semantics=("parallel",),
            vmem_limit_bytes=VMEM_LIMIT),
    )(feat, lab, *weights)
    return out[:B]


if __name__ == "__main__":
    key = jax.random.PRNGKey(0)
    k_img, k_lab, k_par = jax.random.split(key, 3)

    B = 2
    image = jax.random.normal(k_img, (B, 3, 32, 32), jnp.float32)     # NCHW like PyTorch
    label_idx = jax.random.randint(k_lab, (B,), 0, 10)
    hard_label = jax.nn.one_hot(label_idx, 10, dtype=jnp.float32)     # (B, 10)

    params = init_params(k_par)
    out = jax.jit(forward)(params, image, hard_label)
    out = jax.block_until_ready(out)

    assert out.shape == (B, 10)
    assert bool(jnp.all(jnp.isfinite(out)))
    assert bool(jnp.allclose(jnp.sum(out, axis=1), 1.0, atol=1e-5))   # softmax rows
    print("KERNEL_OK")
</pallas_src>

<mosaic_0001>
module attributes {stable_mosaic.version = 11 : i64} {
  func.func @kernel(%arg0: i32, %arg1: memref<512x48xbf16, #tpu.memory_space<vmem>>, %arg2: memref<48x512xbf16, #tpu.memory_space<vmem>>, %arg3: memref<1x32xf32, #tpu.memory_space<vmem>>, %arg4: memref<512x32xbf16, #tpu.memory_space<vmem>>) attributes {dimension_semantics = [#tpu.dimension_semantics<parallel>], iteration_bounds = array<i64: 1>, scalar_prefetch = 0 : i64, scratch_operands = 0 : i64, tpu.core_type = #tpu.core_type<tc>, window_params = [{transform_indices = @transform_0, window_bounds = array<i64: 512, 48>}, {pipeline_mode = #tpu.pipeline_mode<synchronous>, transform_indices = @transform_1, window_bounds = array<i64: 48, 512>}, {pipeline_mode = #tpu.pipeline_mode<synchronous>, transform_indices = @transform_2, window_bounds = array<i64: 1, 32>}, {transform_indices = @transform_3, window_bounds = array<i64: 512, 32>}]} {
    %c0 = arith.constant 0 : index
    %c0_0 = arith.constant 0 : index
    %0 = vector.load %arg1[%c0, %c0_0] : memref<512x48xbf16, #tpu.memory_space<vmem>>, vector<512x48xbf16>
    %c0_1 = arith.constant 0 : index
    %c0_2 = arith.constant 0 : index
    %1 = vector.load %arg2[%c0_1, %c0_2] : memref<48x512xbf16, #tpu.memory_space<vmem>>, vector<48x512xbf16>
    %cst = arith.constant dense<0.000000e+00> : vector<512x512xf32>
    %2 = tpu.matmul %0, %1, %cst {dimension_numbers = #tpu.dot_dimension_numbers<[1], [0], [0], [1], [0, 0, 1, 1], [], []>} : vector<512x48xbf16>, vector<48x512xbf16>, vector<512x512xf32> -> vector<512x512xf32>
    %3 = vector.extract_strided_slice %2 {offsets = [0, 0], sizes = [512, 128], strides = [1, 1]} : vector<512x512xf32> to vector<512x128xf32>
    %4 = vector.extract_strided_slice %2 {offsets = [0, 128], sizes = [512, 128], strides = [1, 1]} : vector<512x512xf32> to vector<512x128xf32>
    %5 = arith.maximumf %3, %4 : vector<512x128xf32>
    %6 = vector.extract_strided_slice %2 {offsets = [0, 256], sizes = [512, 128], strides = [1, 1]} : vector<512x512xf32> to vector<512x128xf32>
    %7 = vector.extract_strided_slice %2 {offsets = [0, 384], sizes = [512, 128], strides = [1, 1]} : vector<512x512xf32> to vector<512x128xf32>
    %8 = arith.maximumf %6, %7 : vector<512x128xf32>
    %9 = arith.maximumf %5, %8 : vector<512x128xf32>
    %10 = vector.extract_strided_slice %9 {offsets = [0, 0], sizes = [512, 32], strides = [1, 1]} : vector<512x128xf32> to vector<512x32xf32>
    %c0_3 = arith.constant 0 : index
    %c0_4 = arith.constant 0 : index
    %11 = vector.load %arg3[%c0_3, %c0_4] : memref<1x32xf32, #tpu.memory_space<vmem>>, vector<1x32xf32>
    %12 = vector.broadcast %11 : vector<1x32xf32> to vector<512x32xf32>
    %13 = arith.addf %10, %12 : vector<512x32xf32>
    %cst_5 = arith.constant 0.000000e+00 : f32
    %14 = vector.broadcast %cst_5 : f32 to vector<512x32xf32>
    %15 = arith.maximumf %13, %14 : vector<512x32xf32>
    %16 = arith.truncf %15 : vector<512x32xf32> to vector<512x32xbf16>
    %c0_6 = arith.constant 0 : index
    %c0_7 = arith.constant 0 : index
    %17 = vector.load %arg4[%c0_6, %c0_7] : memref<512x32xbf16, #tpu.memory_space<vmem>>, vector<512x32xbf16>
    tpu.vector_store %arg4[%c0_6, %c0_7], %16 {strides = array<i32>} : memref<512x32xbf16, #tpu.memory_space<vmem>>, vector<512x32xbf16>,
    return
  }
  func.func @transform_0(%arg0: i32) -> (i32, i32) {
    %c0_i32 = arith.constant 0 : i32
    %c0_i32_0 = arith.constant 0 : i32
    return %arg0, %c0_i32 : i32, i32
  }
  func.func @transform_1(%arg0: i32) -> (i32, i32) {
    %c0_i32 = arith.constant 0 : i32
    %c0_i32_0 = arith.constant 0 : i32
    %c0_i32_1 = arith.constant 0 : i32
    return %c0_i32, %c0_i32_0 : i32, i32
  }
  func.func @transform_2(%arg0: i32) -> (i32, i32) {
    %c0_i32 = arith.constant 0 : i32
    %c0_i32_0 = arith.constant 0 : i32
    %c0_i32_1 = arith.constant 0 : i32
    return %c0_i32, %c0_i32_0 : i32, i32
  }
  func.func @transform_3(%arg0: i32) -> (i32, i32) {
    %c0_i32 = arith.constant 0 : i32
    %c0_i32_0 = arith.constant 0 : i32
    return %arg0, %c0_i32 : i32, i32
  }
}

module attributes {stable_mosaic.version = 11 : i64} {
  func.func @kernel(%arg0: i32, %arg1: memref<128x512xbf16, #tpu.memory_space<vmem>>, %arg2: memref<512x512xbf16, #tpu.memory_space<vmem>>, %arg3: memref<1x64xf32, #tpu.memory_space<vmem>>, %arg4: memref<128x64xbf16, #tpu.memory_space<vmem>>) attributes {dimension_semantics = [#tpu.dimension_semantics<parallel>], iteration_bounds = array<i64: 1>, scalar_prefetch = 0 : i64, scratch_operands = 0 : i64, tpu.core_type = #tpu.core_type<tc>, window_params = [{transform_indices = @transform_0, window_bounds = array<i64: 128, 512>}, {pipeline_mode = #tpu.pipeline_mode<synchronous>, transform_indices = @transform_1, window_bounds = array<i64: 512, 512>}, {pipeline_mode = #tpu.pipeline_mode<synchronous>, transform_indices = @transform_2, window_bounds = array<i64: 1, 64>}, {transform_indices = @transform_3, window_bounds = array<i64: 128, 64>}]} {
    %c0 = arith.constant 0 : index
    %c0_0 = arith.constant 0 : index
    %0 = vector.load %arg1[%c0, %c0_0] : memref<128x512xbf16, #tpu.memory_space<vmem>>, vector<128x512xbf16>
    %c0_1 = arith.constant 0 : index
    %c0_2 = arith.constant 0 : index
    %1 = vector.load %arg2[%c0_1, %c0_2] : memref<512x512xbf16, #tpu.memory_space<vmem>>, vector<512x512xbf16>
    %cst = arith.constant dense<0.000000e+00> : vector<128x512xf32>
    %2 = tpu.matmul %0, %1, %cst {dimension_numbers = #tpu.dot_dimension_numbers<[1], [0], [0], [1], [0, 0, 1, 1], [], []>} : vector<128x512xbf16>, vector<512x512xbf16>, vector<128x512xf32> -> vector<128x512xf32>
    %3 = vector.extract_strided_slice %2 {offsets = [0, 0], sizes = [128, 128], strides = [1, 1]} : vector<128x512xf32> to vector<128x128xf32>
    %4 = vector.extract_strided_slice %2 {offsets = [0, 128], sizes = [128, 128], strides = [1, 1]} : vector<128x512xf32> to vector<128x128xf32>
    %5 = arith.maximumf %3, %4 : vector<128x128xf32>
    %6 = vector.extract_strided_slice %2 {offsets = [0, 256], sizes = [128, 128], strides = [1, 1]} : vector<128x512xf32> to vector<128x128xf32>
    %7 = vector.extract_strided_slice %2 {offsets = [0, 384], sizes = [128, 128], strides = [1, 1]} : vector<128x512xf32> to vector<128x128xf32>
    %8 = arith.maximumf %6, %7 : vector<128x128xf32>
    %9 = arith.maximumf %5, %8 : vector<128x128xf32>
    %10 = vector.extract_strided_slice %9 {offsets = [0, 0], sizes = [128, 64], strides = [1, 1]} : vector<128x128xf32> to vector<128x64xf32>
    %c0_3 = arith.constant 0 : index
    %c0_4 = arith.constant 0 : index
    %11 = vector.load %arg3[%c0_3, %c0_4] : memref<1x64xf32, #tpu.memory_space<vmem>>, vector<1x64xf32>
    %12 = vector.broadcast %11 : vector<1x64xf32> to vector<128x64xf32>
    %13 = arith.addf %10, %12 : vector<128x64xf32>
    %cst_5 = arith.constant 0.000000e+00 : f32
    %14 = vector.broadcast %cst_5 : f32 to vector<128x64xf32>
    %15 = arith.maximumf %13, %14 : vector<128x64xf32>
    %16 = arith.truncf %15 : vector<128x64xf32> to vector<128x64xbf16>
    %c0_6 = arith.constant 0 : index
    %c0_7 = arith.constant 0 : index
    %17 = vector.load %arg4[%c0_6, %c0_7] : memref<128x64xbf16, #tpu.memory_space<vmem>>, vector<128x64xbf16>
    tpu.vector_store %arg4[%c0_6, %c0_7], %16 {strides = array<i32>} : memref<128x64xbf16, #tpu.memory_space<vmem>>, vector<128x64xbf16>,
    return
  }
  func.func @transform_0(%arg0: i32) -> (i32, i32) {
    %c0_i32 = arith.constant 0 : i32
    %c0_i32_0 = arith.constant 0 : i32
    return %arg0, %c0_i32 : i32, i32
  }
  func.func @transform_1(%arg0: i32) -> (i32, i32) {
    %c0_i32 = arith.constant 0 : i32
    %c0_i32_0 = arith.constant 0 : i32
    %c0_i32_1 = arith.constant 0 : i32
    return %c0_i32, %c0_i32_0 : i32, i32
  }
  func.func @transform_2(%arg0: i32) -> (i32, i32) {
    %c0_i32 = arith.constant 0 : i32
    %c0_i32_0 = arith.constant 0 : i32
    %c0_i32_1 = arith.constant 0 : i32
    return %c0_i32, %c0_i32_0 : i32, i32
  }
  func.func @transform_3(%arg0: i32) -> (i32, i32) {
    %c0_i32 = arith.constant 0 : i32
    %c0_i32_0 = arith.constant 0 : i32
    return %arg0, %c0_i32 : i32, i32
  }
}

module attributes {stable_mosaic.version = 11 : i64} {
  func.func @head_kernel(%arg0: i32, %arg1: memref<2x4096xbf16, #tpu.memory_space<vmem>>, %arg2: memref<2x10xbf16, #tpu.memory_space<vmem>>, %arg3: memref<4096x128xbf16, #tpu.memory_space<vmem>>, %arg4: memref<1x128xf32, #tpu.memory_space<vmem>>, %arg5: memref<10x128xbf16, #tpu.memory_space<vmem>>, %arg6: memref<1x128xf32, #tpu.memory_space<vmem>>, %arg7: memref<128x128xbf16, #tpu.memory_space<vmem>>, %arg8: memref<128x128xbf16, #tpu.memory_space<vmem>>, %arg9: memref<1x128xf32, #tpu.memory_space<vmem>>, %arg10: memref<1x128xf32, #tpu.memory_space<vmem>>, %arg11: memref<1x128xf32, #tpu.memory_space<vmem>>, %arg12: memref<128x64xbf16, #tpu.memory_space<vmem>>, %arg13: memref<1x64xf32, #tpu.memory_space<vmem>>, %arg14: memref<1x64xf32, #tpu.memory_space<vmem>>, %arg15: memref<1x64xf32, #tpu.memory_space<vmem>>, %arg16: memref<64x10xbf16, #tpu.memory_space<vmem>>, %arg17: memref<1x10xf32, #tpu.memory_space<vmem>>, %arg18: memref<2x10xf32, #tpu.memory_space<vmem>>) attributes {dimension_semantics = [#tpu.dimension_semantics<parallel>], iteration_bounds = array<i64: 1>, scalar_prefetch = 0 : i64, scratch_operands = 0 : i64, tpu.core_type = #tpu.core_type<tc>, window_params = [{transform_indices = @transform_0, window_bounds = array<i64: 2, 4096>}, {transform_indices = @transform_1, window_bounds = array<i64: 2, 10>}, {pipeline_mode = #tpu.pipeline_mode<synchronous>, transform_indices = @transform_2, window_bounds = array<i64: 4096, 128>}, {pipeline_mode = #tpu.pipeline_mode<synchronous>, transform_indices = @transform_3, window_bounds = array<i64: 1, 128>}, {pipeline_mode = #tpu.pipeline_mode<synchronous>, transform_indices = @transform_4, window_bounds = array<i64: 10, 128>}, {pipeline_mode = #tpu.pipeline_mode<synchronous>, transform_indices = @transform_5, window_bounds = array<i64: 1, 128>}, {pipeline_mode = #tpu.pipeline_mode<synchronous>, transform_indices = @transform_6, window_bounds = array<i64: 128, 128>}, {pipeline_mode = #tpu.pipeline_mode<synchronous>, transform_indices = @transform_7, window_bounds = array<i64: 128, 128>}, {pipeline_mode = #tpu.pipeline_mode<synchronous>, transform_indices = @transform_8, window_bounds = array<i64: 1, 128>}, {pipeline_mode = #tpu.pipeline_mode<synchronous>, transform_indices = @transform_9, window_bounds = array<i64: 1, 128>}, {pipeline_mode = #tpu.pipeline_mode<synchronous>, transform_indices = @transform_10, window_bounds = array<i64: 1, 128>}, {pipeline_mode = #tpu.pipeline_mode<synchronous>, transform_indices = @transform_11, window_bounds = array<i64: 128, 64>}, {pipeline_mode = #tpu.pipeline_mode<synchronous>, transform_indices = @transform_12, window_bounds = array<i64: 1, 64>}, {pipeline_mode = #tpu.pipeline_mode<synchronous>, transform_indices = @transform_13, window_bounds = array<i64: 1, 64>}, {pipeline_mode = #tpu.pipeline_mode<synchronous>, transform_indices = @transform_14, window_bounds = array<i64: 1, 64>}, {pipeline_mode = #tpu.pipeline_mode<synchronous>, transform_indices = @transform_15, window_bounds = array<i64: 64, 10>}, {pipeline_mode = #tpu.pipeline_mode<synchronous>, transform_indices = @transform_16, window_bounds = array<i64: 1, 10>}, {transform_indices = @transform_17, window_bounds = array<i64: 2, 10>}]} {
    %c0 = arith.constant 0 : index
    %c0_0 = arith.constant 0 : index
    %0 = vector.load %arg1[%c0, %c0_0] : memref<2x4096xbf16, #tpu.memory_space<vmem>>, vector<2x4096xbf16>
    %c0_1 = arith.constant 0 : index
    %c0_2 = arith.constant 0 : index
    %1 = vector.load %arg3[%c0_1, %c0_2] : memref<4096x128xbf16, #tpu.memory_space<vmem>>, vector<4096x128xbf16>
    %cst = arith.constant dense<0.000000e+00> : vector<2x128xf32>
    %2 = tpu.matmul %0, %1, %cst {dimension_numbers = #tpu.dot_dimension_numbers<[1], [0], [0], [1], [0, 0, 1, 1], [], []>} : vector<2x4096xbf16>, vector<4096x128xbf16>, vector<2x128xf32> -> vector<2x128xf32>
    %c0_3 = arith.constant 0 : index
    %c0_4 = arith.constant 0 : index
    %3 = vector.load %arg4[%c0_3, %c0_4] : memref<1x128xf32, #tpu.memory_space<vmem>>, vector<1x128xf32>
    %4 = vector.broadcast %3 : vector<1x128xf32> to vector<2x128xf32>
    %5 = arith.addf %2, %4 : vector<2x128xf32>
    %c0_5 = arith.constant 0 : index
    %c0_6 = arith.constant 0 : index
    %6 = vector.load %arg2[%c0_5, %c0_6] : memref<2x10xbf16, #tpu.memory_space<vmem>>, vector<2x10xbf16>
    %c0_7 = arith.constant 0 : index
    %c0_8 = arith.constant 0 : index
    %7 = vector.load %arg5[%c0_7, %c0_8] : memref<10x128xbf16, #tpu.memory_space<vmem>>, vector<10x128xbf16>
    %cst_9 = arith.constant dense<0.000000e+00> : vector<2x128xf32>
    %8 = tpu.matmul %6, %7, %cst_9 {dimension_numbers = #tpu.dot_dimension_numbers<[1], [0], [0], [1], [0, 0, 1, 1], [], []>} : vector<2x10xbf16>, vector<10x128xbf16>, vector<2x128xf32> -> vector<2x128xf32>
    %c0_10 = arith.constant 0 : index
    %c0_11 = arith.constant 0 : index
    %9 = vector.load %arg6[%c0_10, %c0_11] : memref<1x128xf32, #tpu.memory_space<vmem>>, vector<1x128xf32>
    %10 = vector.broadcast %9 : vector<1x128xf32> to vector<2x128xf32>
    %11 = arith.addf %8, %10 : vector<2x128xf32>
    %12 = arith.truncf %5 : vector<2x128xf32> to vector<2x128xbf16>
    %c0_12 = arith.constant 0 : index
    %c0_13 = arith.constant 0 : index
    %13 = vector.load %arg7[%c0_12, %c0_13] : memref<128x128xbf16, #tpu.memory_space<vmem>>, vector<128x128xbf16>
    %cst_14 = arith.constant dense<0.000000e+00> : vector<2x128xf32>
    %14 = tpu.matmul %12, %13, %cst_14 {dimension_numbers = #tpu.dot_dimension_numbers<[1], [0], [0], [1], [0, 0, 1, 1], [], []>} : vector<2x128xbf16>, vector<128x128xbf16>, vector<2x128xf32> -> vector<2x128xf32>
    %15 = arith.truncf %11 : vector<2x128xf32> to vector<2x128xbf16>
    %c0_15 = arith.constant 0 : index
    %c0_16 = arith.constant 0 : index
    %16 = vector.load %arg8[%c0_15, %c0_16] : memref<128x128xbf16, #tpu.memory_space<vmem>>, vector<128x128xbf16>
    %cst_17 = arith.constant dense<0.000000e+00> : vector<2x128xf32>
    %17 = tpu.matmul %15, %16, %cst_17 {dimension_numbers = #tpu.dot_dimension_numbers<[1], [0], [0], [1], [0, 0, 1, 1], [], []>} : vector<2x128xbf16>, vector<128x128xbf16>, vector<2x128xf32> -> vector<2x128xf32>
    %18 = arith.addf %14, %17 : vector<2x128xf32>
    %c0_18 = arith.constant 0 : index
    %c0_19 = arith.constant 0 : index
    %19 = vector.load %arg9[%c0_18, %c0_19] : memref<1x128xf32, #tpu.memory_space<vmem>>, vector<1x128xf32>
    %20 = vector.broadcast %19 : vector<1x128xf32> to vector<2x128xf32>
    %21 = arith.addf %18, %20 : vector<2x128xf32>
    %cst_20 = arith.constant 0.000000e+00 : f32
    %22 = vector.broadcast %cst_20 : f32 to vector<2x128xf32>
    %23 = arith.maximumf %21, %22 : vector<2x128xf32>
    %c0_21 = arith.constant 0 : index
    %c0_22 = arith.constant 0 : index
    %24 = vector.load %arg10[%c0_21, %c0_22] : memref<1x128xf32, #tpu.memory_space<vmem>>, vector<1x128xf32>
    %25 = vector.broadcast %24 : vector<1x128xf32> to vector<2x128xf32>
    %26 = arith.mulf %23, %25 : vector<2x128xf32>
    %c0_23 = arith.constant 0 : index
    %c0_24 = arith.constant 0 : index
    %27 = vector.load %arg11[%c0_23, %c0_24] : memref<1x128xf32, #tpu.memory_space<vmem>>, vector<1x128xf32>
    %28 = vector.broadcast %27 : vector<1x128xf32> to vector<2x128xf32>
    %29 = arith.addf %26, %28 : vector<2x128xf32>
    %30 = arith.truncf %29 : vector<2x128xf32> to vector<2x128xbf16>
    %c0_25 = arith.constant 0 : index
    %c0_26 = arith.constant 0 : index
    %31 = vector.load %arg12[%c0_25, %c0_26] : memref<128x64xbf16, #tpu.memory_space<vmem>>, vector<128x64xbf16>
    %cst_27 = arith.constant dense<0.000000e+00> : vector<2x64xf32>
    %32 = tpu.matmul %30, %31, %cst_27 {dimension_numbers = #tpu.dot_dimension_numbers<[1], [0], [0], [1], [0, 0, 1, 1], [], []>} : vector<2x128xbf16>, vector<128x64xbf16>, vector<2x64xf32> -> vector<2x64xf32>
    %c0_28 = arith.constant 0 : index
    %c0_29 = arith.constant 0 : index
    %33 = vector.load %arg13[%c0_28, %c0_29] : memref<1x64xf32, #tpu.memory_space<vmem>>, vector<1x64xf32>
    %34 = vector.broadcast %33 : vector<1x64xf32> to vector<2x64xf32>
    %35 = arith.addf %32, %34 : vector<2x64xf32>
    %cst_30 = arith.constant 0.000000e+00 : f32
    %36 = vector.broadcast %cst_30 : f32 to vector<2x64xf32>
    %37 = arith.maximumf %35, %36 : vector<2x64xf32>
    %c0_31 = arith.constant 0 : index
    %c0_32 = arith.constant 0 : index
    %38 = vector.load %arg14[%c0_31, %c0_32] : memref<1x64xf32, #tpu.memory_space<vmem>>, vector<1x64xf32>
    %39 = vector.broadcast %38 : vector<1x64xf32> to vector<2x64xf32>
    %40 = arith.mulf %37, %39 : vector<2x64xf32>
    %c0_33 = arith.constant 0 : index
    %c0_34 = arith.constant 0 : index
    %41 = vector.load %arg15[%c0_33, %c0_34] : memref<1x64xf32, #tpu.memory_space<vmem>>, vector<1x64xf32>
    %42 = vector.broadcast %41 : vector<1x64xf32> to vector<2x64xf32>
    %43 = arith.addf %40, %42 : vector<2x64xf32>
    %44 = arith.truncf %43 : vector<2x64xf32> to vector<2x64xbf16>
    %c0_35 = arith.constant 0 : index
    %c0_36 = arith.constant 0 : index
    %45 = vector.load %arg16[%c0_35, %c0_36] : memref<64x10xbf16, #tpu.memory_space<vmem>>, vector<64x10xbf16>
    %cst_37 = arith.constant dense<0.000000e+00> : vector<2x10xf32>
    %46 = tpu.matmul %44, %45, %cst_37 {dimension_numbers = #tpu.dot_dimension_numbers<[1], [0], [0], [1], [0, 0, 1, 1], [], []>} : vector<2x64xbf16>, vector<64x10xbf16>, vector<2x10xf32> -> vector<2x10xf32>
    %c0_38 = arith.constant 0 : index
    %c0_39 = arith.constant 0 : index
    %47 = vector.load %arg17[%c0_38, %c0_39] : memref<1x10xf32, #tpu.memory_space<vmem>>, vector<1x10xf32>
    %48 = vector.broadcast %47 : vector<1x10xf32> to vector<2x10xf32>
    %49 = arith.addf %46, %48 : vector<2x10xf32>
    %cst_40 = arith.constant dense<0xFF800000> : vector<2xf32>
    %50 = vector.multi_reduction <maximumf>, %49, %cst_40 [1] : vector<2x10xf32> to vector<2xf32>
    %51 = vector.shape_cast %50 : vector<2xf32> to vector<2x1xf32>
    %52 = vector.broadcast %51 : vector<2x1xf32> to vector<2x10xf32>
    %53 = arith.subf %49, %52 : vector<2x10xf32>
    %54 = math.exp %53 : vector<2x10xf32>
    %cst_41 = arith.constant dense<0.000000e+00> : vector<2xf32>
    %55 = vector.multi_reduction <add>, %54, %cst_41 [1] : vector<2x10xf32> to vector<2xf32>
    %56 = vector.shape_cast %55 : vector<2xf32> to vector<2x1xf32>
    %57 = tpu.reciprocal %56 : vector<2x1xf32> -> vector<2x1xf32>
    %58 = vector.broadcast %57 : vector<2x1xf32> to vector<2x10xf32>
    %59 = arith.mulf %54, %58 : vector<2x10xf32>
    %c0_42 = arith.constant 0 : index
    %c0_43 = arith.constant 0 : index
    %60 = vector.load %arg18[%c0_42, %c0_43] : memref<2x10xf32, #tpu.memory_space<vmem>>, vector<2x10xf32>
    tpu.vector_store %arg18[%c0_42, %c0_43], %59 {strides = array<i32>} : memref<2x10xf32, #tpu.memory_space<vmem>>, vector<2x10xf32>,
    return
  }
  func.func @transform_0(%arg0: i32) -> (i32, i32) {
    %c0_i32 = arith.constant 0 : i32
    %c0_i32_0 = arith.constant 0 : i32
    return %arg0, %c0_i32 : i32, i32
  }
  func.func @transform_1(%arg0: i32) -> (i32, i32) {
    %c0_i32 = arith.constant 0 : i32
    %c0_i32_0 = arith.constant 0 : i32
    return %arg0, %c0_i32 : i32, i32
  }
  func.func @transform_2(%arg0: i32) -> (i32, i32) {
    %c0_i32 = arith.constant 0 : i32
    %c0_i32_0 = arith.constant 0 : i32
    %c0_i32_1 = arith.constant 0 : i32
    return %c0_i32, %c0_i32_0 : i32, i32
  }
  func.func @transform_3(%arg0: i32) -> (i32, i32) {
    %c0_i32 = arith.constant 0 : i32
    %c0_i32_0 = arith.constant 0 : i32
    %c0_i32_1 = arith.constant 0 : i32
    return %c0_i32, %c0_i32_0 : i32, i32
  }
  func.func @transform_4(%arg0: i32) -> (i32, i32) {
    %c0_i32 = arith.constant 0 : i32
    %c0_i32_0 = arith.constant 0 : i32
    %c0_i32_1 = arith.constant 0 : i32
    return %c0_i32, %c0_i32_0 : i32, i32
  }
  func.func @transform_5(%arg0: i32) -> (i32, i32) {
    %c0_i32 = arith.constant 0 : i32
    %c0_i32_0 = arith.constant 0 : i32
    %c0_i32_1 = arith.constant 0 : i32
    return %c0_i32, %c0_i32_0 : i32, i32
  }
  func.func @transform_6(%arg0: i32) -> (i32, i32) {
    %c0_i32 = arith.constant 0 : i32
    %c0_i32_0 = arith.constant 0 : i32
    %c0_i32_1 = arith.constant 0 : i32
    return %c0_i32, %c0_i32_0 : i32, i32
  }
  func.func @transform_7(%arg0: i32) -> (i32, i32) {
    %c0_i32 = arith.constant 0 : i32
    %c0_i32_0 = arith.constant 0 : i32
    %c0_i32_1 = arith.constant 0 : i32
    return %c0_i32, %c0_i32_0 : i32, i32
  }
  func.func @transform_8(%arg0: i32) -> (i32, i32) {
    %c0_i32 = arith.constant 0 : i32
    %c0_i32_0 = arith.constant 0 : i32
    %c0_i32_1 = arith.constant 0 : i32
    return %c0_i32, %c0_i32_0 : i32, i32
  }
  func.func @transform_9(%arg0: i32) -> (i32, i32) {
    %c0_i32 = arith.constant 0 : i32
    %c0_i32_0 = arith.constant 0 : i32
    %c0_i32_1 = arith.constant 0 : i32
    return %c0_i32, %c0_i32_0 : i32, i32
  }
  func.func @transform_10(%arg0: i32) -> (i32, i32) {
    %c0_i32 = arith.constant 0 : i32
    %c0_i32_0 = arith.constant 0 : i32
    %c0_i32_1 = arith.constant 0 : i32
    return %c0_i32, %c0_i32_0 : i32, i32
  }
  func.func @transform_11(%arg0: i32) -> (i32, i32) {
    %c0_i32 = arith.constant 0 : i32
    %c0_i32_0 = arith.constant 0 : i32
    %c0_i32_1 = arith.constant 0 : i32
    return %c0_i32, %c0_i32_0 : i32, i32
  }
  func.func @transform_12(%arg0: i32) -> (i32, i32) {
    %c0_i32 = arith.constant 0 : i32
    %c0_i32_0 = arith.constant 0 : i32
    %c0_i32_1 = arith.constant 0 : i32
    return %c0_i32, %c0_i32_0 : i32, i32
  }
  func.func @transform_13(%arg0: i32) -> (i32, i32) {
    %c0_i32 = arith.constant 0 : i32
    %c0_i32_0 = arith.constant 0 : i32
    %c0_i32_1 = arith.constant 0 : i32
    return %c0_i32, %c0_i32_0 : i32, i32
  }
  func.func @transform_14(%arg0: i32) -> (i32, i32) {
    %c0_i32 = arith.constant 0 : i32
    %c0_i32_0 = arith.constant 0 : i32
    %c0_i32_1 = arith.constant 0 : i32
    return %c0_i32, %c0_i32_0 : i32, i32
  }
  func.func @transform_15(%arg0: i32) -> (i32, i32) {
    %c0_i32 = arith.constant 0 : i32
    %c0_i32_0 = arith.constant 0 : i32
    %c0_i32_1 = arith.constant 0 : i32
    return %c0_i32, %c0_i32_0 : i32, i32
  }
  func.func @transform_16(%arg0: i32) -> (i32, i32) {
    %c0_i32 = arith.constant 0 : i32
    %c0_i32_0 = arith.constant 0 : i32
    %c0_i32_1 = arith.constant 0 : i32
    return %c0_i32, %c0_i32_0 : i32, i32
  }
  func.func @transform_17(%arg0: i32) -> (i32, i32) {
    %c0_i32 = arith.constant 0 : i32
    %c0_i32_0 = arith.constant 0 : i32
    return %arg0, %c0_i32 : i32, i32
  }
}

</mosaic_0001>

<bundles_post_ra>
// kernel: forward.3
= control target key start
LH: loop header
LB: loop body
LE: loop exit
PB: predicated region body
PF: predicated region fallthrough
CT: control target
= control target key end

     0   :  { %v2055_v1 = vmov 0   ;;  %vm311_vm0 = vcmask 392192   ;;  %vm1697_vm1 = vcmask 257024   ;;  %s2666_s1 = inlined_call_operand.vmem [shape: bf16[48,512], index: 1, kind: input, shape index: {}]   ;;  %s2667_s0 = inlined_call_operand.vmem [shape: bf16[512,48], index: 0, kind: input, shape index: {}]   ;;  %s2668_s2 = inlined_call_operand.vmem [shape: f32[1,32], index: 2, kind: input, shape index: {}]   ;;  %s2669_s3 = inlined_call_operand.vmem [shape: bf16[512,32], index: 3, kind: output, shape index: {}]  }
   0x1   :  { %v2004_v0 = vld [vmem:[%s2666_s1 + $0x4] ss:$16 sps:$4 sm:$0xff]   ;;  %440 = vmatprep.mubr.bf16.mxu0 %v2055_v1  ;;  %793 = vmatprep.mubr.bf16.mxu1 %v2055_v1  ;;  %v2006_v2 = vld [vmem:[%s2666_s1 + $0xc] ss:$16 sps:$4 sm:$0xff]   ;;  %v2008_v3 = vld [vmem:[%s2666_s1] ss:$16 sps:$4 sm:$0xff]  }
   0x2   :  { %408 = vmatprep.subr.bf16.mxu0 %v2004_v0  ;;  %v2009_v4 = vld [vmem:[%s2666_s1 + $0x8] ss:$16 sps:$4 sm:$0xff]   ;;  %761 = vmatprep.subr.bf16.mxu1 %v2006_v2  ;;  %v2010_v5 = vld [vmem:[%s2666_s1 + $0x24] ss:$16 sps:$4 sm:$0xff]   ;;  %v2012_v6 = vld [vmem:[%s2666_s1 + $0x2c] ss:$16 sps:$4 sm:$0xff]  }
   0x3   :  { %409 = vmatpush1.bf16.msra.mxu0 %v2008_v3  ;;  %762 = vmatpush1.bf16.msra.mxu1 %v2009_v4  ;;  %v2014_v7 = vld [vmem:[%s2666_s1 + $0x20] ss:$16 sps:$4 sm:$0xff]   ;;  %v2015_v8 = vld [vmem:[%s2666_s1 + $0x28] ss:$16 sps:$4 sm:$0xff]   ;;  %v2016_v9 = vld [vmem:[%s2666_s1 + $0x44] ss:$16 sps:$4 sm:$0xff]  }
   0x4   :  { %410 = vmatprep.subr.bf16.mxu0 %v2010_v5  ;;  %763 = vmatprep.subr.bf16.mxu1 %v2012_v6  ;;  %v2018_v10 = vld [vmem:[%s2666_s1 + $0x4c] ss:$16 sps:$4 sm:$0xff]   ;;  %v2020_v11 = vld [vmem:[%s2666_s1 + $0x40] ss:$16 sps:$4 sm:$0xff]   ;;  %v2021_v12 = vld [vmem:[%s2666_s1 + $0x48] ss:$16 sps:$4 sm:$0xff]  }
   0x5   :  { %v2022_v13 = vld [vmem:[%s2667_s0] sm:$0xff]   ;;  %v2023_v14 = vld [vmem:[%s2667_s0 + $0x8] sm:$0xff]   ;;  %v2024_v15 = vld [vmem:[%s2667_s0 + $0x10] sm:$0xff]  }
   0x6   :  { %v2025_v16 = vld [vmem:[%s2667_s0 + $0x18] sm:$0xff]   ;;  %v2026_v17 = vld [vmem:[%s2667_s0 + $0x20] sm:$0xff]   ;;  %v2027_v18 = vld [vmem:[%s2667_s0 + $0x28] sm:$0xff]  }
   0x7   :  { %411 = vmatpush1.bf16.msra.mxu0 %v2014_v7  ;;  %764 = vmatpush1.bf16.msra.mxu1 %v2015_v8  ;;  %v2028_v19 = vld [vmem:[%s2667_s0 + $0x30] sm:$0xff]   ;;  %v2029_v20 = vld [vmem:[%s2667_s0 + $0x38] sm:$0xff]   ;;  %v2030_v21 = vld [vmem:[%s2667_s0 + $0x40] sm:$0xff]  }
   0x8   :  { %412 = vmatprep.subr.bf16.mxu0 %v2016_v9  ;;  %765 = vmatprep.subr.bf16.mxu1 %v2018_v10  ;;  %v2031_v22 = vld [vmem:[%s2667_s0 + $0x48] sm:$0xff]   ;;  %v2032_v23 = vld [vmem:[%s2667_s0 + $0x50] sm:$0xff]   ;;  %v2033_v24 = vld [vmem:[%s2667_s0 + $0x58] sm:$0xff]  }
   0x9   :  { %v2034_v25 = vld [vmem:[%s2667_s0 + $0x60] sm:$0xff]   ;;  %v2035_v26 = vld [vmem:[%s2667_s0 + $0x68] sm:$0xff]   ;;  %v2036_v27 = vld [vmem:[%s2667_s0 + $0x70] sm:$0xff]  }
   0xa   :  { %v2037_v28 = vld [vmem:[%s2667_s0 + $0x78] sm:$0xff]   ;;  %v2038_v29 = vld [vmem:[%s2667_s0 + $0x80] sm:$0xff]   ;;  %v2039_v30 = vld [vmem:[%s2667_s0 + $0x88] sm:$0xff]  }
   0xb   :  { %413 = vmatpush1.bf16.msra.mxu0 %v2020_v11  ;;  %766 = vmatpush1.bf16.msra.mxu1 %v2021_v12  ;;  %v2040_v31 = vld [vmem:[%s2667_s0 + $0x90] sm:$0xff]   ;;  %v2041_v32 = vld [vmem:[%s2667_s0 + $0x98] sm:$0xff]   ;;  %v2042_v33 = vld [vmem:[%s2667_s0 + $0xa0] sm:$0xff]  }
   0xc   :  { %v2043_v34 = vld [vmem:[%s2667_s0 + $0xa8] sm:$0xff]   ;;  %v2044_v35 = vld [vmem:[%s2667_s0 + $0xb0] sm:$0xff]   ;;  %v2045_v36 = vld [vmem:[%s2667_s0 + $0xb8] sm:$0xff]  }
   0xd   :  { %v2046_v37 = vld [vmem:[%s2667_s0 + $0xc0] sm:$0xff]   ;;  %v2047_v38 = vld [vmem:[%s2667_s0 + $0xc8] sm:$0xff]   ;;  %v2048_v39 = vld [vmem:[%s2667_s0 + $0xd0] sm:$0xff]  }
   0xe   :  { %1810 = vmatmul.mubr.msk.bf16.vlgmr.msra.gmra.mrb[0].mxu0 %vm311_vm0, %v2022_v13  ;;  %1842 = vmatmul.mubr.msk.bf16.vlgmr.msra.gmra.mrb[0].mxu1 %vm311_vm0, %v2022_v13  ;;  %v2049_v44 = vld [vmem:[%s2667_s0 + $0xd8] sm:$0xff]   ;;  %v2309_v49 = vld [vmem:[%s2668_s2] ss:$0 sm:$0xff] }
   0xf   :  { %450 = vmatprep.mubr.bf16.mxu0 %v2055_v1  ;;  %803 = vmatprep.mubr.bf16.mxu1 %v2055_v1  ;;  %v2050_v63 = vld [vmem:[%s2667_s0 + $0xe0] sm:$0xff]  }
  0x16   :  { %1811 = vmatmul.mubr.msk.bf16.gmra.mrb[4].mxu0 %vm311_vm0, %v2023_v14  ;;  %1843 = vmatmul.mubr.msk.bf16.gmra.mrb[4].mxu1 %vm311_vm0, %v2023_v14 }
  0x17   :  { %460 = vmatprep.mubr.bf16.mxu0 %v2055_v1  ;;  %813 = vmatprep.mubr.bf16.mxu1 %v2055_v1 }
  0x1e   :  { %1812 = vmatmul.mubr.msk.bf16.gmra.mrb[8].mxu0 %vm311_vm0, %v2024_v15  ;;  %1844 = vmatmul.mubr.msk.bf16.gmra.mrb[8].mxu1 %vm311_vm0, %v2024_v15 }
  0x1f   :  { %470 = vmatprep.mubr.bf16.mxu0 %v2055_v1  ;;  %823 = vmatprep.mubr.bf16.mxu1 %v2055_v1 }
  0x26   :  { %1813 = vmatmul.mubr.msk.bf16.gmra.mrb[12].mxu0 %vm311_vm0, %v2025_v16  ;;  %1845 = vmatmul.mubr.msk.bf16.gmra.mrb[12].mxu1 %vm311_vm0, %v2025_v16 }
  0x27   :  { %480 = vmatprep.mubr.bf16.mxu0 %v2055_v1  ;;  %833 = vmatprep.mubr.bf16.mxu1 %v2055_v1 }
  0x2e   :  { %1814 = vmatmul.mubr.msk.bf16.gmra.mrb[16].mxu0 %vm311_vm0, %v2026_v17  ;;  %1846 = vmatmul.mubr.msk.bf16.gmra.mrb[16].mxu1 %vm311_vm0, %v2026_v17 }
  0x2f   :  { %490 = vmatprep.mubr.bf16.mxu0 %v2055_v1  ;;  %843 = vmatprep.mubr.bf16.mxu1 %v2055_v1 }
  0x36   :  { %1815 = vmatmul.mubr.msk.bf16.gmra.mrb[20].mxu0 %vm311_vm0, %v2027_v18  ;;  %1847 = vmatmul.mubr.msk.bf16.gmra.mrb[20].mxu1 %vm311_vm0, %v2027_v18 }
  0x37   :  { %500 = vmatprep.mubr.bf16.mxu0 %v2055_v1  ;;  %853 = vmatprep.mubr.bf16.mxu1 %v2055_v1 }
  0x3e   :  { %1816 = vmatmul.mubr.msk.bf16.gmra.mrb[24].mxu0 %vm311_vm0, %v2028_v19  ;;  %1848 = vmatmul.mubr.msk.bf16.gmra.mrb[24].mxu1 %vm311_vm0, %v2028_v19 }
  0x3f   :  { %510 = vmatprep.mubr.bf16.mxu0 %v2055_v1  ;;  %863 = vmatprep.mubr.bf16.mxu1 %v2055_v1 }
  0x46   :  { %1817 = vmatmul.mubr.msk.bf16.gmra.mrb[28].mxu0 %vm311_vm0, %v2029_v20  ;;  %1849 = vmatmul.mubr.msk.bf16.gmra.mrb[28].mxu1 %vm311_vm0, %v2029_v20 }
  0x47   :  { %520 = vmatprep.mubr.bf16.mxu0 %v2055_v1  ;;  %873 = vmatprep.mubr.bf16.mxu1 %v2055_v1 }
  0x4e   :  { %1818 = vmatmul.mubr.msk.bf16.gmra.mrb[32].mxu0 %vm311_vm0, %v2030_v21  ;;  %1850 = vmatmul.mubr.msk.bf16.gmra.mrb[32].mxu1 %vm311_vm0, %v2030_v21  ;;  %v2051_v21 = vld [vmem:[%s2667_s0 + $0xe8] sm:$0xff]  }
  0x4f   :  { %530 = vmatprep.mubr.bf16.mxu0 %v2055_v1  ;;  %883 = vmatprep.mubr.bf16.mxu1 %v2055_v1 }
  0x56   :  { %1819 = vmatmul.mubr.msk.bf16.gmra.mrb[36].mxu0 %vm311_vm0, %v2031_v22  ;;  %1851 = vmatmul.mubr.msk.bf16.gmra.mrb[36].mxu1 %vm311_vm0, %v2031_v22 }
  0x57   :  { %540 = vmatprep.mubr.bf16.mxu0 %v2055_v1  ;;  %893 = vmatprep.mubr.bf16.mxu1 %v2055_v1 }
  0x5e   :  { %1820 = vmatmul.mubr.msk.bf16.gmra.mrb[40].mxu0 %vm311_vm0, %v2032_v23  ;;  %1852 = vmatmul.mubr.msk.bf16.gmra.mrb[40].mxu1 %vm311_vm0, %v2032_v23 }
  0x5f   :  { %550 = vmatprep.mubr.bf16.mxu0 %v2055_v1  ;;  %903 = vmatprep.mubr.bf16.mxu1 %v2055_v1 }
  0x66   :  { %1821 = vmatmul.mubr.msk.bf16.gmra.mrb[44].mxu0 %vm311_vm0, %v2033_v24  ;;  %1853 = vmatmul.mubr.msk.bf16.gmra.mrb[44].mxu1 %vm311_vm0, %v2033_v24 }
  0x67   :  { %560 = vmatprep.mubr.bf16.mxu0 %v2055_v1  ;;  %913 = vmatprep.mubr.bf16.mxu1 %v2055_v1 }
  0x6e   :  { %1822 = vmatmul.mubr.msk.bf16.gmra.mrb[48].mxu0 %vm311_vm0, %v2034_v25  ;;  %1854 = vmatmul.mubr.msk.bf16.gmra.mrb[48].mxu1 %vm311_vm0, %v2034_v25 }
  0x6f   :  { %570 = vmatprep.mubr.bf16.mxu0 %v2055_v1  ;;  %923 = vmatprep.mubr.bf16.mxu1 %v2055_v1 }
  0x76   :  { %1823 = vmatmul.mubr.msk.bf16.gmra.mrb[52].mxu0 %vm311_vm0, %v2035_v26  ;;  %1855 = vmatmul.mubr.msk.bf16.gmra.mrb[52].mxu1 %vm311_vm0, %v2035_v26 }
  0x77   :  { %580 = vmatprep.mubr.bf16.mxu0 %v2055_v1  ;;  %933 = vmatprep.mubr.bf16.mxu1 %v2055_v1 }
  0x7e   :  { %1824 = vmatmul.mubr.msk.bf16.gmra.mrb[56].mxu0 %vm311_vm0, %v2036_v27  ;;  %1856 = vmatmul.mubr.msk.bf16.gmra.mrb[56].mxu1 %vm311_vm0, %v2036_v27 }
  0x7f   :  { %590 = vmatprep.mubr.bf16.mxu0 %v2055_v1  ;;  %943 = vmatprep.mubr.bf16.mxu1 %v2055_v1 }
  0x86   :  { %1825 = vmatmul.mubr.msk.bf16.gmra.mrb[60].mxu0 %vm311_vm0, %v2037_v28  ;;  %1857 = vmatmul.mubr.msk.bf16.gmra.mrb[60].mxu1 %vm311_vm0, %v2037_v28 }
  0x87   :  { %600 = vmatprep.mubr.bf16.mxu0 %v2055_v1  ;;  %953 = vmatprep.mubr.bf16.mxu1 %v2055_v1 }
  0x8e   :  { %1826 = vmatmul.mubr.msk.bf16.gmra.mrb[64].mxu0 %vm311_vm0, %v2038_v29  ;;  %1858 = vmatmul.mubr.msk.bf16.gmra.mrb[64].mxu1 %vm311_vm0, %v2038_v29 }
  0x8f   :  { %610 = vmatprep.mubr.bf16.mxu0 %v2055_v1  ;;  %963 = vmatprep.mubr.bf16.mxu1 %v2055_v1 }
  0x96   :  { %1827 = vmatmul.mubr.msk.bf16.gmra.mrb[68].mxu0 %vm311_vm0, %v2039_v30  ;;  %1859 = vmatmul.mubr.msk.bf16.gmra.mrb[68].mxu1 %vm311_vm0, %v2039_v30 }
  0x97   :  { %620 = vmatprep.mubr.bf16.mxu0 %v2055_v1  ;;  %973 = vmatprep.mubr.bf16.mxu1 %v2055_v1 }
  0x9e   :  { %1828 = vmatmul.mubr.msk.bf16.gmra.mrb[72].mxu0 %vm311_vm0, %v2040_v31  ;;  %1860 = vmatmul.mubr.msk.bf16.gmra.mrb[72].mxu1 %vm311_vm0, %v2040_v31 }
  0x9f   :  { %630 = vmatprep.mubr.bf16.mxu0 %v2055_v1  ;;  %983 = vmatprep.mubr.bf16.mxu1 %v2055_v1 }
  0xa6   :  { %1829 = vmatmul.mubr.msk.bf16.gmra.mrb[76].mxu0 %vm311_vm0, %v2041_v32  ;;  %1861 = vmatmul.mubr.msk.bf16.gmra.mrb[76].mxu1 %vm311_vm0, %v2041_v32 }
  0xa7   :  { %640 = vmatprep.mubr.bf16.mxu0 %v2055_v1  ;;  %993 = vmatprep.mubr.bf16.mxu1 %v2055_v1 }
  0xae   :  { %1830 = vmatmul.mubr.msk.bf16.gmra.mrb[80].mxu0 %vm311_vm0, %v2042_v33  ;;  %1862 = vmatmul.mubr.msk.bf16.gmra.mrb[80].mxu1 %vm311_vm0, %v2042_v33 }
  0xaf   :  { %650 = vmatprep.mubr.bf16.mxu0 %v2055_v1  ;;  %1003 = vmatprep.mubr.bf16.mxu1 %v2055_v1 }
  0xb6   :  { %1831 = vmatmul.mubr.msk.bf16.gmra.mrb[84].mxu0 %vm311_vm0, %v2043_v34  ;;  %1863 = vmatmul.mubr.msk.bf16.gmra.mrb[84].mxu1 %vm311_vm0, %v2043_v34 }
  0xb7   :  { %660 = vmatprep.mubr.bf16.mxu0 %v2055_v1  ;;  %1013 = vmatprep.mubr.bf16.mxu1 %v2055_v1 }
  0xbe   :  { %1832 = vmatmul.mubr.msk.bf16.gmra.mrb[88].mxu0 %vm311_vm0, %v2044_v35  ;;  %1864 = vmatmul.mubr.msk.bf16.gmra.mrb[88].mxu1 %vm311_vm0, %v2044_v35 }
  0xbf   :  { %670 = vmatprep.mubr.bf16.mxu0 %v2055_v1  ;;  %1023 = vmatprep.mubr.bf16.mxu1 %v2055_v1 }
  0xc6   :  { %1833 = vmatmul.mubr.msk.bf16.gmra.mrb[92].mxu0 %vm311_vm0, %v2045_v36  ;;  %1865 = vmatmul.mubr.msk.bf16.gmra.mrb[92].mxu1 %vm311_vm0, %v2045_v36 }
  0xc7   :  { %680 = vmatprep.mubr.bf16.mxu0 %v2055_v1  ;;  %1033 = vmatprep.mubr.bf16.mxu1 %v2055_v1 }
  0xce   :  { %1834 = vmatmul.mubr.msk.bf16.gmra.mrb[96].mxu0 %vm311_vm0, %v2046_v37  ;;  %1866 = vmatmul.mubr.msk.bf16.gmra.mrb[96].mxu1 %vm311_vm0, %v2046_v37 }
  0xcf   :  { %690 = vmatprep.mubr.bf16.mxu0 %v2055_v1  ;;  %1043 = vmatprep.mubr.bf16.mxu1 %v2055_v1 }
  0xd6   :  { %1835 = vmatmul.mubr.msk.bf16.gmra.mrb[100].mxu0 %vm311_vm0, %v2047_v38  ;;  %1867 = vmatmul.mubr.msk.bf16.gmra.mrb[100].mxu1 %vm311_vm0, %v2047_v38 }
  0xd7   :  { %700 = vmatprep.mubr.bf16.mxu0 %v2055_v1  ;;  %1053 = vmatprep.mubr.bf16.mxu1 %v2055_v1 }
  0xde   :  { %1836 = vmatmul.mubr.msk.bf16.gmra.mrb[104].mxu0 %vm311_vm0, %v2048_v39  ;;  %1868 = vmatmul.mubr.msk.bf16.gmra.mrb[104].mxu1 %vm311_vm0, %v2048_v39 }
  0xdf   :  { %710 = vmatprep.mubr.bf16.mxu0 %v2055_v1  ;;  %1063 = vmatprep.mubr.bf16.mxu1 %v2055_v1 }
  0xe1   :  { %v442_v40 = vpop.f32.mrb[0].mxu0  ;;  %v795_v41 = vpop.f32.mrb[0].mxu1 }
  0xe2   :  { %v444_v42 = vpop.f32.mrb[1].mxu0  ;;  %v797_v43 = vpop.f32.mrb[1].mxu1 }
  0xe3   :  { %v1114_v45 = vmax.f32 %v442_v40, %v444_v42  ;;  %v1178_v46 = vmax.f32 %v795_v41, %v797_v43  ;;  %v446_v47 = vpop.f32.mrb[2].mxu0  ;;  %v799_v48 = vpop.f32.mrb[2].mxu1  ;;  %v2052_v42 = vld [vmem:[%s2667_s0 + $0xf0] sm:$0xff]  }
  0xe4   :  { %v448_v50 = vpop.f32.mrb[3].mxu0  ;;  %v801_v51 = vpop.f32.mrb[3].mxu1 }
  0xe5   :  { %v1242_v52 = vmax.f32 %v1114_v45, %v1178_v46  ;;  %v1115_v53 = vmax.f32 %v446_v47, %v448_v50  ;;  %v1179_v54 = vmax.f32 %v799_v48, %v801_v51 }
  0xe6   :  { %1837 = vmatmul.mubr.msk.bf16.gmra.mrb[108].mxu0 %vm311_vm0, %v2049_v44  ;;  %1869 = vmatmul.mubr.msk.bf16.gmra.mrb[108].mxu1 %vm311_vm0, %v2049_v44 }
  0xe7   :  { %v1313_v55 = vadd.f32 %v2309_v49, %v1242_v52  ;;  %v1243_v56 = vmax.f32 %v1115_v53, %v1179_v54  ;;  %720 = vmatprep.mubr.bf16.mxu0 %v2055_v1  ;;  %1073 = vmatprep.mubr.bf16.mxu1 %v2055_v1 }
  0xe9   :  { %v1377_v57 = vmax.f32 %v1313_v55, 0.0  ;;  %v1314_v58 = vadd.f32 %v2309_v49, %v1243_v56  ;;  %v452_v59 = vpop.f32.mrb[4].mxu0  ;;  %v805_v60 = vpop.f32.mrb[4].mxu1 }
  0xea   :  { %v454_v61 = vpop.f32.mrb[5].mxu0  ;;  %v807_v62 = vpop.f32.mrb[5].mxu1 }
  0xeb   :  { %v1939_v0 = vpack.c.bf16 %v1377_v57, %v1377_v57  ;;  %v1378_v2 = vmax.f32 %v1314_v58, 0.0  ;;  %v1116_v3 = vmax.f32 %v452_v59, %v454_v61  ;;  %v1180_v4 = vmax.f32 %v805_v60, %v807_v62  ;;  %v456_v5 = vpop.f32.mrb[6].mxu0  ;;  %v809_v6 = vpop.f32.mrb[6].mxu1 }
  0xec   :  { %v458_v7 = vpop.f32.mrb[7].mxu0  ;;  %v811_v8 = vpop.f32.mrb[7].mxu1 }
  0xed   :  { %1698 = vst.msk [vmem:[%s2669_s3] sm:$0xf] %vm1697_vm1, %v1939_v0  ;;  %v1940_v9 = vpack.c.bf16 %v1378_v2, %v1378_v2  ;;  %v1244_v10 = vmax.f32 %v1116_v3, %v1180_v4  ;;  %v1117_v11 = vmax.f32 %v456_v5, %v458_v7  ;;  %v1181_v12 = vmax.f32 %v809_v6, %v811_v8  ;;  %v2053_v0 = vld [vmem:[%s2667_s0 + $0xf8] sm:$0xff]  }
  0xee   :  { %1838 = vmatmul.mubr.msk.bf16.gmra.mrb[112].mxu0 %vm311_vm0, %v2050_v63  ;;  %1870 = vmatmul.mubr.msk.bf16.gmra.mrb[112].mxu1 %vm311_vm0, %v2050_v63 }
  0xef   :  { %1699 = vst.msk [vmem:[%s2669_s3 + $0x4] sm:$0xf] %vm1697_vm1, %v1940_v9  ;;  %v1315_v13 = vadd.f32 %v2309_v49, %v1244_v10  ;;  %v1245_v14 = vmax.f32 %v1117_v11, %v1181_v12  ;;  %730 = vmatprep.mubr.bf16.mxu0 %v2055_v1  ;;  %1083 = vmatprep.mubr.bf16.mxu1 %v2055_v1 }
  0xf1   :  { %v1379_v15 = vmax.f32 %v1315_v13, 0.0  ;;  %v1316_v16 = vadd.f32 %v2309_v49, %v1245_v14  ;;  %v462_v17 = vpop.f32.mrb[8].mxu0  ;;  %v815_v18 = vpop.f32.mrb[8].mxu1 }
  0xf2   :  { %v464_v19 = vpop.f32.mrb[9].mxu0  ;;  %v817_v20 = vpop.f32.mrb[9].mxu1 }
  0xf3   :  { %v1941_v22 = vpack.c.bf16 %v1379_v15, %v1379_v15  ;;  %v1380_v23 = vmax.f32 %v1316_v16, 0.0  ;;  %v1118_v24 = vmax.f32 %v462_v17, %v464_v19  ;;  %v1182_v25 = vmax.f32 %v815_v18, %v817_v20  ;;  %v466_v26 = vpop.f32.mrb[10].mxu0  ;;  %v819_v27 = vpop.f32.mrb[10].mxu1 }
  0xf4   :  { %v468_v28 = vpop.f32.mrb[11].mxu0  ;;  %v821_v29 = vpop.f32.mrb[11].mxu1 }
  0xf5   :  { %1700 = vst.msk [vmem:[%s2669_s3 + $0x8] sm:$0xf] %vm1697_vm1, %v1941_v22  ;;  %v1942_v30 = vpack.c.bf16 %v1380_v23, %v1380_v23  ;;  %v1246_v31 = vmax.f32 %v1118_v24, %v1182_v25  ;;  %v1119_v32 = vmax.f32 %v466_v26, %v468_v28  ;;  %v1183_v33 = vmax.f32 %v819_v27, %v821_v29 }
  0xf6   :  { %1839 = vmatmul.mubr.msk.bf16.gmra.mrb[116].mxu0 %vm311_vm0, %v2051_v21  ;;  %1871 = vmatmul.mubr.msk.bf16.gmra.mrb[116].mxu1 %vm311_vm0, %v2051_v21 }
  0xf7   :  { %1701 = vst.msk [vmem:[%s2669_s3 + $0xc] sm:$0xf] %vm1697_vm1, %v1942_v30  ;;  %v1317_v34 = vadd.f32 %v2309_v49, %v1246_v31  ;;  %v1247_v35 = vmax.f32 %v1119_v32, %v1183_v33  ;;  %740 = vmatprep.mubr.bf16.mxu0 %v2055_v1  ;;  %1093 = vmatprep.mubr.bf16.mxu1 %v2055_v1 }
  0xf9   :  { %v1381_v36 = vmax.f32 %v1317_v34, 0.0  ;;  %v1318_v37 = vadd.f32 %v2309_v49, %v1247_v35  ;;  %v472_v38 = vpop.f32.mrb[12].mxu0  ;;  %v825_v39 = vpop.f32.mrb[12].mxu1 }
  0xfa   :  { %v474_v40 = vpop.f32.mrb[13].mxu0  ;;  %v827_v41 = vpop.f32.mrb[13].mxu1 }
  0xfb   :  { %v1943_v43 = vpack.c.bf16 %v1381_v36, %v1381_v36  ;;  %v1382_v44 = vmax.f32 %v1318_v37, 0.0  ;;  %v1120_v45 = vmax.f32 %v472_v38, %v474_v40  ;;  %v1184_v46 = vmax.f32 %v825_v39, %v827_v41  ;;  %v476_v47 = vpop.f32.mrb[14].mxu0  ;;  %v829_v48 = vpop.f32.mrb[14].mxu1 }
  0xfc   :  { %v478_v50 = vpop.f32.mrb[15].mxu0  ;;  %v831_v51 = vpop.f32.mrb[15].mxu1 }
  0xfd   :  { %1702 = vst.msk [vmem:[%s2669_s3 + $0x10] sm:$0xf] %vm1697_vm1, %v1943_v43  ;;  %v1944_v52 = vpack.c.bf16 %v1382_v44, %v1382_v44  ;;  %v1248_v53 = vmax.f32 %v1120_v45, %v1184_v46  ;;  %v1121_v54 = vmax.f32 %v476_v47, %v478_v50  ;;  %v1185_v55 = vmax.f32 %v829_v48, %v831_v51 }
  0xfe   :  { %1840 = vmatmul.mubr.msk.bf16.gmra.mrb[120].mxu0 %vm311_vm0, %v2052_v42  ;;  %1872 = vmatmul.mubr.msk.bf16.gmra.mrb[120].mxu1 %vm311_vm0, %v2052_v42 }
  0xff   :  { %1703 = vst.msk [vmem:[%s2669_s3 + $0x14] sm:$0xf] %vm1697_vm1, %v1944_v52  ;;  %v1319_v56 = vadd.f32 %v2309_v49, %v1248_v53  ;;  %v1249_v57 = vmax.f32 %v1121_v54, %v1185_v55  ;;  %750 = vmatprep.mubr.bf16.mxu0 %v2055_v1  ;;  %1103 = vmatprep.mubr.bf16.mxu1 %v2055_v1 }
 0x101   :  { %v1383_v58 = vmax.f32 %v1319_v56, 0.0  ;;  %v1320_v59 = vadd.f32 %v2309_v49, %v1249_v57  ;;  %v482_v60 = vpop.f32.mrb[16].mxu0  ;;  %v835_v61 = vpop.f32.mrb[16].mxu1 }
 0x102   :  { %v484_v62 = vpop.f32.mrb[17].mxu0  ;;  %v837_v63 = vpop.f32.mrb[17].mxu1 }
 0x103   :  { %v1945_v2 = vpack.c.bf16 %v1383_v58, %v1383_v58  ;;  %v1384_v3 = vmax.f32 %v1320_v59, 0.0  ;;  %v1122_v4 = vmax.f32 %v482_v60, %v484_v62  ;;  %v1186_v5 = vmax.f32 %v835_v61, %v837_v63  ;;  %v486_v6 = vpop.f32.mrb[18].mxu0  ;;  %v839_v7 = vpop.f32.mrb[18].mxu1 }
 0x104   :  { %v488_v8 = vpop.f32.mrb[19].mxu0  ;;  %v841_v9 = vpop.f32.mrb[19].mxu1 }
 0x105   :  { %1704 = vst.msk [vmem:[%s2669_s3 + $0x18] sm:$0xf] %vm1697_vm1, %v1945_v2  ;;  %v1946_v1 = vpack.c.bf16 %v1384_v3, %v1384_v3  ;;  %v1250_v10 = vmax.f32 %v1122_v4, %v1186_v5  ;;  %v1123_v11 = vmax.f32 %v486_v6, %v488_v8  ;;  %v1187_v12 = vmax.f32 %v839_v7, %v841_v9 }
 0x106   :  { %1841 = vmatmul.mubr.msk.bf16.gmra.mrb[124].mxu0 %vm311_vm0, %v2053_v0  ;;  %1873 = vmatmul.mubr.msk.bf16.gmra.mrb[124].mxu1 %vm311_vm0, %v2053_v0 }
 0x107   :  { %1705 = vst.msk [vmem:[%s2669_s3 + $0x1c] sm:$0xf] %vm1697_vm1, %v1946_v1  ;;  %v1321_v13 = vadd.f32 %v2309_v49, %v1250_v10  ;;  %v1251_v14 = vmax.f32 %v1123_v11, %v1187_v12 }
 0x109   :  { %v1385_v15 = vmax.f32 %v1321_v13, 0.0  ;;  %v1322_v16 = vadd.f32 %v2309_v49, %v1251_v14  ;;  %v492_v17 = vpop.f32.mrb[20].mxu0  ;;  %v845_v18 = vpop.f32.mrb[20].mxu1 }
 0x10a   :  { %v494_v19 = vpop.f32.mrb[21].mxu0  ;;  %v847_v20 = vpop.f32.mrb[21].mxu1 }
 0x10b   :  { %v1947_v21 = vpack.c.bf16 %v1385_v15, %v1385_v15  ;;  %v1386_v22 = vmax.f32 %v1322_v16, 0.0  ;;  %v1124_v23 = vmax.f32 %v492_v17, %v494_v19  ;;  %v1188_v24 = vmax.f32 %v845_v18, %v847_v20  ;;  %v496_v25 = vpop.f32.mrb[22].mxu0  ;;  %v849_v26 = vpop.f32.mrb[22].mxu1 }
 0x10c   :  { %v498_v27 = vpop.f32.mrb[23].mxu0  ;;  %v851_v28 = vpop.f32.mrb[23].mxu1 }
 0x10d   :  { %1706 = vst.msk [vmem:[%s2669_s3 + $0x20] sm:$0xf] %vm1697_vm1, %v1947_v21  ;;  %v1948_v29 = vpack.c.bf16 %v1386_v22, %v1386_v22  ;;  %v1252_v30 = vmax.f32 %v1124_v23, %v1188_v24  ;;  %v1125_v31 = vmax.f32 %v496_v25, %v498_v27  ;;  %v1189_v32 = vmax.f32 %v849_v26, %v851_v28 }
 0x10f   :  { %1707 = vst.msk [vmem:[%s2669_s3 + $0x24] sm:$0xf] %vm1697_vm1, %v1948_v29  ;;  %v1323_v33 = vadd.f32 %v2309_v49, %v1252_v30  ;;  %v1253_v34 = vmax.f32 %v1125_v31, %v1189_v32 }
 0x111   :  { %v1387_v35 = vmax.f32 %v1323_v33, 0.0  ;;  %v1324_v36 = vadd.f32 %v2309_v49, %v1253_v34  ;;  %v502_v37 = vpop.f32.mrb[24].mxu0  ;;  %v855_v38 = vpop.f32.mrb[24].mxu1 }
 0x112   :  { %v504_v39 = vpop.f32.mrb[25].mxu0  ;;  %v857_v40 = vpop.f32.mrb[25].mxu1 }
 0x113   :  { %v1949_v41 = vpack.c.bf16 %v1387_v35, %v1387_v35  ;;  %v1388_v42 = vmax.f32 %v1324_v36, 0.0  ;;  %v1126_v43 = vmax.f32 %v502_v37, %v504_v39  ;;  %v1190_v44 = vmax.f32 %v855_v38, %v857_v40  ;;  %v506_v45 = vpop.f32.mrb[26].mxu0  ;;  %v859_v46 = vpop.f32.mrb[26].mxu1 }
 0x114   :  { %v508_v47 = vpop.f32.mrb[27].mxu0  ;;  %v861_v48 = vpop.f32.mrb[27].mxu1 }
 0x115   :  { %1708 = vst.msk [vmem:[%s2669_s3 + $0x28] sm:$0xf] %vm1697_vm1, %v1949_v41  ;;  %v1950_v50 = vpack.c.bf16 %v1388_v42, %v1388_v42  ;;  %v1254_v51 = vmax.f32 %v1126_v43, %v1190_v44  ;;  %v1127_v52 = vmax.f32 %v506_v45, %v508_v47  ;;  %v1191_v53 = vmax.f32 %v859_v46, %v861_v48 }
 0x117   :  { %1709 = vst.msk [vmem:[%s2669_s3 + $0x2c] sm:$0xf] %vm1697_vm1, %v1950_v50  ;;  %v1325_v54 = vadd.f32 %v2309_v49, %v1254_v51  ;;  %v1255_v55 = vmax.f32 %v1127_v52, %v1191_v53 }
 0x119   :  { %v1389_v56 = vmax.f32 %v1325_v54, 0.0  ;;  %v1326_v57 = vadd.f32 %v2309_v49, %v1255_v55  ;;  %v512_v58 = vpop.f32.mrb[28].mxu0  ;;  %v865_v59 = vpop.f32.mrb[28].mxu1 }
 0x11a   :  { %v514_v60 = vpop.f32.mrb[29].mxu0  ;;  %v867_v61 = vpop.f32.mrb[29].mxu1 }
 0x11b   :  { %v1951_v62 = vpack.c.bf16 %v1389_v56, %v1389_v56  ;;  %v1390_v63 = vmax.f32 %v1326_v57, 0.0  ;;  %v1128_v0 = vmax.f32 %v512_v58, %v514_v60  ;;  %v1192_v2 = vmax.f32 %v865_v59, %v867_v61  ;;  %v516_v3 = vpop.f32.mrb[30].mxu0  ;;  %v869_v4 = vpop.f32.mrb[30].mxu1 }
 0x11c   :  { %v518_v5 = vpop.f32.mrb[31].mxu0  ;;  %v871_v6 = vpop.f32.mrb[31].mxu1 }
 0x11d   :  { %1710 = vst.msk [vmem:[%s2669_s3 + $0x30] sm:$0xf] %vm1697_vm1, %v1951_v62  ;;  %v1952_v7 = vpack.c.bf16 %v1390_v63, %v1390_v63  ;;  %v1256_v8 = vmax.f32 %v1128_v0, %v1192_v2  ;;  %v1129_v9 = vmax.f32 %v516_v3, %v518_v5  ;;  %v1193_v1 = vmax.f32 %v869_v4, %v871_v6 }
 0x11f   :  { %1711 = vst.msk [vmem:[%s2669_s3 + $0x34] sm:$0xf] %vm1697_vm1, %v1952_v7  ;;  %v1327_v10 = vadd.f32 %v2309_v49, %v1256_v8  ;;  %v1257_v11 = vmax.f32 %v1129_v9, %v1193_v1 }
 0x121   :  { %v1391_v12 = vmax.f32 %v1327_v10, 0.0  ;;  %v1328_v13 = vadd.f32 %v2309_v49, %v1257_v11  ;;  %v522_v14 = vpop.f32.mrb[32].mxu0  ;;  %v875_v15 = vpop.f32.mrb[32].mxu1 }
 0x122   :  { %v524_v16 = vpop.f32.mrb[33].mxu0  ;;  %v877_v17 = vpop.f32.mrb[33].mxu1 }
 0x123   :  { %v1953_v18 = vpack.c.bf16 %v1391_v12, %v1391_v12  ;;  %v1392_v19 = vmax.f32 %v1328_v13, 0.0  ;;  %v1130_v20 = vmax.f32 %v522_v14, %v524_v16  ;;  %v1194_v21 = vmax.f32 %v875_v15, %v877_v17  ;;  %v526_v22 = vpop.f32.mrb[34].mxu0  ;;  %v879_v23 = vpop.f32.mrb[34].mxu1 }
 0x124   :  { %v528_v24 = vpop.f32.mrb[35].mxu0  ;;  %v881_v25 = vpop.f32.mrb[35].mxu1 }
 0x125   :  { %1712 = vst.msk [vmem:[%s2669_s3 + $0x38] sm:$0xf] %vm1697_vm1, %v1953_v18  ;;  %v1954_v26 = vpack.c.bf16 %v1392_v19, %v1392_v19  ;;  %v1258_v27 = vmax.f32 %v1130_v20, %v1194_v21  ;;  %v1131_v28 = vmax.f32 %v526_v22, %v528_v24  ;;  %v1195_v29 = vmax.f32 %v879_v23, %v881_v25 }
 0x127   :  { %1713 = vst.msk [vmem:[%s2669_s3 + $0x3c] sm:$0xf] %vm1697_vm1, %v1954_v26  ;;  %v1329_v30 = vadd.f32 %v2309_v49, %v1258_v27  ;;  %v1259_v31 = vmax.f32 %v1131_v28, %v1195_v29 }
 0x129   :  { %v1393_v32 = vmax.f32 %v1329_v30, 0.0  ;;  %v1330_v33 = vadd.f32 %v2309_v49, %v1259_v31  ;;  %v532_v34 = vpop.f32.mrb[36].mxu0  ;;  %v885_v35 = vpop.f32.mrb[36].mxu1 }
 0x12a   :  { %v534_v36 = vpop.f32.mrb[37].mxu0  ;;  %v887_v37 = vpop.f32.mrb[37].mxu1 }
 0x12b   :  { %v1955_v38 = vpack.c.bf16 %v1393_v32, %v1393_v32  ;;  %v1394_v39 = vmax.f32 %v1330_v33, 0.0  ;;  %v1132_v40 = vmax.f32 %v532_v34, %v534_v36  ;;  %v1196_v41 = vmax.f32 %v885_v35, %v887_v37  ;;  %v536_v42 = vpop.f32.mrb[38].mxu0  ;;  %v889_v43 = vpop.f32.mrb[38].mxu1 }
 0x12c   :  { %v538_v44 = vpop.f32.mrb[39].mxu0  ;;  %v891_v45 = vpop.f32.mrb[39].mxu1 }
 0x12d   :  { %1714 = vst.msk [vmem:[%s2669_s3 + $0x40] sm:$0xf] %vm1697_vm1, %v1955_v38  ;;  %v1956_v46 = vpack.c.bf16 %v1394_v39, %v1394_v39  ;;  %v1260_v47 = vmax.f32 %v1132_v40, %v1196_v41  ;;  %v1133_v48 = vmax.f32 %v536_v42, %v538_v44  ;;  %v1197_v50 = vmax.f32 %v889_v43, %v891_v45 }
 0x12f   :  { %1715 = vst.msk [vmem:[%s2669_s3 + $0x44] sm:$0xf] %vm1697_vm1, %v1956_v46  ;;  %v1331_v51 = vadd.f32 %v2309_v49, %v1260_v47  ;;  %v1261_v52 = vmax.f32 %v1133_v48, %v1197_v50 }
 0x131   :  { %v1395_v53 = vmax.f32 %v1331_v51, 0.0  ;;  %v1332_v54 = vadd.f32 %v2309_v49, %v1261_v52  ;;  %v542_v55 = vpop.f32.mrb[40].mxu0  ;;  %v895_v56 = vpop.f32.mrb[40].mxu1 }
 0x132   :  { %v544_v57 = vpop.f32.mrb[41].mxu0  ;;  %v897_v58 = vpop.f32.mrb[41].mxu1 }
 0x133   :  { %v1957_v59 = vpack.c.bf16 %v1395_v53, %v1395_v53  ;;  %v1396_v60 = vmax.f32 %v1332_v54, 0.0  ;;  %v1134_v61 = vmax.f32 %v542_v55, %v544_v57  ;;  %v1198_v62 = vmax.f32 %v895_v56, %v897_v58  ;;  %v546_v63 = vpop.f32.mrb[42].mxu0  ;;  %v899_v0 = vpop.f32.mrb[42].mxu1 }
 0x134   :  { %v548_v2 = vpop.f32.mrb[43].mxu0  ;;  %v901_v3 = vpop.f32.mrb[43].mxu1 }
 0x135   :  { %1716 = vst.msk [vmem:[%s2669_s3 + $0x48] sm:$0xf] %vm1697_vm1, %v1957_v59  ;;  %v1958_v4 = vpack.c.bf16 %v1396_v60, %v1396_v60  ;;  %v1262_v5 = vmax.f32 %v1134_v61, %v1198_v62  ;;  %v1135_v6 = vmax.f32 %v546_v63, %v548_v2  ;;  %v1199_v7 = vmax.f32 %v899_v0, %v901_v3 }
 0x137   :  { %1717 = vst.msk [vmem:[%s2669_s3 + $0x4c] sm:$0xf] %vm1697_vm1, %v1958_v4  ;;  %v1333_v8 = vadd.f32 %v2309_v49, %v1262_v5  ;;  %v1263_v9 = vmax.f32 %v1135_v6, %v1199_v7 }
 0x139   :  { %v1397_v1 = vmax.f32 %v1333_v8, 0.0  ;;  %v1334_v10 = vadd.f32 %v2309_v49, %v1263_v9  ;;  %v552_v11 = vpop.f32.mrb[44].mxu0  ;;  %v905_v12 = vpop.f32.mrb[44].mxu1 }
 0x13a   :  { %v554_v13 = vpop.f32.mrb[45].mxu0  ;;  %v907_v14 = vpop.f32.mrb[45].mxu1 }
 0x13b   :  { %v1959_v15 = vpack.c.bf16 %v1397_v1, %v1397_v1  ;;  %v1398_v16 = vmax.f32 %v1334_v10, 0.0  ;;  %v1136_v17 = vmax.f32 %v552_v11, %v554_v13  ;;  %v1200_v18 = vmax.f32 %v905_v12, %v907_v14  ;;  %v556_v19 = vpop.f32.mrb[46].mxu0  ;;  %v909_v20 = vpop.f32.mrb[46].mxu1 }
 0x13c   :  { %v558_v21 = vpop.f32.mrb[47].mxu0  ;;  %v911_v22 = vpop.f32.mrb[47].mxu1 }
 0x13d   :  { %1718 = vst.msk [vmem:[%s2669_s3 + $0x50] sm:$0xf] %vm1697_vm1, %v1959_v15  ;;  %v1960_v23 = vpack.c.bf16 %v1398_v16, %v1398_v16  ;;  %v1264_v24 = vmax.f32 %v1136_v17, %v1200_v18  ;;  %v1137_v25 = vmax.f32 %v556_v19, %v558_v21  ;;  %v1201_v26 = vmax.f32 %v909_v20, %v911_v22 }
 0x13f   :  { %1719 = vst.msk [vmem:[%s2669_s3 + $0x54] sm:$0xf] %vm1697_vm1, %v1960_v23  ;;  %v1335_v27 = vadd.f32 %v2309_v49, %v1264_v24  ;;  %v1265_v28 = vmax.f32 %v1137_v25, %v1201_v26 }
 0x141   :  { %v1399_v29 = vmax.f32 %v1335_v27, 0.0  ;;  %v1336_v30 = vadd.f32 %v2309_v49, %v1265_v28  ;;  %v562_v31 = vpop.f32.mrb[48].mxu0  ;;  %v915_v32 = vpop.f32.mrb[48].mxu1 }
 0x142   :  { %v564_v33 = vpop.f32.mrb[49].mxu0  ;;  %v917_v34 = vpop.f32.mrb[49].mxu1 }
 0x143   :  { %v1961_v35 = vpack.c.bf16 %v1399_v29, %v1399_v29  ;;  %v1400_v36 = vmax.f32 %v1336_v30, 0.0  ;;  %v1138_v37 = vmax.f32 %v562_v31, %v564_v33  ;;  %v1202_v38 = vmax.f32 %v915_v32, %v917_v34  ;;  %v566_v39 = vpop.f32.mrb[50].mxu0  ;;  %v919_v40 = vpop.f32.mrb[50].mxu1 }
 0x144   :  { %v568_v41 = vpop.f32.mrb[51].mxu0  ;;  %v921_v42 = vpop.f32.mrb[51].mxu1 }
 0x145   :  { %1720 = vst.msk [vmem:[%s2669_s3 + $0x58] sm:$0xf] %vm1697_vm1, %v1961_v35  ;;  %v1962_v43 = vpack.c.bf16 %v1400_v36, %v1400_v36  ;;  %v1266_v44 = vmax.f32 %v1138_v37, %v1202_v38  ;;  %v1139_v45 = vmax.f32 %v566_v39, %v568_v41  ;;  %v1203_v46 = vmax.f32 %v919_v40, %v921_v42 }
 0x147   :  { %1721 = vst.msk [vmem:[%s2669_s3 + $0x5c] sm:$0xf] %vm1697_vm1, %v1962_v43  ;;  %v1337_v47 = vadd.f32 %v2309_v49, %v1266_v44  ;;  %v1267_v48 = vmax.f32 %v1139_v45, %v1203_v46 }
 0x149   :  { %v1401_v50 = vmax.f32 %v1337_v47, 0.0  ;;  %v1338_v51 = vadd.f32 %v2309_v49, %v1267_v48  ;;  %v572_v52 = vpop.f32.mrb[52].mxu0  ;;  %v925_v53 = vpop.f32.mrb[52].mxu1 }
 0x14a   :  { %v574_v54 = vpop.f32.mrb[53].mxu0  ;;  %v927_v55 = vpop.f32.mrb[53].mxu1 }
 0x14b   :  { %v1963_v56 = vpack.c.bf16 %v1401_v50, %v1401_v50  ;;  %v1402_v57 = vmax.f32 %v1338_v51, 0.0  ;;  %v1140_v58 = vmax.f32 %v572_v52, %v574_v54  ;;  %v1204_v59 = vmax.f32 %v925_v53, %v927_v55  ;;  %v576_v60 = vpop.f32.mrb[54].mxu0  ;;  %v929_v61 = vpop.f32.mrb[54].mxu1 }
 0x14c   :  { %v578_v62 = vpop.f32.mrb[55].mxu0  ;;  %v931_v63 = vpop.f32.mrb[55].mxu1 }
 0x14d   :  { %1722 = vst.msk [vmem:[%s2669_s3 + $0x60] sm:$0xf] %vm1697_vm1, %v1963_v56  ;;  %v1964_v0 = vpack.c.bf16 %v1402_v57, %v1402_v57  ;;  %v1268_v2 = vmax.f32 %v1140_v58, %v1204_v59  ;;  %v1141_v3 = vmax.f32 %v576_v60, %v578_v62  ;;  %v1205_v4 = vmax.f32 %v929_v61, %v931_v63 }
 0x14f   :  { %1723 = vst.msk [vmem:[%s2669_s3 + $0x64] sm:$0xf] %vm1697_vm1, %v1964_v0  ;;  %v1339_v5 = vadd.f32 %v2309_v49, %v1268_v2  ;;  %v1269_v6 = vmax.f32 %v1141_v3, %v1205_v4 }
 0x151   :  { %v1403_v7 = vmax.f32 %v1339_v5, 0.0  ;;  %v1340_v8 = vadd.f32 %v2309_v49, %v1269_v6  ;;  %v582_v9 = vpop.f32.mrb[56].mxu0  ;;  %v935_v1 = vpop.f32.mrb[56].mxu1 }
 0x152   :  { %v584_v10 = vpop.f32.mrb[57].mxu0  ;;  %v937_v11 = vpop.f32.mrb[57].mxu1 }
 0x153   :  { %v1965_v12 = vpack.c.bf16 %v1403_v7, %v1403_v7  ;;  %v1404_v13 = vmax.f32 %v1340_v8, 0.0  ;;  %v1142_v14 = vmax.f32 %v582_v9, %v584_v10  ;;  %v1206_v15 = vmax.f32 %v935_v1, %v937_v11  ;;  %v586_v16 = vpop.f32.mrb[58].mxu0  ;;  %v939_v17 = vpop.f32.mrb[58].mxu1 }
 0x154   :  { %v588_v18 = vpop.f32.mrb[59].mxu0  ;;  %v941_v19 = vpop.f32.mrb[59].mxu1 }
 0x155   :  { %1724 = vst.msk [vmem:[%s2669_s3 + $0x68] sm:$0xf] %vm1697_vm1, %v1965_v12  ;;  %v1966_v20 = vpack.c.bf16 %v1404_v13, %v1404_v13  ;;  %v1270_v21 = vmax.f32 %v1142_v14, %v1206_v15  ;;  %v1143_v22 = vmax.f32 %v586_v16, %v588_v18  ;;  %v1207_v23 = vmax.f32 %v939_v17, %v941_v19 }
 0x157   :  { %1725 = vst.msk [vmem:[%s2669_s3 + $0x6c] sm:$0xf] %vm1697_vm1, %v1966_v20  ;;  %v1341_v24 = vadd.f32 %v2309_v49, %v1270_v21  ;;  %v1271_v25 = vmax.f32 %v1143_v22, %v1207_v23 }
 0x159   :  { %v1405_v26 = vmax.f32 %v1341_v24, 0.0  ;;  %v1342_v27 = vadd.f32 %v2309_v49, %v1271_v25  ;;  %v592_v28 = vpop.f32.mrb[60].mxu0  ;;  %v945_v29 = vpop.f32.mrb[60].mxu1 }
 0x15a   :  { %v594_v30 = vpop.f32.mrb[61].mxu0  ;;  %v947_v31 = vpop.f32.mrb[61].mxu1 }
 0x15b   :  { %v1967_v32 = vpack.c.bf16 %v1405_v26, %v1405_v26  ;;  %v1406_v33 = vmax.f32 %v1342_v27, 0.0  ;;  %v1144_v34 = vmax.f32 %v592_v28, %v594_v30  ;;  %v1208_v35 = vmax.f32 %v945_v29, %v947_v31  ;;  %v596_v36 = vpop.f32.mrb[62].mxu0  ;;  %v949_v37 = vpop.f32.mrb[62].mxu1 }
 0x15c   :  { %v598_v38 = vpop.f32.mrb[63].mxu0  ;;  %v951_v39 = vpop.f32.mrb[63].mxu1 }
 0x15d   :  { %1726 = vst.msk [vmem:[%s2669_s3 + $0x70] sm:$0xf] %vm1697_vm1, %v1967_v32  ;;  %v1968_v40 = vpack.c.bf16 %v1406_v33, %v1406_v33  ;;  %v1272_v41 = vmax.f32 %v1144_v34, %v1208_v35  ;;  %v1145_v42 = vmax.f32 %v596_v36, %v598_v38  ;;  %v1209_v43 = vmax.f32 %v949_v37, %v951_v39 }
 0x15f   :  { %1727 = vst.msk [vmem:[%s2669_s3 + $0x74] sm:$0xf] %vm1697_vm1, %v1968_v40  ;;  %v1343_v44 = vadd.f32 %v2309_v49, %v1272_v41  ;;  %v1273_v45 = vmax.f32 %v1145_v42, %v1209_v43 }
 0x161   :  { %v1407_v46 = vmax.f32 %v1343_v44, 0.0  ;;  %v1344_v47 = vadd.f32 %v2309_v49, %v1273_v45  ;;  %v602_v48 = vpop.f32.mrb[64].mxu0  ;;  %v955_v50 = vpop.f32.mrb[64].mxu1 }
 0x162   :  { %v604_v51 = vpop.f32.mrb[65].mxu0  ;;  %v957_v52 = vpop.f32.mrb[65].mxu1 }
 0x163   :  { %v1969_v53 = vpack.c.bf16 %v1407_v46, %v1407_v46  ;;  %v1408_v54 = vmax.f32 %v1344_v47, 0.0  ;;  %v1146_v55 = vmax.f32 %v602_v48, %v604_v51  ;;  %v1210_v56 = vmax.f32 %v955_v50, %v957_v52  ;;  %v606_v57 = vpop.f32.mrb[66].mxu0  ;;  %v959_v58 = vpop.f32.mrb[66].mxu1 }
 0x164   :  { %v608_v59 = vpop.f32.mrb[67].mxu0  ;;  %v961_v60 = vpop.f32.mrb[67].mxu1 }
 0x165   :  { %1728 = vst.msk [vmem:[%s2669_s3 + $0x78] sm:$0xf] %vm1697_vm1, %v1969_v53  ;;  %v1970_v61 = vpack.c.bf16 %v1408_v54, %v1408_v54  ;;  %v1274_v62 = vmax.f32 %v1146_v55, %v1210_v56  ;;  %v1147_v63 = vmax.f32 %v606_v57, %v608_v59  ;;  %v1211_v0 = vmax.f32 %v959_v58, %v961_v60 }
 0x167   :  { %1729 = vst.msk [vmem:[%s2669_s3 + $0x7c] sm:$0xf] %vm1697_vm1, %v1970_v61  ;;  %v1345_v2 = vadd.f32 %v2309_v49, %v1274_v62  ;;  %v1275_v3 = vmax.f32 %v1147_v63, %v1211_v0 }
 0x169   :  { %v1409_v4 = vmax.f32 %v1345_v2, 0.0  ;;  %v1346_v5 = vadd.f32 %v2309_v49, %v1275_v3  ;;  %v612_v6 = vpop.f32.mrb[68].mxu0  ;;  %v965_v7 = vpop.f32.mrb[68].mxu1 }
 0x16a   :  { %v614_v8 = vpop.f32.mrb[69].mxu0  ;;  %v967_v9 = vpop.f32.mrb[69].mxu1 }
 0x16b   :  { %v1971_v1 = vpack.c.bf16 %v1409_v4, %v1409_v4  ;;  %v1410_v10 = vmax.f32 %v1346_v5, 0.0  ;;  %v1148_v11 = vmax.f32 %v612_v6, %v614_v8  ;;  %v1212_v12 = vmax.f32 %v965_v7, %v967_v9  ;;  %v616_v13 = vpop.f32.mrb[70].mxu0  ;;  %v969_v14 = vpop.f32.mrb[70].mxu1 }
 0x16c   :  { %v618_v15 = vpop.f32.mrb[71].mxu0  ;;  %v971_v16 = vpop.f32.mrb[71].mxu1 }
 0x16d   :  { %1730 = vst.msk [vmem:[%s2669_s3 + $0x80] sm:$0xf] %vm1697_vm1, %v1971_v1  ;;  %v1972_v17 = vpack.c.bf16 %v1410_v10, %v1410_v10  ;;  %v1276_v18 = vmax.f32 %v1148_v11, %v1212_v12  ;;  %v1149_v19 = vmax.f32 %v616_v13, %v618_v15  ;;  %v1213_v20 = vmax.f32 %v969_v14, %v971_v16 }
 0x16f   :  { %1731 = vst.msk [vmem:[%s2669_s3 + $0x84] sm:$0xf] %vm1697_vm1, %v1972_v17  ;;  %v1347_v21 = vadd.f32 %v2309_v49, %v1276_v18  ;;  %v1277_v22 = vmax.f32 %v1149_v19, %v1213_v20 }
 0x171   :  { %v1411_v23 = vmax.f32 %v1347_v21, 0.0  ;;  %v1348_v24 = vadd.f32 %v2309_v49, %v1277_v22  ;;  %v622_v25 = vpop.f32.mrb[72].mxu0  ;;  %v975_v26 = vpop.f32.mrb[72].mxu1 }
 0x172   :  { %v624_v27 = vpop.f32.mrb[73].mxu0  ;;  %v977_v28 = vpop.f32.mrb[73].mxu1 }
 0x173   :  { %v1973_v29 = vpack.c.bf16 %v1411_v23, %v1411_v23  ;;  %v1412_v30 = vmax.f32 %v1348_v24, 0.0  ;;  %v1150_v31 = vmax.f32 %v622_v25, %v624_v27  ;;  %v1214_v32 = vmax.f32 %v975_v26, %v977_v28  ;;  %v626_v33 = vpop.f32.mrb[74].mxu0  ;;  %v979_v34 = vpop.f32.mrb[74].mxu1 }
 0x174   :  { %v628_v35 = vpop.f32.mrb[75].mxu0  ;;  %v981_v36 = vpop.f32.mrb[75].mxu1 }
 0x175   :  { %1732 = vst.msk [vmem:[%s2669_s3 + $0x88] sm:$0xf] %vm1697_vm1, %v1973_v29  ;;  %v1974_v37 = vpack.c.bf16 %v1412_v30, %v1412_v30  ;;  %v1278_v38 = vmax.f32 %v1150_v31, %v1214_v32  ;;  %v1151_v39 = vmax.f32 %v626_v33, %v628_v35  ;;  %v1215_v40 = vmax.f32 %v979_v34, %v981_v36 }
 0x177   :  { %1733 = vst.msk [vmem:[%s2669_s3 + $0x8c] sm:$0xf] %vm1697_vm1, %v1974_v37  ;;  %v1349_v41 = vadd.f32 %v2309_v49, %v1278_v38  ;;  %v1279_v42 = vmax.f32 %v1151_v39, %v1215_v40 }
 0x179   :  { %v1413_v43 = vmax.f32 %v1349_v41, 0.0  ;;  %v1350_v44 = vadd.f32 %v2309_v49, %v1279_v42  ;;  %v632_v45 = vpop.f32.mrb[76].mxu0  ;;  %v985_v46 = vpop.f32.mrb[76].mxu1 }
 0x17a   :  { %v634_v47 = vpop.f32.mrb[77].mxu0  ;;  %v987_v48 = vpop.f32.mrb[77].mxu1 }
 0x17b   :  { %v1975_v50 = vpack.c.bf16 %v1413_v43, %v1413_v43  ;;  %v1414_v51 = vmax.f32 %v1350_v44, 0.0  ;;  %v1152_v52 = vmax.f32 %v632_v45, %v634_v47  ;;  %v1216_v53 = vmax.f32 %v985_v46, %v987_v48  ;;  %v636_v54 = vpop.f32.mrb[78].mxu0  ;;  %v989_v55 = vpop.f32.mrb[78].mxu1 }
 0x17c   :  { %v638_v56 = vpop.f32.mrb[79].mxu0  ;;  %v991_v57 = vpop.f32.mrb[79].mxu1 }
 0x17d   :  { %1734 = vst.msk [vmem:[%s2669_s3 + $0x90] sm:$0xf] %vm1697_vm1, %v1975_v50  ;;  %v1976_v58 = vpack.c.bf16 %v1414_v51, %v1414_v51  ;;  %v1280_v59 = vmax.f32 %v1152_v52, %v1216_v53  ;;  %v1153_v60 = vmax.f32 %v636_v54, %v638_v56  ;;  %v1217_v61 = vmax.f32 %v989_v55, %v991_v57 }
 0x17f   :  { %1735 = vst.msk [vmem:[%s2669_s3 + $0x94] sm:$0xf] %vm1697_vm1, %v1976_v58  ;;  %v1351_v62 = vadd.f32 %v2309_v49, %v1280_v59  ;;  %v1281_v63 = vmax.f32 %v1153_v60, %v1217_v61  ;;  %v2564_v58 = vld [vmem:[%s2668_s2] ss:$0 sm:$0xff] }
 0x181   :  { %v1415_v0 = vmax.f32 %v1351_v62, 0.0  ;;  %v1352_v2 = vadd.f32 %v2309_v49, %v1281_v63  ;;  %v642_v3 = vpop.f32.mrb[80].mxu0  ;;  %v995_v4 = vpop.f32.mrb[80].mxu1 }
 0x182   :  { %v644_v5 = vpop.f32.mrb[81].mxu0  ;;  %v997_v6 = vpop.f32.mrb[81].mxu1 }
 0x183   :  { %v1977_v7 = vpack.c.bf16 %v1415_v0, %v1415_v0  ;;  %v1416_v8 = vmax.f32 %v1352_v2, 0.0  ;;  %v1154_v9 = vmax.f32 %v642_v3, %v644_v5  ;;  %v1218_v1 = vmax.f32 %v995_v4, %v997_v6  ;;  %v646_v10 = vpop.f32.mrb[82].mxu0  ;;  %v999_v11 = vpop.f32.mrb[82].mxu1 }
 0x184   :  { %v648_v12 = vpop.f32.mrb[83].mxu0  ;;  %v1001_v13 = vpop.f32.mrb[83].mxu1 }
 0x185   :  { %1736 = vst.msk [vmem:[%s2669_s3 + $0x98] sm:$0xf] %vm1697_vm1, %v1977_v7  ;;  %v1978_v14 = vpack.c.bf16 %v1416_v8, %v1416_v8  ;;  %v1282_v15 = vmax.f32 %v1154_v9, %v1218_v1  ;;  %v1155_v16 = vmax.f32 %v646_v10, %v648_v12  ;;  %v1219_v17 = vmax.f32 %v999_v11, %v1001_v13 }
 0x187   :  { %1737 = vst.msk [vmem:[%s2669_s3 + $0x9c] sm:$0xf] %vm1697_vm1, %v1978_v14  ;;  %v1353_v18 = vadd.f32 %v2309_v49, %v1282_v15  ;;  %v1283_v19 = vmax.f32 %v1155_v16, %v1219_v17 }
 0x189   :  { %v1417_v20 = vmax.f32 %v1353_v18, 0.0  ;;  %v1354_v21 = vadd.f32 %v2309_v49, %v1283_v19  ;;  %v652_v22 = vpop.f32.mrb[84].mxu0  ;;  %v1005_v23 = vpop.f32.mrb[84].mxu1 }
 0x18a   :  { %v654_v24 = vpop.f32.mrb[85].mxu0  ;;  %v1007_v25 = vpop.f32.mrb[85].mxu1 }
 0x18b   :  { %v1979_v26 = vpack.c.bf16 %v1417_v20, %v1417_v20  ;;  %v1418_v27 = vmax.f32 %v1354_v21, 0.0  ;;  %v1156_v28 = vmax.f32 %v652_v22, %v654_v24  ;;  %v1220_v29 = vmax.f32 %v1005_v23, %v1007_v25  ;;  %v656_v30 = vpop.f32.mrb[86].mxu0  ;;  %v1009_v31 = vpop.f32.mrb[86].mxu1 }
 0x18c   :  { %v658_v32 = vpop.f32.mrb[87].mxu0  ;;  %v1011_v33 = vpop.f32.mrb[87].mxu1 }
 0x18d   :  { %1738 = vst.msk [vmem:[%s2669_s3 + $0xa0] sm:$0xf] %vm1697_vm1, %v1979_v26  ;;  %v1980_v34 = vpack.c.bf16 %v1418_v27, %v1418_v27  ;;  %v1284_v35 = vmax.f32 %v1156_v28, %v1220_v29  ;;  %v1157_v36 = vmax.f32 %v656_v30, %v658_v32  ;;  %v1221_v37 = vmax.f32 %v1009_v31, %v1011_v33 }
 0x18f   :  { %1739 = vst.msk [vmem:[%s2669_s3 + $0xa4] sm:$0xf] %vm1697_vm1, %v1980_v34  ;;  %v1355_v38 = vadd.f32 %v2309_v49, %v1284_v35  ;;  %v1285_v39 = vmax.f32 %v1157_v36, %v1221_v37 }
 0x191   :  { %v1419_v40 = vmax.f32 %v1355_v38, 0.0  ;;  %v1356_v41 = vadd.f32 %v2309_v49, %v1285_v39  ;;  %v662_v42 = vpop.f32.mrb[88].mxu0  ;;  %v1015_v43 = vpop.f32.mrb[88].mxu1 }
 0x192   :  { %v664_v44 = vpop.f32.mrb[89].mxu0  ;;  %v1017_v45 = vpop.f32.mrb[89].mxu1 }
 0x193   :  { %v1981_v46 = vpack.c.bf16 %v1419_v40, %v1419_v40  ;;  %v1420_v47 = vmax.f32 %v1356_v41, 0.0  ;;  %v1158_v48 = vmax.f32 %v662_v42, %v664_v44  ;;  %v1222_v50 = vmax.f32 %v1015_v43, %v1017_v45  ;;  %v666_v51 = vpop.f32.mrb[90].mxu0  ;;  %v1019_v52 = vpop.f32.mrb[90].mxu1 }
 0x194   :  { %v668_v53 = vpop.f32.mrb[91].mxu0  ;;  %v1021_v54 = vpop.f32.mrb[91].mxu1 }
 0x195   :  { %1740 = vst.msk [vmem:[%s2669_s3 + $0xa8] sm:$0xf] %vm1697_vm1, %v1981_v46  ;;  %v1982_v55 = vpack.c.bf16 %v1420_v47, %v1420_v47  ;;  %v1286_v56 = vmax.f32 %v1158_v48, %v1222_v50  ;;  %v1159_v49 = vmax.f32 %v666_v51, %v668_v53  ;;  %v1223_v57 = vmax.f32 %v1019_v52, %v1021_v54 }
 0x197   :  { %1741 = vst.msk [vmem:[%s2669_s3 + $0xac] sm:$0xf] %vm1697_vm1, %v1982_v55  ;;  %v1357_v59 = vadd.f32 %v2564_v58, %v1286_v56  ;;  %v1287_v60 = vmax.f32 %v1159_v49, %v1223_v57 }
 0x199   :  { %v1421_v61 = vmax.f32 %v1357_v59, 0.0  ;;  %v1358_v62 = vadd.f32 %v2564_v58, %v1287_v60  ;;  %v672_v63 = vpop.f32.mrb[92].mxu0  ;;  %v1025_v0 = vpop.f32.mrb[92].mxu1 }
 0x19a   :  { %v674_v2 = vpop.f32.mrb[93].mxu0  ;;  %v1027_v3 = vpop.f32.mrb[93].mxu1 }
 0x19b   :  { %v1983_v4 = vpack.c.bf16 %v1421_v61, %v1421_v61  ;;  %v1422_v5 = vmax.f32 %v1358_v62, 0.0  ;;  %v1160_v6 = vmax.f32 %v672_v63, %v674_v2  ;;  %v1224_v7 = vmax.f32 %v1025_v0, %v1027_v3  ;;  %v676_v8 = vpop.f32.mrb[94].mxu0  ;;  %v1029_v9 = vpop.f32.mrb[94].mxu1 }
 0x19c   :  { %v678_v1 = vpop.f32.mrb[95].mxu0  ;;  %v1031_v10 = vpop.f32.mrb[95].mxu1 }
 0x19d   :  { %1742 = vst.msk [vmem:[%s2669_s3 + $0xb0] sm:$0xf] %vm1697_vm1, %v1983_v4  ;;  %v1984_v11 = vpack.c.bf16 %v1422_v5, %v1422_v5  ;;  %v1288_v12 = vmax.f32 %v1160_v6, %v1224_v7  ;;  %v1161_v13 = vmax.f32 %v676_v8, %v678_v1  ;;  %v1225_v14 = vmax.f32 %v1029_v9, %v1031_v10 }
 0x19f   :  { %1743 = vst.msk [vmem:[%s2669_s3 + $0xb4] sm:$0xf] %vm1697_vm1, %v1984_v11  ;;  %v1359_v15 = vadd.f32 %v2564_v58, %v1288_v12  ;;  %v1289_v16 = vmax.f32 %v1161_v13, %v1225_v14 }
 0x1a1   :  { %v1423_v17 = vmax.f32 %v1359_v15, 0.0  ;;  %v1360_v18 = vadd.f32 %v2564_v58, %v1289_v16  ;;  %v682_v19 = vpop.f32.mrb[96].mxu0  ;;  %v1035_v20 = vpop.f32.mrb[96].mxu1 }
 0x1a2   :  { %v684_v21 = vpop.f32.mrb[97].mxu0  ;;  %v1037_v22 = vpop.f32.mrb[97].mxu1 }
 0x1a3   :  { %v1985_v23 = vpack.c.bf16 %v1423_v17, %v1423_v17  ;;  %v1424_v24 = vmax.f32 %v1360_v18, 0.0  ;;  %v1162_v25 = vmax.f32 %v682_v19, %v684_v21  ;;  %v1226_v26 = vmax.f32 %v1035_v20, %v1037_v22  ;;  %v686_v27 = vpop.f32.mrb[98].mxu0  ;;  %v1039_v28 = vpop.f32.mrb[98].mxu1 }
 0x1a4   :  { %v688_v29 = vpop.f32.mrb[99].mxu0  ;;  %v1041_v30 = vpop.f32.mrb[99].mxu1 }
 0x1a5   :  { %1744 = vst.msk [vmem:[%s2669_s3 + $0xb8] sm:$0xf] %vm1697_vm1, %v1985_v23  ;;  %v1986_v31 = vpack.c.bf16 %v1424_v24, %v1424_v24  ;;  %v1290_v32 = vmax.f32 %v1162_v25, %v1226_v26  ;;  %v1163_v33 = vmax.f32 %v686_v27, %v688_v29  ;;  %v1227_v34 = vmax.f32 %v1039_v28, %v1041_v30 }
 0x1a7   :  { %1745 = vst.msk [vmem:[%s2669_s3 + $0xbc] sm:$0xf] %vm1697_vm1, %v1986_v31  ;;  %v1361_v35 = vadd.f32 %v2564_v58, %v1290_v32  ;;  %v1291_v36 = vmax.f32 %v1163_v33, %v1227_v34 }
 0x1a9   :  { %v1425_v37 = vmax.f32 %v1361_v35, 0.0  ;;  %v1362_v38 = vadd.f32 %v2564_v58, %v1291_v36  ;;  %v692_v39 = vpop.f32.mrb[100].mxu0  ;;  %v1045_v40 = vpop.f32.mrb[100].mxu1 }
 0x1aa   :  { %v694_v41 = vpop.f32.mrb[101].mxu0  ;;  %v1047_v42 = vpop.f32.mrb[101].mxu1 }
 0x1ab   :  { %v1987_v43 = vpack.c.bf16 %v1425_v37, %v1425_v37  ;;  %v1426_v44 = vmax.f32 %v1362_v38, 0.0  ;;  %v1164_v45 = vmax.f32 %v692_v39, %v694_v41  ;;  %v1228_v46 = vmax.f32 %v1045_v40, %v1047_v42  ;;  %v696_v47 = vpop.f32.mrb[102].mxu0  ;;  %v1049_v48 = vpop.f32.mrb[102].mxu1 }
 0x1ac   :  { %v698_v50 = vpop.f32.mrb[103].mxu0  ;;  %v1051_v51 = vpop.f32.mrb[103].mxu1 }
 0x1ad   :  { %1746 = vst.msk [vmem:[%s2669_s3 + $0xc0] sm:$0xf] %vm1697_vm1, %v1987_v43  ;;  %v1988_v52 = vpack.c.bf16 %v1426_v44, %v1426_v44  ;;  %v1292_v53 = vmax.f32 %v1164_v45, %v1228_v46  ;;  %v1165_v54 = vmax.f32 %v696_v47, %v698_v50  ;;  %v1229_v55 = vmax.f32 %v1049_v48, %v1051_v51 }
 0x1af   :  { %1747 = vst.msk [vmem:[%s2669_s3 + $0xc4] sm:$0xf] %vm1697_vm1, %v1988_v52  ;;  %v1363_v56 = vadd.f32 %v2564_v58, %v1292_v53  ;;  %v1293_v49 = vmax.f32 %v1165_v54, %v1229_v55 }
 0x1b1   :  { %v1427_v57 = vmax.f32 %v1363_v56, 0.0  ;;  %v1364_v59 = vadd.f32 %v2564_v58, %v1293_v49  ;;  %v702_v60 = vpop.f32.mrb[104].mxu0  ;;  %v1055_v61 = vpop.f32.mrb[104].mxu1 }
 0x1b2   :  { %v704_v62 = vpop.f32.mrb[105].mxu0  ;;  %v1057_v63 = vpop.f32.mrb[105].mxu1 }
 0x1b3   :  { %v1989_v0 = vpack.c.bf16 %v1427_v57, %v1427_v57  ;;  %v1428_v2 = vmax.f32 %v1364_v59, 0.0  ;;  %v1166_v3 = vmax.f32 %v702_v60, %v704_v62  ;;  %v1230_v4 = vmax.f32 %v1055_v61, %v1057_v63  ;;  %v706_v5 = vpop.f32.mrb[106].mxu0  ;;  %v1059_v6 = vpop.f32.mrb[106].mxu1 }
 0x1b4   :  { %v708_v7 = vpop.f32.mrb[107].mxu0  ;;  %v1061_v8 = vpop.f32.mrb[107].mxu1 }
 0x1b5   :  { %1748 = vst.msk [vmem:[%s2669_s3 + $0xc8] sm:$0xf] %vm1697_vm1, %v1989_v0  ;;  %v1990_v9 = vpack.c.bf16 %v1428_v2, %v1428_v2  ;;  %v1294_v1 = vmax.f32 %v1166_v3, %v1230_v4  ;;  %v1167_v10 = vmax.f32 %v706_v5, %v708_v7  ;;  %v1231_v11 = vmax.f32 %v1059_v6, %v1061_v8 }
 0x1b7   :  { %1749 = vst.msk [vmem:[%s2669_s3 + $0xcc] sm:$0xf] %vm1697_vm1, %v1990_v9  ;;  %v1365_v12 = vadd.f32 %v2564_v58, %v1294_v1  ;;  %v1295_v13 = vmax.f32 %v1167_v10, %v1231_v11 }
 0x1b9   :  { %v1429_v14 = vmax.f32 %v1365_v12, 0.0  ;;  %v1366_v15 = vadd.f32 %v2564_v58, %v1295_v13  ;;  %v712_v16 = vpop.f32.mrb[108].mxu0  ;;  %v1065_v17 = vpop.f32.mrb[108].mxu1 }
 0x1ba   :  { %v714_v18 = vpop.f32.mrb[109].mxu0  ;;  %v1067_v19 = vpop.f32.mrb[109].mxu1 }
 0x1bb   :  { %v1991_v20 = vpack.c.bf16 %v1429_v14, %v1429_v14  ;;  %v1430_v21 = vmax.f32 %v1366_v15, 0.0  ;;  %v1168_v22 = vmax.f32 %v712_v16, %v714_v18  ;;  %v1232_v23 = vmax.f32 %v1065_v17, %v1067_v19  ;;  %v716_v24 = vpop.f32.mrb[110].mxu0  ;;  %v1069_v25 = vpop.f32.mrb[110].mxu1 }
 0x1bc   :  { %v718_v26 = vpop.f32.mrb[111].mxu0  ;;  %v1071_v27 = vpop.f32.mrb[111].mxu1 }
 0x1bd   :  { %1750 = vst.msk [vmem:[%s2669_s3 + $0xd0] sm:$0xf] %vm1697_vm1, %v1991_v20  ;;  %v1992_v28 = vpack.c.bf16 %v1430_v21, %v1430_v21  ;;  %v1296_v29 = vmax.f32 %v1168_v22, %v1232_v23  ;;  %v1169_v30 = vmax.f32 %v716_v24, %v718_v26  ;;  %v1233_v31 = vmax.f32 %v1069_v25, %v1071_v27 }
 0x1bf   :  { %1751 = vst.msk [vmem:[%s2669_s3 + $0xd4] sm:$0xf] %vm1697_vm1, %v1992_v28  ;;  %v1367_v32 = vadd.f32 %v2564_v58, %v1296_v29  ;;  %v1297_v33 = vmax.f32 %v1169_v30, %v1233_v31 }
 0x1c1   :  { %v1431_v34 = vmax.f32 %v1367_v32, 0.0  ;;  %v1368_v35 = vadd.f32 %v2564_v58, %v1297_v33  ;;  %v722_v36 = vpop.f32.mrb[112].mxu0  ;;  %v1075_v37 = vpop.f32.mrb[112].mxu1 }
 0x1c2   :  { %v724_v38 = vpop.f32.mrb[113].mxu0  ;;  %v1077_v39 = vpop.f32.mrb[113].mxu1 }
 0x1c3   :  { %v1993_v40 = vpack.c.bf16 %v1431_v34, %v1431_v34  ;;  %v1432_v41 = vmax.f32 %v1368_v35, 0.0  ;;  %v1170_v42 = vmax.f32 %v722_v36, %v724_v38  ;;  %v1234_v43 = vmax.f32 %v1075_v37, %v1077_v39  ;;  %v726_v44 = vpop.f32.mrb[114].mxu0  ;;  %v1079_v45 = vpop.f32.mrb[114].mxu1 }
 0x1c4   :  { %v728_v46 = vpop.f32.mrb[115].mxu0  ;;  %v1081_v47 = vpop.f32.mrb[115].mxu1 }
 0x1c5   :  { %1752 = vst.msk [vmem:[%s2669_s3 + $0xd8] sm:$0xf] %vm1697_vm1, %v1993_v40  ;;  %v1994_v48 = vpack.c.bf16 %v1432_v41, %v1432_v41  ;;  %v1298_v50 = vmax.f32 %v1170_v42, %v1234_v43  ;;  %v1171_v51 = vmax.f32 %v726_v44, %v728_v46  ;;  %v1235_v52 = vmax.f32 %v1079_v45, %v1081_v47 }
 0x1c7   :  { %1753 = vst.msk [vmem:[%s2669_s3 + $0xdc] sm:$0xf] %vm1697_vm1, %v1994_v48  ;;  %v1369_v53 = vadd.f32 %v2564_v58, %v1298_v50  ;;  %v1299_v54 = vmax.f32 %v1171_v51, %v1235_v52 }
 0x1c9   :  { %v1433_v55 = vmax.f32 %v1369_v53, 0.0  ;;  %v1370_v56 = vadd.f32 %v2564_v58, %v1299_v54  ;;  %v732_v49 = vpop.f32.mrb[116].mxu0  ;;  %v1085_v57 = vpop.f32.mrb[116].mxu1 }
 0x1ca   :  { %v734_v59 = vpop.f32.mrb[117].mxu0  ;;  %v1087_v60 = vpop.f32.mrb[117].mxu1 }
 0x1cb   :  { %v1995_v61 = vpack.c.bf16 %v1433_v55, %v1433_v55  ;;  %v1434_v62 = vmax.f32 %v1370_v56, 0.0  ;;  %v1172_v63 = vmax.f32 %v732_v49, %v734_v59  ;;  %v1236_v0 = vmax.f32 %v1085_v57, %v1087_v60  ;;  %v736_v2 = vpop.f32.mrb[118].mxu0  ;;  %v1089_v3 = vpop.f32.mrb[118].mxu1 }
 0x1cc   :  { %v738_v4 = vpop.f32.mrb[119].mxu0  ;;  %v1091_v5 = vpop.f32.mrb[119].mxu1 }
 0x1cd   :  { %1754 = vst.msk [vmem:[%s2669_s3 + $0xe0] sm:$0xf] %vm1697_vm1, %v1995_v61  ;;  %v1996_v6 = vpack.c.bf16 %v1434_v62, %v1434_v62  ;;  %v1300_v7 = vmax.f32 %v1172_v63, %v1236_v0  ;;  %v1173_v8 = vmax.f32 %v736_v2, %v738_v4  ;;  %v1237_v9 = vmax.f32 %v1089_v3, %v1091_v5 }
 0x1cf   :  { %1755 = vst.msk [vmem:[%s2669_s3 + $0xe4] sm:$0xf] %vm1697_vm1, %v1996_v6  ;;  %v1371_v1 = vadd.f32 %v2564_v58, %v1300_v7  ;;  %v1301_v10 = vmax.f32 %v1173_v8, %v1237_v9 }
 0x1d1   :  { %v1435_v11 = vmax.f32 %v1371_v1, 0.0  ;;  %v1372_v12 = vadd.f32 %v2564_v58, %v1301_v10  ;;  %v742_v13 = vpop.f32.mrb[120].mxu0  ;;  %v1095_v14 = vpop.f32.mrb[120].mxu1 }
 0x1d2   :  { %v744_v15 = vpop.f32.mrb[121].mxu0  ;;  %v1097_v16 = vpop.f32.mrb[121].mxu1 }
 0x1d3   :  { %v1997_v17 = vpack.c.bf16 %v1435_v11, %v1435_v11  ;;  %v1436_v18 = vmax.f32 %v1372_v12, 0.0  ;;  %v1174_v19 = vmax.f32 %v742_v13, %v744_v15  ;;  %v1238_v20 = vmax.f32 %v1095_v14, %v1097_v16  ;;  %v746_v21 = vpop.f32.mrb[122].mxu0  ;;  %v1099_v22 = vpop.f32.mrb[122].mxu1 }
 0x1d4   :  { %v748_v23 = vpop.f32.mrb[123].mxu0  ;;  %v1101_v24 = vpop.f32.mrb[123].mxu1 }
 0x1d5   :  { %1756 = vst.msk [vmem:[%s2669_s3 + $0xe8] sm:$0xf] %vm1697_vm1, %v1997_v17  ;;  %v1998_v25 = vpack.c.bf16 %v1436_v18, %v1436_v18  ;;  %v1302_v26 = vmax.f32 %v1174_v19, %v1238_v20  ;;  %v1175_v27 = vmax.f32 %v746_v21, %v748_v23  ;;  %v1239_v28 = vmax.f32 %v1099_v22, %v1101_v24 }
 0x1d7   :  { %1757 = vst.msk [vmem:[%s2669_s3 + $0xec] sm:$0xf] %vm1697_vm1, %v1998_v25  ;;  %v1373_v29 = vadd.f32 %v2564_v58, %v1302_v26  ;;  %v1303_v30 = vmax.f32 %v1175_v27, %v1239_v28 }
 0x1d9   :  { %v1437_v31 = vmax.f32 %v1373_v29, 0.0  ;;  %v1374_v32 = vadd.f32 %v2564_v58, %v1303_v30  ;;  %v752_v33 = vpop.f32.mrb[124].mxu0  ;;  %v1105_v34 = vpop.f32.mrb[124].mxu1 }
 0x1da   :  { %v754_v35 = vpop.f32.mrb[125].mxu0  ;;  %v1107_v36 = vpop.f32.mrb[125].mxu1 }
 0x1db   :  { %v1999_v37 = vpack.c.bf16 %v1437_v31, %v1437_v31  ;;  %v1438_v38 = vmax.f32 %v1374_v32, 0.0  ;;  %v1176_v39 = vmax.f32 %v752_v33, %v754_v35  ;;  %v1240_v40 = vmax.f32 %v1105_v34, %v1107_v36  ;;  %v756_v41 = vpop.f32.mrb[126].mxu0  ;;  %v1109_v42 = vpop.f32.mrb[126].mxu1 }
 0x1dc   :  { %v758_v43 = vpop.f32.mrb[127].mxu0  ;;  %v1111_v44 = vpop.f32.mrb[127].mxu1 }
 0x1dd   :  { %1758 = vst.msk [vmem:[%s2669_s3 + $0xf0] sm:$0xf] %vm1697_vm1, %v1999_v37  ;;  %v2000_v45 = vpack.c.bf16 %v1438_v38, %v1438_v38  ;;  %v1304_v46 = vmax.f32 %v1176_v39, %v1240_v40  ;;  %v1177_v47 = vmax.f32 %v756_v41, %v758_v43  ;;  %v1241_v48 = vmax.f32 %v1109_v42, %v1111_v44 }
 0x1df   :  { %1759 = vst.msk [vmem:[%s2669_s3 + $0xf4] sm:$0xf] %vm1697_vm1, %v2000_v45  ;;  %v1375_v50 = vadd.f32 %v2564_v58, %v1304_v46  ;;  %v1305_v51 = vmax.f32 %v1177_v47, %v1241_v48 }
 0x1e1   :  { %v1439_v52 = vmax.f32 %v1375_v50, 0.0  ;;  %v1376_v53 = vadd.f32 %v2564_v58, %v1305_v51 }
 0x1e3   :  { %v2001_v54 = vpack.c.bf16 %v1439_v52, %v1439_v52  ;;  %v1440_v55 = vmax.f32 %v1376_v53, 0.0 }
 0x1e5   :  { %1760 = vst.msk [vmem:[%s2669_s3 + $0xf8] sm:$0xf] %vm1697_vm1, %v2001_v54  ;;  %v2002_v56 = vpack.c.bf16 %v1440_v55, %v1440_v55 }
 0x1e7   :  { %1761 = vst.msk [vmem:[%s2669_s3 + $0xfc] sm:$0xf] %vm1697_vm1, %v2002_v56 }

// kernel: forward.4
= control target key start
LH: loop header
LB: loop body
LE: loop exit
PB: predicated region body
PF: predicated region fallthrough
CT: control target
= control target key end

     0   :  { %vm1577_vm0 = vcmask 519168   ;;  %s2680_s1 = inlined_call_operand.vmem [shape: bf16[512,512], index: 1, kind: input, shape index: {}]   ;;  %s2681_s0 = inlined_call_operand.vmem [shape: bf16[128,512], index: 0, kind: input, shape index: {}]   ;;  %s2682_s2 = inlined_call_operand.vmem [shape: f32[1,64], index: 2, kind: input, shape index: {}]   ;;  %s2683_s3 = inlined_call_operand.vmem [shape: bf16[128,64], index: 3, kind: output, shape index: {}]  }
   0x1   :  { %v1855_v0 = vld [vmem:[%s2680_s1 + $0x4] ss:$16 sps:$4 sm:$0xff]   ;;  %v1857_v1 = vld [vmem:[%s2680_s1 + $0xc] ss:$16 sps:$4 sm:$0xff]   ;;  %v1859_v2 = vld [vmem:[%s2680_s1] ss:$16 sps:$4 sm:$0xff]  }
   0x2   :  { %974 = vmatprep.subr.bf16.mxu0 %v1855_v0  ;;  %v1860_v3 = vld [vmem:[%s2680_s1 + $0x8] ss:$16 sps:$4 sm:$0xff]   ;;  %1200 = vmatprep.subr.bf16.mxu1 %v1857_v1  ;;  %v1861_v4 = vld [vmem:[%s2680_s1 + $0x24] ss:$16 sps:$4 sm:$0xff]   ;;  %v1863_v5 = vld [vmem:[%s2680_s1 + $0x2c] ss:$16 sps:$4 sm:$0xff]  }
   0x3   :  { %975 = vmatpush1.bf16.msra.mxu0 %v1859_v2  ;;  %1201 = vmatpush1.bf16.msra.mxu1 %v1860_v3  ;;  %v1865_v6 = vld [vmem:[%s2680_s1 + $0x20] ss:$16 sps:$4 sm:$0xff]   ;;  %v1866_v7 = vld [vmem:[%s2680_s1 + $0x28] ss:$16 sps:$4 sm:$0xff]   ;;  %v1867_v8 = vld [vmem:[%s2680_s1 + $0x44] ss:$16 sps:$4 sm:$0xff]  }
   0x4   :  { %976 = vmatprep.subr.bf16.mxu0 %v1861_v4  ;;  %1202 = vmatprep.subr.bf16.mxu1 %v1863_v5  ;;  %v1869_v9 = vld [vmem:[%s2680_s1 + $0x4c] ss:$16 sps:$4 sm:$0xff]   ;;  %v1871_v10 = vld [vmem:[%s2680_s1 + $0x40] ss:$16 sps:$4 sm:$0xff]   ;;  %v1872_v11 = vld [vmem:[%s2680_s1 + $0x48] ss:$16 sps:$4 sm:$0xff]  }
   0x5   :  { %v1873_v12 = vld [vmem:[%s2680_s1 + $0x64] ss:$16 sps:$4 sm:$0xff]   ;;  %v1875_v13 = vld [vmem:[%s2680_s1 + $0x6c] ss:$16 sps:$4 sm:$0xff]   ;;  %v1877_v14 = vld [vmem:[%s2680_s1 + $0x60] ss:$16 sps:$4 sm:$0xff]  }
   0x6   :  { %v1878_v15 = vld [vmem:[%s2680_s1 + $0x68] ss:$16 sps:$4 sm:$0xff]   ;;  %v1879_v16 = vld [vmem:[%s2680_s1 + $0x84] ss:$16 sps:$4 sm:$0xff]   ;;  %v1881_v17 = vld [vmem:[%s2680_s1 + $0x8c] ss:$16 sps:$4 sm:$0xff]  }
   0x7   :  { %977 = vmatpush1.bf16.msra.mxu0 %v1865_v6  ;;  %1203 = vmatpush1.bf16.msra.mxu1 %v1866_v7  ;;  %v1883_v18 = vld [vmem:[%s2680_s1 + $0x80] ss:$16 sps:$4 sm:$0xff]   ;;  %v1884_v19 = vld [vmem:[%s2680_s1 + $0x88] ss:$16 sps:$4 sm:$0xff]   ;;  %v1885_v20 = vld [vmem:[%s2680_s1 + $0xa4] ss:$16 sps:$4 sm:$0xff]  }
   0x8   :  { %978 = vmatprep.subr.bf16.mxu0 %v1867_v8  ;;  %1204 = vmatprep.subr.bf16.mxu1 %v1869_v9  ;;  %v1887_v21 = vld [vmem:[%s2680_s1 + $0xac] ss:$16 sps:$4 sm:$0xff]   ;;  %v1889_v22 = vld [vmem:[%s2680_s1 + $0xa0] ss:$16 sps:$4 sm:$0xff]   ;;  %v1890_v23 = vld [vmem:[%s2680_s1 + $0xa8] ss:$16 sps:$4 sm:$0xff]  }
   0x9   :  { %v1891_v24 = vld [vmem:[%s2680_s1 + $0xc4] ss:$16 sps:$4 sm:$0xff]   ;;  %v1893_v25 = vld [vmem:[%s2680_s1 + $0xcc] ss:$16 sps:$4 sm:$0xff]   ;;  %v1895_v26 = vld [vmem:[%s2680_s1 + $0xc0] ss:$16 sps:$4 sm:$0xff]  }
   0xa   :  { %v1896_v27 = vld [vmem:[%s2680_s1 + $0xc8] ss:$16 sps:$4 sm:$0xff]   ;;  %v1897_v28 = vld [vmem:[%s2680_s1 + $0xe4] ss:$16 sps:$4 sm:$0xff]   ;;  %v1899_v29 = vld [vmem:[%s2680_s1 + $0xec] ss:$16 sps:$4 sm:$0xff]  }
   0xb   :  { %979 = vmatpush1.bf16.msra.mxu0 %v1871_v10  ;;  %1205 = vmatpush1.bf16.msra.mxu1 %v1872_v11  ;;  %v1901_v30 = vld [vmem:[%s2680_s1 + $0xe0] ss:$16 sps:$4 sm:$0xff]   ;;  %v1902_v31 = vld [vmem:[%s2680_s1 + $0xe8] ss:$16 sps:$4 sm:$0xff]   ;;  %v1903_v32 = vld [vmem:[%s2680_s1 + $0x104] ss:$16 sps:$4 sm:$0xff]  }
   0xc   :  { %980 = vmatprep.subr.bf16.mxu0 %v1873_v12  ;;  %1206 = vmatprep.subr.bf16.mxu1 %v1875_v13  ;;  %v1905_v33 = vld [vmem:[%s2680_s1 + $0x10c] ss:$16 sps:$4 sm:$0xff]   ;;  %v1907_v34 = vld [vmem:[%s2680_s1 + $0x100] ss:$16 sps:$4 sm:$0xff]   ;;  %v1908_v35 = vld [vmem:[%s2680_s1 + $0x108] ss:$16 sps:$4 sm:$0xff]  }
   0xd   :  { %v1909_v36 = vld [vmem:[%s2680_s1 + $0x124] ss:$16 sps:$4 sm:$0xff]   ;;  %v1911_v37 = vld [vmem:[%s2680_s1 + $0x12c] ss:$16 sps:$4 sm:$0xff]   ;;  %v1913_v38 = vld [vmem:[%s2680_s1 + $0x120] ss:$16 sps:$4 sm:$0xff]  }
   0xe   :  { %v1914_v39 = vld [vmem:[%s2680_s1 + $0x128] ss:$16 sps:$4 sm:$0xff]   ;;  %v1915_v40 = vld [vmem:[%s2680_s1 + $0x144] ss:$16 sps:$4 sm:$0xff]   ;;  %v1917_v41 = vld [vmem:[%s2680_s1 + $0x14c] ss:$16 sps:$4 sm:$0xff]  }
   0xf   :  { %981 = vmatpush1.bf16.msra.mxu0 %v1877_v14  ;;  %1207 = vmatpush1.bf16.msra.mxu1 %v1878_v15  ;;  %v1919_v42 = vld [vmem:[%s2680_s1 + $0x140] ss:$16 sps:$4 sm:$0xff]   ;;  %v1920_v43 = vld [vmem:[%s2680_s1 + $0x148] ss:$16 sps:$4 sm:$0xff]   ;;  %v1921_v44 = vld [vmem:[%s2680_s1 + $0x164] ss:$16 sps:$4 sm:$0xff]  }
  0x10   :  { %982 = vmatprep.subr.bf16.mxu0 %v1879_v16  ;;  %1208 = vmatprep.subr.bf16.mxu1 %v1881_v17  ;;  %v1923_v45 = vld [vmem:[%s2680_s1 + $0x16c] ss:$16 sps:$4 sm:$0xff]   ;;  %v1925_v46 = vld [vmem:[%s2680_s1 + $0x160] ss:$16 sps:$4 sm:$0xff]   ;;  %v1926_v47 = vld [vmem:[%s2680_s1 + $0x168] ss:$16 sps:$4 sm:$0xff]  }
  0x11   :  { %v1953_v48 = vld [vmem:[%s2681_s0 + $0x4] ss:$16 sps:$4 sm:$0xff]   ;;  %v1929_v50 = vld [vmem:[%s2680_s1 + $0x18c] ss:$16 sps:$4 sm:$0xff]   ;;  %v1931_v51 = vld [vmem:[%s2680_s1 + $0x180] ss:$16 sps:$4 sm:$0xff]  }
  0x12   :  { %v1927_v49 = vld [vmem:[%s2680_s1 + $0x184] ss:$16 sps:$4 sm:$0xff]   ;;  %1006 = vmatprep.mubr.bf16.mxu0 %v1953_v48  ;;  %1232 = vmatprep.mubr.bf16.mxu1 %v1953_v48  ;;  %v1932_v52 = vld [vmem:[%s2680_s1 + $0x188] ss:$16 sps:$4 sm:$0xff]   ;;  %v1935_v54 = vld [vmem:[%s2680_s1 + $0x1ac] ss:$16 sps:$4 sm:$0xff]  }
  0x13   :  { %983 = vmatpush1.bf16.msra.mxu0 %v1883_v18  ;;  %1209 = vmatpush1.bf16.msra.mxu1 %v1884_v19  ;;  %v1933_v53 = vld [vmem:[%s2680_s1 + $0x1a4] ss:$16 sps:$4 sm:$0xff]   ;;  %v1937_v55 = vld [vmem:[%s2680_s1 + $0x1a0] ss:$16 sps:$4 sm:$0xff]   ;;  %v1938_v56 = vld [vmem:[%s2680_s1 + $0x1a8] ss:$16 sps:$4 sm:$0xff]  }
  0x14   :  { %984 = vmatprep.subr.bf16.mxu0 %v1885_v20  ;;  %1210 = vmatprep.subr.bf16.mxu1 %v1887_v21  ;;  %v1939_v57 = vld [vmem:[%s2680_s1 + $0x1c4] ss:$16 sps:$4 sm:$0xff]   ;;  %v1941_v58 = vld [vmem:[%s2680_s1 + $0x1cc] ss:$16 sps:$4 sm:$0xff]   ;;  %v1943_v59 = vld [vmem:[%s2680_s1 + $0x1c0] ss:$16 sps:$4 sm:$0xff]  }
  0x15   :  { %v1944_v60 = vld [vmem:[%s2680_s1 + $0x1c8] ss:$16 sps:$4 sm:$0xff]   ;;  %v1945_v61 = vld [vmem:[%s2680_s1 + $0x1e4] ss:$16 sps:$4 sm:$0xff]   ;;  %v1947_v62 = vld [vmem:[%s2680_s1 + $0x1ec] ss:$16 sps:$4 sm:$0xff]  }
  0x16   :  { %v1949_v63 = vld [vmem:[%s2680_s1 + $0x1e0] ss:$16 sps:$4 sm:$0xff]   ;;  %v1950_v0 = vld [vmem:[%s2680_s1 + $0x1e8] ss:$16 sps:$4 sm:$0xff]   ;;  %v1956_v1 = vld [vmem:[%s2680_s1 + $0x204] ss:$16 sps:$4 sm:$0xff]  }
  0x17   :  { %985 = vmatpush1.bf16.msra.mxu0 %v1889_v22  ;;  %1211 = vmatpush1.bf16.msra.mxu1 %v1890_v23  ;;  %v1959_v2 = vld [vmem:[%s2680_s1 + $0x20c] ss:$16 sps:$4 sm:$0xff]   ;;  %v1951_v3 = vld [vmem:[%s2681_s0] ss:$16 sps:$4 sm:$0xff]   ;;  %v1957_v5 = vld [vmem:[%s2680_s1 + $0x208] ss:$16 sps:$4 sm:$0xff]  }
  0x18   :  { %986 = vmatprep.subr.bf16.mxu0 %v1891_v24  ;;  %1212 = vmatprep.subr.bf16.mxu1 %v1893_v25  ;;  %v1954_v4 = vld [vmem:[%s2680_s1 + $0x200] ss:$16 sps:$4 sm:$0xff]   ;;  %v1962_v6 = vld [vmem:[%s2680_s1 + $0x224] ss:$16 sps:$4 sm:$0xff]   ;;  %v1965_v7 = vld [vmem:[%s2680_s1 + $0x22c] ss:$16 sps:$4 sm:$0xff]  }
  0x19   :  { %v1966_v8 = vld [vmem:[%s2681_s0 + $0x24] ss:$16 sps:$4 sm:$0xff]   ;;  %v1960_v9 = vld [vmem:[%s2680_s1 + $0x220] ss:$16 sps:$4 sm:$0xff]   ;;  %v1963_v10 = vld [vmem:[%s2680_s1 + $0x228] ss:$16 sps:$4 sm:$0xff]  }
  0x1a   :  { %v1971_v11 = vld [vmem:[%s2680_s1 + $0x244] ss:$16 sps:$4 sm:$0xff]   ;;  %v1974_v12 = vld [vmem:[%s2680_s1 + $0x24c] ss:$16 sps:$4 sm:$0xff]   ;;  %v1968_v13 = vld [vmem:[%s2681_s0 + $0x20] ss:$16 sps:$4 sm:$0xff]  }
  0x1b   :  { %987 = vmatpush1.bf16.msra.mxu0 %v1895_v26  ;;  %1213 = vmatpush1.bf16.msra.mxu1 %v1896_v27  ;;  %v1969_v14 = vld [vmem:[%s2680_s1 + $0x240] ss:$16 sps:$4 sm:$0xff]   ;;  %v1972_v15 = vld [vmem:[%s2680_s1 + $0x248] ss:$16 sps:$4 sm:$0xff]   ;;  %v1977_v16 = vld [vmem:[%s2680_s1 + $0x264] ss:$16 sps:$4 sm:$0xff]  }
  0x1c   :  { %988 = vmatprep.subr.bf16.mxu0 %v1897_v28  ;;  %1214 = vmatprep.subr.bf16.mxu1 %v1899_v29  ;;  %v1980_v17 = vld [vmem:[%s2680_s1 + $0x26c] ss:$16 sps:$4 sm:$0xff]   ;;  %v1981_v18 = vld [vmem:[%s2681_s0 + $0x44] ss:$16 sps:$4 sm:$0xff]   ;;  %v1975_v19 = vld [vmem:[%s2680_s1 + $0x260] ss:$16 sps:$4 sm:$0xff]  }
  0x1d   :  { %v1978_v20 = vld [vmem:[%s2680_s1 + $0x268] ss:$16 sps:$4 sm:$0xff]   ;;  %v1986_v21 = vld [vmem:[%s2680_s1 + $0x284] ss:$16 sps:$4 sm:$0xff]   ;;  %v1989_v22 = vld [vmem:[%s2680_s1 + $0x28c] ss:$16 sps:$4 sm:$0xff]  }
  0x1e   :  { %v1983_v23 = vld [vmem:[%s2681_s0 + $0x40] ss:$16 sps:$4 sm:$0xff]   ;;  %v1987_v25 = vld [vmem:[%s2680_s1 + $0x288] ss:$16 sps:$4 sm:$0xff]   ;;  %v1992_v26 = vld [vmem:[%s2680_s1 + $0x2a4] ss:$16 sps:$4 sm:$0xff]  }
  0x1f   :  { %989 = vmatpush1.bf16.msra.mxu0 %v1901_v30  ;;  %1215 = vmatpush1.bf16.msra.mxu1 %v1902_v31  ;;  %v1984_v24 = vld [vmem:[%s2680_s1 + $0x280] ss:$16 sps:$4 sm:$0xff]   ;;  %v1995_v27 = vld [vmem:[%s2680_s1 + $0x2ac] ss:$16 sps:$4 sm:$0xff]   ;;  %v1996_v28 = vld [vmem:[%s2681_s0 + $0x64] ss:$16 sps:$4 sm:$0xff]  }
  0x20   :  { %990 = vmatprep.subr.bf16.mxu0 %v1903_v32  ;;  %1216 = vmatprep.subr.bf16.mxu1 %v1905_v33  ;;  %v1990_v29 = vld [vmem:[%s2680_s1 + $0x2a0] ss:$16 sps:$4 sm:$0xff]   ;;  %v1993_v30 = vld [vmem:[%s2680_s1 + $0x2a8] ss:$16 sps:$4 sm:$0xff]   ;;  %v2001_v31 = vld [vmem:[%s2680_s1 + $0x2c4] ss:$16 sps:$4 sm:$0xff]  }
  0x21   :  { %v2004_v32 = vld [vmem:[%s2680_s1 + $0x2cc] ss:$16 sps:$4 sm:$0xff]   ;;  %v1998_v33 = vld [vmem:[%s2681_s0 + $0x60] ss:$16 sps:$4 sm:$0xff]   ;;  %v2026_v48 = vld [vmem:[%s2681_s0 + $0xa4] ss:$16 sps:$4 sm:$0xff]  }
  0x23   :  { %991 = vmatpush1.bf16.msra.mxu0 %v1907_v34  ;;  %1217 = vmatpush1.bf16.msra.mxu1 %v1908_v35  ;;  %v1999_v34 = vld [vmem:[%s2680_s1 + $0x2c0] ss:$16 sps:$4 sm:$0xff]   ;;  %v2002_v35 = vld [vmem:[%s2680_s1 + $0x2c8] ss:$16 sps:$4 sm:$0xff]  }
  0x24   :  { %992 = vmatprep.subr.bf16.mxu0 %v1909_v36  ;;  %1218 = vmatprep.subr.bf16.mxu1 %v1911_v37  ;;  %v2007_v36 = vld [vmem:[%s2680_s1 + $0x2e4] ss:$16 sps:$4 sm:$0xff]   ;;  %v2010_v37 = vld [vmem:[%s2680_s1 + $0x2ec] ss:$16 sps:$4 sm:$0xff]  }
  0x27   :  { %993 = vmatpush1.bf16.msra.mxu0 %v1913_v38  ;;  %1219 = vmatpush1.bf16.msra.mxu1 %v1914_v39  ;;  %v2011_v38 = vld [vmem:[%s2681_s0 + $0x84] ss:$16 sps:$4 sm:$0xff]   ;;  %v2005_v39 = vld [vmem:[%s2680_s1 + $0x2e0] ss:$16 sps:$4 sm:$0xff]  }
  0x28   :  { %994 = vmatprep.subr.bf16.mxu0 %v1915_v40  ;;  %1220 = vmatprep.subr.bf16.mxu1 %v1917_v41  ;;  %v2008_v40 = vld [vmem:[%s2680_s1 + $0x2e8] ss:$16 sps:$4 sm:$0xff]   ;;  %v2016_v41 = vld [vmem:[%s2680_s1 + $0x304] ss:$16 sps:$4 sm:$0xff]  }
  0x2b   :  { %995 = vmatpush1.bf16.msra.mxu0 %v1919_v42  ;;  %1221 = vmatpush1.bf16.msra.mxu1 %v1920_v43  ;;  %v2019_v42 = vld [vmem:[%s2680_s1 + $0x30c] ss:$16 sps:$4 sm:$0xff]   ;;  %v2013_v43 = vld [vmem:[%s2681_s0 + $0x80] ss:$16 sps:$4 sm:$0xff]  }
  0x2c   :  { %996 = vmatprep.subr.bf16.mxu0 %v1921_v44  ;;  %1222 = vmatprep.subr.bf16.mxu1 %v1923_v45  ;;  %v2014_v44 = vld [vmem:[%s2680_s1 + $0x300] ss:$16 sps:$4 sm:$0xff]   ;;  %v2017_v45 = vld [vmem:[%s2680_s1 + $0x308] ss:$16 sps:$4 sm:$0xff]  }
  0x2f   :  { %997 = vmatpush1.bf16.msra.mxu0 %v1925_v46  ;;  %1223 = vmatpush1.bf16.msra.mxu1 %v1926_v47  ;;  %v2022_v46 = vld [vmem:[%s2680_s1 + $0x324] ss:$16 sps:$4 sm:$0xff]   ;;  %v2025_v47 = vld [vmem:[%s2680_s1 + $0x32c] ss:$16 sps:$4 sm:$0xff]  }
  0x30   :  { %998 = vmatprep.subr.bf16.mxu0 %v1927_v49  ;;  %1224 = vmatprep.subr.bf16.mxu1 %v1929_v50  ;;  %v2020_v49 = vld [vmem:[%s2680_s1 + $0x320] ss:$16 sps:$4 sm:$0xff]   ;;  %v2023_v50 = vld [vmem:[%s2680_s1 + $0x328] ss:$16 sps:$4 sm:$0xff]  }
  0x33   :  { %999 = vmatpush1.bf16.msra.mxu0 %v1931_v51  ;;  %1225 = vmatpush1.bf16.msra.mxu1 %v1932_v52  ;;  %v2031_v51 = vld [vmem:[%s2680_s1 + $0x344] ss:$16 sps:$4 sm:$0xff]   ;;  %v2034_v52 = vld [vmem:[%s2680_s1 + $0x34c] ss:$16 sps:$4 sm:$0xff]  }
  0x34   :  { %1000 = vmatprep.subr.bf16.mxu0 %v1933_v53  ;;  %1226 = vmatprep.subr.bf16.mxu1 %v1935_v54  ;;  %v2028_v53 = vld [vmem:[%s2681_s0 + $0xa0] ss:$16 sps:$4 sm:$0xff]  }
  0x35   :  { %v2029_v54 = vld [vmem:[%s2680_s1 + $0x340] ss:$16 sps:$4 sm:$0xff]  }
  0x37   :  { %1001 = vmatpush1.bf16.msra.mxu0 %v1937_v55  ;;  %1227 = vmatpush1.bf16.msra.mxu1 %v1938_v56  ;;  %v2032_v55 = vld [vmem:[%s2680_s1 + $0x348] ss:$16 sps:$4 sm:$0xff]   ;;  %v2037_v56 = vld [vmem:[%s2680_s1 + $0x364] ss:$16 sps:$4 sm:$0xff]  }
  0x38   :  { %1002 = vmatprep.subr.bf16.mxu0 %v1939_v57  ;;  %1228 = vmatprep.subr.bf16.mxu1 %v1941_v58  ;;  %v2040_v57 = vld [vmem:[%s2680_s1 + $0x36c] ss:$16 sps:$4 sm:$0xff]   ;;  %v2041_v58 = vld [vmem:[%s2681_s0 + $0xc4] ss:$16 sps:$4 sm:$0xff]  }
  0x3b   :  { %1003 = vmatpush1.bf16.msra.mxu0 %v1943_v59  ;;  %1229 = vmatpush1.bf16.msra.mxu1 %v1944_v60  ;;  %v2035_v59 = vld [vmem:[%s2680_s1 + $0x360] ss:$16 sps:$4 sm:$0xff]   ;;  %v2038_v60 = vld [vmem:[%s2680_s1 + $0x368] ss:$16 sps:$4 sm:$0xff]  }
  0x3c   :  { %1004 = vmatprep.subr.bf16.mxu0 %v1945_v61  ;;  %1230 = vmatprep.subr.bf16.mxu1 %v1947_v62  ;;  %v2046_v61 = vld [vmem:[%s2680_s1 + $0x384] ss:$16 sps:$4 sm:$0xff]   ;;  %v2049_v62 = vld [vmem:[%s2680_s1 + $0x38c] ss:$16 sps:$4 sm:$0xff]  }
  0x3f   :  { %1005 = vmatpush1.bf16.msra.mxu0 %v1949_v63  ;;  %1231 = vmatpush1.bf16.msra.mxu1 %v1950_v0  ;;  %v2043_v63 = vld [vmem:[%s2681_s0 + $0xc0] ss:$16 sps:$4 sm:$0xff]  }
  0x40   :  { %1087 = vmatprep.subr.bf16.mxu0 %v1956_v1  ;;  %1313 = vmatprep.subr.bf16.mxu1 %v1959_v2  ;;  %v2044_v0 = vld [vmem:[%s2680_s1 + $0x380] ss:$16 sps:$4 sm:$0xff]   ;;  %v2047_v1 = vld [vmem:[%s2680_s1 + $0x388] ss:$16 sps:$4 sm:$0xff]   ;;  %v2052_v2 = vld [vmem:[%s2680_s1 + $0x3a4] ss:$16 sps:$4 sm:$0xff]  }
  0x42   :  { %1007 = vmatmul.mubr.bf16.vlgmr.msra.gmra.mrb[0].mxu0 %v1951_v3  ;;  %1233 = vmatmul.mubr.bf16.vlgmr.msra.gmra.mrb[0].mxu1 %v1951_v3  ;;  %v2055_v3 = vld [vmem:[%s2680_s1 + $0x3ac] ss:$16 sps:$4 sm:$0xff]  }
  0x43   :  { %1088 = vmatpush1.bf16.msra.mxu0 %v1954_v4  ;;  %1314 = vmatpush1.bf16.msra.mxu1 %v1957_v5  ;;  %v2056_v4 = vld [vmem:[%s2681_s0 + $0xe4] ss:$16 sps:$4 sm:$0xff]   ;;  %v2050_v5 = vld [vmem:[%s2680_s1 + $0x3a0] ss:$16 sps:$4 sm:$0xff]  }
  0x44   :  { %1089 = vmatprep.subr.bf16.mxu0 %v1962_v6  ;;  %1315 = vmatprep.subr.bf16.mxu1 %v1965_v7  ;;  %v2053_v6 = vld [vmem:[%s2680_s1 + $0x3a8] ss:$16 sps:$4 sm:$0xff]   ;;  %v2061_v7 = vld [vmem:[%s2680_s1 + $0x3c4] ss:$16 sps:$4 sm:$0xff]  }
  0x45   :  { %1016 = vmatprep.mubr.bf16.mxu0 %v1966_v8  ;;  %1242 = vmatprep.mubr.bf16.mxu1 %v1966_v8  ;;  %v2064_v8 = vld [vmem:[%s2680_s1 + $0x3cc] ss:$16 sps:$4 sm:$0xff]  }
  0x47   :  { %1090 = vmatpush1.bf16.msra.mxu0 %v1960_v9  ;;  %1316 = vmatpush1.bf16.msra.mxu1 %v1963_v10  ;;  %v2058_v9 = vld [vmem:[%s2681_s0 + $0xe0] ss:$16 sps:$4 sm:$0xff]  }
  0x48   :  { %1091 = vmatprep.subr.bf16.mxu0 %v1971_v11  ;;  %1317 = vmatprep.subr.bf16.mxu1 %v1974_v12  ;;  %v2059_v10 = vld [vmem:[%s2680_s1 + $0x3c0] ss:$16 sps:$4 sm:$0xff]   ;;  %v2062_v11 = vld [vmem:[%s2680_s1 + $0x3c8] ss:$16 sps:$4 sm:$0xff]   ;;  %v2067_v12 = vld [vmem:[%s2680_s1 + $0x3e4] ss:$16 sps:$4 sm:$0xff]  }
  0x4a   :  { %1017 = vmatmul.mubr.bf16.gmra.mrb[4].mxu0 %v1968_v13  ;;  %1243 = vmatmul.mubr.bf16.gmra.mrb[4].mxu1 %v1968_v13  ;;  %v2070_v13 = vld [vmem:[%s2680_s1 + $0x3ec] ss:$16 sps:$4 sm:$0xff]  }
  0x4b   :  { %1092 = vmatpush1.bf16.msra.mxu0 %v1969_v14  ;;  %1318 = vmatpush1.bf16.msra.mxu1 %v1972_v15  ;;  %v2073_v14 = vld [vmem:[%s2681_s0 + $0xc] ss:$16 sps:$4 sm:$0xff]   ;;  %v2065_v15 = vld [vmem:[%s2680_s1 + $0x3e0] ss:$16 sps:$4 sm:$0xff]  }
  0x4c   :  { %1093 = vmatprep.subr.bf16.mxu0 %v1977_v16  ;;  %1319 = vmatprep.subr.bf16.mxu1 %v1980_v17  ;;  %v2068_v16 = vld [vmem:[%s2680_s1 + $0x3e8] ss:$16 sps:$4 sm:$0xff]  }
  0x4d   :  { %1026 = vmatprep.mubr.bf16.mxu0 %v1981_v18  ;;  %1252 = vmatprep.mubr.bf16.mxu1 %v1981_v18  ;;  %v2071_v17 = vld [vmem:[%s2681_s0 + $0x8] ss:$16 sps:$4 sm:$0xff]   ;;  %v2074_v18 = vld [vmem:[%s2681_s0 + $0x2c] ss:$16 sps:$4 sm:$0xff]  }
  0x4f   :  { %1094 = vmatpush1.bf16.msra.mxu0 %v1975_v19  ;;  %1320 = vmatpush1.bf16.msra.mxu1 %v1978_v20  ;;  %v2076_v19 = vld [vmem:[%s2681_s0 + $0x28] ss:$16 sps:$4 sm:$0xff]   ;;  %v2077_v20 = vld [vmem:[%s2681_s0 + $0x4c] ss:$16 sps:$4 sm:$0xff]  }
  0x50   :  { %1095 = vmatprep.subr.bf16.mxu0 %v1986_v21  ;;  %1321 = vmatprep.subr.bf16.mxu1 %v1989_v22  ;;  %v2079_v21 = vld [vmem:[%s2681_s0 + $0x48] ss:$16 sps:$4 sm:$0xff]   ;;  %v2080_v22 = vld [vmem:[%s2681_s0 + $0x6c] ss:$16 sps:$4 sm:$0xff]  }
  0x52   :  { %1027 = vmatmul.mubr.bf16.gmra.mrb[8].mxu0 %v1983_v23  ;;  %1253 = vmatmul.mubr.bf16.gmra.mrb[8].mxu1 %v1983_v23  ;;  %v2082_v23 = vld [vmem:[%s2681_s0 + $0x68] ss:$16 sps:$4 sm:$0xff]  }
  0x53   :  { %1096 = vmatpush1.bf16.msra.mxu0 %v1984_v24  ;;  %1322 = vmatpush1.bf16.msra.mxu1 %v1987_v25  ;;  %v2083_v24 = vld [vmem:[%s2681_s0 + $0x8c] ss:$16 sps:$4 sm:$0xff]   ;;  %v2085_v25 = vld [vmem:[%s2681_s0 + $0x88] ss:$16 sps:$4 sm:$0xff]  }
  0x54   :  { %1097 = vmatprep.subr.bf16.mxu0 %v1992_v26  ;;  %1323 = vmatprep.subr.bf16.mxu1 %v1995_v27  ;;  %v2086_v26 = vld [vmem:[%s2681_s0 + $0xac] ss:$16 sps:$4 sm:$0xff]   ;;  %v2088_v27 = vld [vmem:[%s2681_s0 + $0xa8] ss:$16 sps:$4 sm:$0xff]  }
  0x55   :  { %1036 = vmatprep.mubr.bf16.mxu0 %v1996_v28  ;;  %1262 = vmatprep.mubr.bf16.mxu1 %v1996_v28  ;;  %v2089_v28 = vld [vmem:[%s2681_s0 + $0xcc] ss:$16 sps:$4 sm:$0xff]  }
  0x57   :  { %1098 = vmatpush1.bf16.msra.mxu0 %v1990_v29  ;;  %1324 = vmatpush1.bf16.msra.mxu1 %v1993_v30  ;;  %v2091_v29 = vld [vmem:[%s2681_s0 + $0xc8] ss:$16 sps:$4 sm:$0xff]   ;;  %v2092_v30 = vld [vmem:[%s2681_s0 + $0xec] ss:$16 sps:$4 sm:$0xff]  }
  0x58   :  { %1099 = vmatprep.subr.bf16.mxu0 %v2001_v31  ;;  %1325 = vmatprep.subr.bf16.mxu1 %v2004_v32  ;;  %v2094_v31 = vld [vmem:[%s2681_s0 + $0xe8] ss:$16 sps:$4 sm:$0xff]  }
  0x5a   :  { %1037 = vmatmul.mubr.bf16.gmra.mrb[12].mxu0 %v1998_v33  ;;  %1263 = vmatmul.mubr.bf16.gmra.mrb[12].mxu1 %v1998_v33 }
  0x5b   :  { %1100 = vmatpush1.bf16.msra.mxu0 %v1999_v34  ;;  %1326 = vmatpush1.bf16.msra.mxu1 %v2002_v35 }
  0x5c   :  { %1101 = vmatprep.subr.bf16.mxu0 %v2007_v36  ;;  %1327 = vmatprep.subr.bf16.mxu1 %v2010_v37 }
  0x5d   :  { %1046 = vmatprep.mubr.bf16.mxu0 %v2011_v38  ;;  %1272 = vmatprep.mubr.bf16.mxu1 %v2011_v38 }
  0x5f   :  { %1102 = vmatpush1.bf16.msra.mxu0 %v2005_v39  ;;  %1328 = vmatpush1.bf16.msra.mxu1 %v2008_v40  ;;  %v2598_v40 = vld [vmem:[%s2682_s2] ss:$0 sm:$0xff] }
  0x60   :  { %1103 = vmatprep.subr.bf16.mxu0 %v2016_v41  ;;  %1329 = vmatprep.subr.bf16.mxu1 %v2019_v42 }
  0x62   :  { %1047 = vmatmul.mubr.bf16.gmra.mrb[16].mxu0 %v2013_v43  ;;  %1273 = vmatmul.mubr.bf16.gmra.mrb[16].mxu1 %v2013_v43 }
  0x63   :  { %1104 = vmatpush1.bf16.msra.mxu0 %v2014_v44  ;;  %1330 = vmatpush1.bf16.msra.mxu1 %v2017_v45 }
  0x64   :  { %1105 = vmatprep.subr.bf16.mxu0 %v2022_v46  ;;  %1331 = vmatprep.subr.bf16.mxu1 %v2025_v47 }
  0x65   :  { %1056 = vmatprep.mubr.bf16.mxu0 %v2026_v48  ;;  %1282 = vmatprep.mubr.bf16.mxu1 %v2026_v48 }
  0x67   :  { %1106 = vmatpush1.bf16.msra.mxu0 %v2020_v49  ;;  %1332 = vmatpush1.bf16.msra.mxu1 %v2023_v50 }
  0x68   :  { %1107 = vmatprep.subr.bf16.mxu0 %v2031_v51  ;;  %1333 = vmatprep.subr.bf16.mxu1 %v2034_v52 }
  0x6a   :  { %1057 = vmatmul.mubr.bf16.gmra.mrb[20].mxu0 %v2028_v53  ;;  %1283 = vmatmul.mubr.bf16.gmra.mrb[20].mxu1 %v2028_v53 }
  0x6b   :  { %1108 = vmatpush1.bf16.msra.mxu0 %v2029_v54  ;;  %1334 = vmatpush1.bf16.msra.mxu1 %v2032_v55 }
  0x6c   :  { %1109 = vmatprep.subr.bf16.mxu0 %v2037_v56  ;;  %1335 = vmatprep.subr.bf16.mxu1 %v2040_v57 }
  0x6d   :  { %1066 = vmatprep.mubr.bf16.mxu0 %v2041_v58  ;;  %1292 = vmatprep.mubr.bf16.mxu1 %v2041_v58 }
  0x6f   :  { %1110 = vmatpush1.bf16.msra.mxu0 %v2035_v59  ;;  %1336 = vmatpush1.bf16.msra.mxu1 %v2038_v60 }
  0x70   :  { %1111 = vmatprep.subr.bf16.mxu0 %v2046_v61  ;;  %1337 = vmatprep.subr.bf16.mxu1 %v2049_v62 }
  0x72   :  { %1067 = vmatmul.mubr.bf16.gmra.mrb[24].mxu0 %v2043_v63  ;;  %1293 = vmatmul.mubr.bf16.gmra.mrb[24].mxu1 %v2043_v63 }
  0x73   :  { %1112 = vmatpush1.bf16.msra.mxu0 %v2044_v0  ;;  %1338 = vmatpush1.bf16.msra.mxu1 %v2047_v1 }
  0x74   :  { %1113 = vmatprep.subr.bf16.mxu0 %v2052_v2  ;;  %1339 = vmatprep.subr.bf16.mxu1 %v2055_v3 }
  0x75   :  { %1076 = vmatprep.mubr.bf16.mxu0 %v2056_v4  ;;  %1302 = vmatprep.mubr.bf16.mxu1 %v2056_v4 }
  0x77   :  { %1114 = vmatpush1.bf16.msra.mxu0 %v2050_v5  ;;  %1340 = vmatpush1.bf16.msra.mxu1 %v2053_v6 }
  0x78   :  { %1115 = vmatprep.subr.bf16.mxu0 %v2061_v7  ;;  %1341 = vmatprep.subr.bf16.mxu1 %v2064_v8 }
  0x7a   :  { %1077 = vmatmul.mubr.bf16.gmra.mrb[28].mxu0 %v2058_v9  ;;  %1303 = vmatmul.mubr.bf16.gmra.mrb[28].mxu1 %v2058_v9 }
  0x7b   :  { %1116 = vmatpush1.bf16.msra.mxu0 %v2059_v10  ;;  %1342 = vmatpush1.bf16.msra.mxu1 %v2062_v11 }
  0x7c   :  { %1117 = vmatprep.subr.bf16.mxu0 %v2067_v12  ;;  %1343 = vmatprep.subr.bf16.mxu1 %v2070_v13 }
  0x7d   :  { %1119 = vmatprep.mubr.bf16.mxu0 %v2073_v14  ;;  %1345 = vmatprep.mubr.bf16.mxu1 %v2073_v14 }
  0x7f   :  { %1118 = vmatpush1.bf16.msra.mxu0 %v2065_v15  ;;  %1344 = vmatpush1.bf16.msra.mxu1 %v2068_v16 }
  0x82   :  { %1120 = vmatmul.mubr.bf16.vlgmr.msra.gmra.mrb[0].mxu0 %v2071_v17  ;;  %1346 = vmatmul.mubr.bf16.vlgmr.msra.gmra.mrb[0].mxu1 %v2071_v17 }
  0x83   :  { %1129 = vmatprep.mubr.bf16.mxu0 %v2074_v18  ;;  %1355 = vmatprep.mubr.bf16.mxu1 %v2074_v18 }
  0x8a   :  { %1130 = vmatmul.mubr.bf16.gmra.mrb[4].mxu0 %v2076_v19  ;;  %1356 = vmatmul.mubr.bf16.gmra.mrb[4].mxu1 %v2076_v19 }
  0x8b   :  { %1139 = vmatprep.mubr.bf16.mxu0 %v2077_v20  ;;  %1365 = vmatprep.mubr.bf16.mxu1 %v2077_v20 }
  0x92   :  { %1140 = vmatmul.mubr.bf16.gmra.mrb[8].mxu0 %v2079_v21  ;;  %1366 = vmatmul.mubr.bf16.gmra.mrb[8].mxu1 %v2079_v21 }
  0x93   :  { %1149 = vmatprep.mubr.bf16.mxu0 %v2080_v22  ;;  %1375 = vmatprep.mubr.bf16.mxu1 %v2080_v22 }
  0x9a   :  { %1150 = vmatmul.mubr.bf16.gmra.mrb[12].mxu0 %v2082_v23  ;;  %1376 = vmatmul.mubr.bf16.gmra.mrb[12].mxu1 %v2082_v23 }
  0x9b   :  { %1159 = vmatprep.mubr.bf16.mxu0 %v2083_v24  ;;  %1385 = vmatprep.mubr.bf16.mxu1 %v2083_v24 }
  0xa2   :  { %1160 = vmatmul.mubr.bf16.gmra.mrb[16].mxu0 %v2085_v25  ;;  %1386 = vmatmul.mubr.bf16.gmra.mrb[16].mxu1 %v2085_v25 }
  0xa3   :  { %1169 = vmatprep.mubr.bf16.mxu0 %v2086_v26  ;;  %1395 = vmatprep.mubr.bf16.mxu1 %v2086_v26 }
  0xaa   :  { %1170 = vmatmul.mubr.bf16.gmra.mrb[20].mxu0 %v2088_v27  ;;  %1396 = vmatmul.mubr.bf16.gmra.mrb[20].mxu1 %v2088_v27 }
  0xab   :  { %1179 = vmatprep.mubr.bf16.mxu0 %v2089_v28  ;;  %1405 = vmatprep.mubr.bf16.mxu1 %v2089_v28 }
  0xb2   :  { %1180 = vmatmul.mubr.bf16.gmra.mrb[24].mxu0 %v2091_v29  ;;  %1406 = vmatmul.mubr.bf16.gmra.mrb[24].mxu1 %v2091_v29 }
  0xb3   :  { %1189 = vmatprep.mubr.bf16.mxu0 %v2092_v30  ;;  %1415 = vmatprep.mubr.bf16.mxu1 %v2092_v30 }
  0xba   :  { %1190 = vmatmul.mubr.bf16.gmra.mrb[28].mxu0 %v2094_v31  ;;  %1416 = vmatmul.mubr.bf16.gmra.mrb[28].mxu1 %v2094_v31 }
 0x155   :  { %v1121_v32 = vpop.f32.mrb[0].mxu0  ;;  %v1347_v33 = vpop.f32.mrb[0].mxu1 }
 0x156   :  { %v1123_v34 = vpop.f32.mrb[1].mxu0  ;;  %v1349_v35 = vpop.f32.mrb[1].mxu1 }
 0x157   :  { %v1426_v36 = vmax.f32 %v1121_v32, %v1123_v34  ;;  %v1442_v37 = vmax.f32 %v1347_v33, %v1349_v35  ;;  %v1125_v38 = vpop.f32.mrb[2].mxu0  ;;  %v1351_v39 = vpop.f32.mrb[2].mxu1 }
 0x158   :  { %v1127_v41 = vpop.f32.mrb[3].mxu0  ;;  %v1353_v42 = vpop.f32.mrb[3].mxu1 }
 0x159   :  { %v1458_v43 = vmax.f32 %v1426_v36, %v1442_v37  ;;  %v1427_v44 = vmax.f32 %v1125_v38, %v1127_v41  ;;  %v1443_v45 = vmax.f32 %v1351_v39, %v1353_v42 }
 0x15b   :  { %v1481_v46 = vadd.f32 %v2598_v40, %v1458_v43  ;;  %v1459_v47 = vmax.f32 %v1427_v44, %v1443_v45 }
 0x15d   :  { %v1497_v48 = vmax.f32 %v1481_v46, 0.0  ;;  %v1482_v49 = vadd.f32 %v2598_v40, %v1459_v47  ;;  %v1131_v50 = vpop.f32.mrb[4].mxu0  ;;  %v1357_v51 = vpop.f32.mrb[4].mxu1 }
 0x15e   :  { %v1133_v52 = vpop.f32.mrb[5].mxu0  ;;  %v1359_v53 = vpop.f32.mrb[5].mxu1 }
 0x15f   :  { %v1775_v54 = vpack.c.bf16 %v1497_v48, %v1497_v48  ;;  %v1498_v55 = vmax.f32 %v1482_v49, 0.0  ;;  %v1428_v56 = vmax.f32 %v1131_v50, %v1133_v52  ;;  %v1444_v57 = vmax.f32 %v1357_v51, %v1359_v53  ;;  %v1135_v58 = vpop.f32.mrb[6].mxu0  ;;  %v1361_v59 = vpop.f32.mrb[6].mxu1 }
 0x160   :  { %v1137_v60 = vpop.f32.mrb[7].mxu0  ;;  %v1363_v61 = vpop.f32.mrb[7].mxu1 }
 0x161   :  { %1578 = vst.msk [vmem:[%s2683_s3] sm:$0xf] %vm1577_vm0, %v1775_v54  ;;  %v1776_v62 = vpack.c.bf16 %v1498_v55, %v1498_v55  ;;  %v1460_v63 = vmax.f32 %v1428_v56, %v1444_v57  ;;  %v1429_v0 = vmax.f32 %v1135_v58, %v1137_v60  ;;  %v1445_v1 = vmax.f32 %v1361_v59, %v1363_v61 }
 0x163   :  { %1579 = vst.msk [vmem:[%s2683_s3 + $0x4] sm:$0xf] %vm1577_vm0, %v1776_v62  ;;  %v1483_v2 = vadd.f32 %v2598_v40, %v1460_v63  ;;  %v1461_v3 = vmax.f32 %v1429_v0, %v1445_v1 }
 0x165   :  { %v1499_v4 = vmax.f32 %v1483_v2, 0.0  ;;  %v1484_v5 = vadd.f32 %v2598_v40, %v1461_v3  ;;  %v1141_v6 = vpop.f32.mrb[8].mxu0  ;;  %v1367_v7 = vpop.f32.mrb[8].mxu1 }
 0x166   :  { %v1143_v8 = vpop.f32.mrb[9].mxu0  ;;  %v1369_v9 = vpop.f32.mrb[9].mxu1 }
 0x167   :  { %v1777_v10 = vpack.c.bf16 %v1499_v4, %v1499_v4  ;;  %v1500_v11 = vmax.f32 %v1484_v5, 0.0  ;;  %v1430_v12 = vmax.f32 %v1141_v6, %v1143_v8  ;;  %v1446_v13 = vmax.f32 %v1367_v7, %v1369_v9  ;;  %v1145_v14 = vpop.f32.mrb[10].mxu0  ;;  %v1371_v15 = vpop.f32.mrb[10].mxu1 }
 0x168   :  { %v1147_v16 = vpop.f32.mrb[11].mxu0  ;;  %v1373_v17 = vpop.f32.mrb[11].mxu1 }
 0x169   :  { %1580 = vst.msk [vmem:[%s2683_s3 + $0x8] sm:$0xf] %vm1577_vm0, %v1777_v10  ;;  %v1778_v18 = vpack.c.bf16 %v1500_v11, %v1500_v11  ;;  %v1462_v19 = vmax.f32 %v1430_v12, %v1446_v13  ;;  %v1431_v20 = vmax.f32 %v1145_v14, %v1147_v16  ;;  %v1447_v21 = vmax.f32 %v1371_v15, %v1373_v17 }
 0x16b   :  { %1581 = vst.msk [vmem:[%s2683_s3 + $0xc] sm:$0xf] %vm1577_vm0, %v1778_v18  ;;  %v1485_v22 = vadd.f32 %v2598_v40, %v1462_v19  ;;  %v1463_v23 = vmax.f32 %v1431_v20, %v1447_v21 }
 0x16d   :  { %v1501_v24 = vmax.f32 %v1485_v22, 0.0  ;;  %v1486_v25 = vadd.f32 %v2598_v40, %v1463_v23  ;;  %v1151_v26 = vpop.f32.mrb[12].mxu0  ;;  %v1377_v27 = vpop.f32.mrb[12].mxu1 }
 0x16e   :  { %v1153_v28 = vpop.f32.mrb[13].mxu0  ;;  %v1379_v29 = vpop.f32.mrb[13].mxu1 }
 0x16f   :  { %v1779_v30 = vpack.c.bf16 %v1501_v24, %v1501_v24  ;;  %v1502_v31 = vmax.f32 %v1486_v25, 0.0  ;;  %v1432_v32 = vmax.f32 %v1151_v26, %v1153_v28  ;;  %v1448_v33 = vmax.f32 %v1377_v27, %v1379_v29  ;;  %v1155_v34 = vpop.f32.mrb[14].mxu0  ;;  %v1381_v35 = vpop.f32.mrb[14].mxu1 }
 0x170   :  { %v1157_v36 = vpop.f32.mrb[15].mxu0  ;;  %v1383_v37 = vpop.f32.mrb[15].mxu1 }
 0x171   :  { %1582 = vst.msk [vmem:[%s2683_s3 + $0x10] sm:$0xf] %vm1577_vm0, %v1779_v30  ;;  %v1780_v38 = vpack.c.bf16 %v1502_v31, %v1502_v31  ;;  %v1464_v39 = vmax.f32 %v1432_v32, %v1448_v33  ;;  %v1433_v41 = vmax.f32 %v1155_v34, %v1157_v36  ;;  %v1449_v42 = vmax.f32 %v1381_v35, %v1383_v37 }
 0x173   :  { %1583 = vst.msk [vmem:[%s2683_s3 + $0x14] sm:$0xf] %vm1577_vm0, %v1780_v38  ;;  %v1487_v43 = vadd.f32 %v2598_v40, %v1464_v39  ;;  %v1465_v44 = vmax.f32 %v1433_v41, %v1449_v42 }
 0x175   :  { %v1503_v45 = vmax.f32 %v1487_v43, 0.0  ;;  %v1488_v46 = vadd.f32 %v2598_v40, %v1465_v44  ;;  %v1161_v47 = vpop.f32.mrb[16].mxu0  ;;  %v1387_v48 = vpop.f32.mrb[16].mxu1 }
 0x176   :  { %v1163_v49 = vpop.f32.mrb[17].mxu0  ;;  %v1389_v50 = vpop.f32.mrb[17].mxu1 }
 0x177   :  { %v1781_v51 = vpack.c.bf16 %v1503_v45, %v1503_v45  ;;  %v1504_v52 = vmax.f32 %v1488_v46, 0.0  ;;  %v1434_v53 = vmax.f32 %v1161_v47, %v1163_v49  ;;  %v1450_v54 = vmax.f32 %v1387_v48, %v1389_v50  ;;  %v1165_v55 = vpop.f32.mrb[18].mxu0  ;;  %v1391_v56 = vpop.f32.mrb[18].mxu1 }
 0x178   :  { %v1167_v57 = vpop.f32.mrb[19].mxu0  ;;  %v1393_v58 = vpop.f32.mrb[19].mxu1 }
 0x179   :  { %1584 = vst.msk [vmem:[%s2683_s3 + $0x18] sm:$0xf] %vm1577_vm0, %v1781_v51  ;;  %v1782_v59 = vpack.c.bf16 %v1504_v52, %v1504_v52  ;;  %v1466_v60 = vmax.f32 %v1434_v53, %v1450_v54  ;;  %v1435_v61 = vmax.f32 %v1165_v55, %v1167_v57  ;;  %v1451_v62 = vmax.f32 %v1391_v56, %v1393_v58 }
 0x17b   :  { %1585 = vst.msk [vmem:[%s2683_s3 + $0x1c] sm:$0xf] %vm1577_vm0, %v1782_v59  ;;  %v1489_v63 = vadd.f32 %v2598_v40, %v1466_v60  ;;  %v1467_v0 = vmax.f32 %v1435_v61, %v1451_v62 }
 0x17d   :  { %v1505_v1 = vmax.f32 %v1489_v63, 0.0  ;;  %v1490_v2 = vadd.f32 %v2598_v40, %v1467_v0  ;;  %v1171_v3 = vpop.f32.mrb[20].mxu0  ;;  %v1397_v4 = vpop.f32.mrb[20].mxu1 }
 0x17e   :  { %v1173_v5 = vpop.f32.mrb[21].mxu0  ;;  %v1399_v6 = vpop.f32.mrb[21].mxu1 }
 0x17f   :  { %v1783_v7 = vpack.c.bf16 %v1505_v1, %v1505_v1  ;;  %v1506_v8 = vmax.f32 %v1490_v2, 0.0  ;;  %v1436_v9 = vmax.f32 %v1171_v3, %v1173_v5  ;;  %v1452_v10 = vmax.f32 %v1397_v4, %v1399_v6  ;;  %v1175_v11 = vpop.f32.mrb[22].mxu0  ;;  %v1401_v12 = vpop.f32.mrb[22].mxu1 }
 0x180   :  { %v1177_v13 = vpop.f32.mrb[23].mxu0  ;;  %v1403_v14 = vpop.f32.mrb[23].mxu1 }
 0x181   :  { %1586 = vst.msk [vmem:[%s2683_s3 + $0x20] sm:$0xf] %vm1577_vm0, %v1783_v7  ;;  %v1784_v15 = vpack.c.bf16 %v1506_v8, %v1506_v8  ;;  %v1468_v16 = vmax.f32 %v1436_v9, %v1452_v10  ;;  %v1437_v17 = vmax.f32 %v1175_v11, %v1177_v13  ;;  %v1453_v18 = vmax.f32 %v1401_v12, %v1403_v14 }
 0x183   :  { %1587 = vst.msk [vmem:[%s2683_s3 + $0x24] sm:$0xf] %vm1577_vm0, %v1784_v15  ;;  %v1491_v19 = vadd.f32 %v2598_v40, %v1468_v16  ;;  %v1469_v20 = vmax.f32 %v1437_v17, %v1453_v18 }
 0x185   :  { %v1507_v21 = vmax.f32 %v1491_v19, 0.0  ;;  %v1492_v22 = vadd.f32 %v2598_v40, %v1469_v20  ;;  %v1181_v23 = vpop.f32.mrb[24].mxu0  ;;  %v1407_v24 = vpop.f32.mrb[24].mxu1 }
 0x186   :  { %v1183_v25 = vpop.f32.mrb[25].mxu0  ;;  %v1409_v26 = vpop.f32.mrb[25].mxu1 }
 0x187   :  { %v1785_v27 = vpack.c.bf16 %v1507_v21, %v1507_v21  ;;  %v1508_v28 = vmax.f32 %v1492_v22, 0.0  ;;  %v1438_v29 = vmax.f32 %v1181_v23, %v1183_v25  ;;  %v1454_v30 = vmax.f32 %v1407_v24, %v1409_v26  ;;  %v1185_v31 = vpop.f32.mrb[26].mxu0  ;;  %v1411_v32 = vpop.f32.mrb[26].mxu1 }
 0x188   :  { %v1187_v33 = vpop.f32.mrb[27].mxu0  ;;  %v1413_v34 = vpop.f32.mrb[27].mxu1 }
 0x189   :  { %1588 = vst.msk [vmem:[%s2683_s3 + $0x28] sm:$0xf] %vm1577_vm0, %v1785_v27  ;;  %v1786_v35 = vpack.c.bf16 %v1508_v28, %v1508_v28  ;;  %v1470_v36 = vmax.f32 %v1438_v29, %v1454_v30  ;;  %v1439_v37 = vmax.f32 %v1185_v31, %v1187_v33  ;;  %v1455_v38 = vmax.f32 %v1411_v32, %v1413_v34 }
 0x18b   :  { %1589 = vst.msk [vmem:[%s2683_s3 + $0x2c] sm:$0xf] %vm1577_vm0, %v1786_v35  ;;  %v1493_v39 = vadd.f32 %v2598_v40, %v1470_v36  ;;  %v1471_v41 = vmax.f32 %v1439_v37, %v1455_v38 }
 0x18d   :  { %v1509_v42 = vmax.f32 %v1493_v39, 0.0  ;;  %v1494_v43 = vadd.f32 %v2598_v40, %v1471_v41  ;;  %v1191_v44 = vpop.f32.mrb[28].mxu0  ;;  %v1417_v45 = vpop.f32.mrb[28].mxu1 }
 0x18e   :  { %v1193_v46 = vpop.f32.mrb[29].mxu0  ;;  %v1419_v47 = vpop.f32.mrb[29].mxu1 }
 0x18f   :  { %v1787_v48 = vpack.c.bf16 %v1509_v42, %v1509_v42  ;;  %v1510_v49 = vmax.f32 %v1494_v43, 0.0  ;;  %v1440_v50 = vmax.f32 %v1191_v44, %v1193_v46  ;;  %v1456_v51 = vmax.f32 %v1417_v45, %v1419_v47  ;;  %v1195_v52 = vpop.f32.mrb[30].mxu0  ;;  %v1421_v53 = vpop.f32.mrb[30].mxu1 }
 0x190   :  { %v1197_v54 = vpop.f32.mrb[31].mxu0  ;;  %v1423_v55 = vpop.f32.mrb[31].mxu1 }
 0x191   :  { %1590 = vst.msk [vmem:[%s2683_s3 + $0x30] sm:$0xf] %vm1577_vm0, %v1787_v48  ;;  %v1788_v56 = vpack.c.bf16 %v1510_v49, %v1510_v49  ;;  %v1472_v57 = vmax.f32 %v1440_v50, %v1456_v51  ;;  %v1441_v58 = vmax.f32 %v1195_v52, %v1197_v54  ;;  %v1457_v59 = vmax.f32 %v1421_v53, %v1423_v55 }
 0x193   :  { %1591 = vst.msk [vmem:[%s2683_s3 + $0x34] sm:$0xf] %vm1577_vm0, %v1788_v56  ;;  %v1495_v60 = vadd.f32 %v2598_v40, %v1472_v57  ;;  %v1473_v61 = vmax.f32 %v1441_v58, %v1457_v59 }
 0x195   :  { %v1511_v62 = vmax.f32 %v1495_v60, 0.0  ;;  %v1496_v63 = vadd.f32 %v2598_v40, %v1473_v61 }
 0x197   :  { %v1789_v0 = vpack.c.bf16 %v1511_v62, %v1511_v62  ;;  %v1512_v1 = vmax.f32 %v1496_v63, 0.0 }
 0x199   :  { %1592 = vst.msk [vmem:[%s2683_s3 + $0x38] sm:$0xf] %vm1577_vm0, %v1789_v0  ;;  %v1790_v2 = vpack.c.bf16 %v1512_v1, %v1512_v1 }
 0x19b   :  { %1593 = vst.msk [vmem:[%s2683_s3 + $0x3c] sm:$0xf] %vm1577_vm0, %v1790_v2 }

// kernel: forward.5
= control target key start
LH: loop header
LB: loop body
LE: loop exit
PB: predicated region body
PF: predicated region fallthrough
CT: control target
= control target key end

     0   :  { %s5700_s0 = inlined_call_operand.vmem [shape: bf16[2,4096], index: 0, kind: input, shape index: {}]   ;;  %s5701_s1 = inlined_call_operand.vmem [shape: bf16[2,10], index: 1, kind: input, shape index: {}]   ;;  %s5702_s2 = inlined_call_operand.vmem [shape: bf16[4096,128], index: 2, kind: input, shape index: {}]   ;;  %s5703_s3 = inlined_call_operand.vmem [shape: f32[1,128], index: 3, kind: input, shape index: {}]   ;;  %s5704_s4 = inlined_call_operand.vmem [shape: bf16[10,128], index: 4, kind: input, shape index: {}]   ;;  %s5705_s5 = inlined_call_operand.vmem [shape: f32[1,128], index: 5, kind: input, shape index: {}]   ;;  %s5706_s6 = inlined_call_operand.vmem [shape: bf16[128,128], index: 6, kind: input, shape index: {}]   ;;  %s5707_s7 = inlined_call_operand.vmem [shape: bf16[128,128], index: 7, kind: input, shape index: {}]   ;;  %s5708_s8 = inlined_call_operand.vmem [shape: f32[1,128], index: 8, kind: input, shape index: {}]   ;;  %s5709_s9 = inlined_call_operand.vmem [shape: f32[1,128], index: 9, kind: input, shape index: {}]   ;;  %s5710_s10 = inlined_call_operand.vmem [shape: f32[1,128], index: 10, kind: input, shape index: {}]   ;;  %s5711_s11 = inlined_call_operand.vmem [shape: bf16[128,64], index: 11, kind: input, shape index: {}]   ;;  %s5712_s12 = inlined_call_operand.vmem [shape: f32[1,64], index: 12, kind: input, shape index: {}]   ;;  %s5713_s13 = inlined_call_operand.vmem [shape: f32[1,64], index: 13, kind: input, shape index: {}]   ;;  %s5714_s14 = inlined_call_operand.vmem [shape: f32[1,64], index: 14, kind: input, shape index: {}]   ;;  %s5715_s15 = inlined_call_operand.vmem [shape: bf16[64,10], index: 15, kind: input, shape index: {}]   ;;  %s5716_s16 = inlined_call_operand.vmem [shape: f32[1,10], index: 16, kind: input, shape index: {}]   ;;  %s5717_s17 = inlined_call_operand.hbm [shape: f32[2,10], index: 17, kind: output, shape index: {}]  }
   0x1   :  { %5719 = sst [smem:[#allocation5_spill]] %s5700_s0 }
   0x2   :  { %5720 = sst [smem:[#allocation6_spill]] %s5701_s1 }
   0x3   :  { %v4291_v0 = vld [vmem:[%s5702_s2 + $0x40] sm:$0xff]   ;;  %v4295_v4 = vld [vmem:[%s5702_s2 + $0x48] sm:$0xff]   ;;  %v4299_v8 = vld [vmem:[%s5702_s2 + $0x50] sm:$0xff]   ;;  %v589_v27 = vlaneseq  ;;  %s5721_s28 = sld [smem:[#allocation5_spill]]  ;;  %v4608_v35 = vmov 1966171168  }
   0x4   :  { %v4292_v1 = vld [vmem:[%s5702_s2] sm:$0xff]   ;;  %3823 = vmatprep.subr.bf16.mxu0 %v4291_v0  ;;  %v4296_v5 = vld [vmem:[%s5702_s2 + $0x8] sm:$0xff]   ;;  %v4300_v9 = vld [vmem:[%s5702_s2 + $0x10] sm:$0xff]   ;;  %v587_v36 = vunpack.c.l.s4 %v4608_v35  ;;  %vm3008_vm0 = vcmask 1044480   ;;  %vm3004_vm1 = vcmask 80896   ;;  %vm4610_vm2 = vmmov 0  }
   0x5   :  { %v4293_v2 = vld [vmem:[%s5702_s2 + $0xc0] sm:$0xff]   ;;  %3824 = vmatpush3.bf16.msra.mxu0 %v4292_v1  ;;  %v4297_v6 = vld [vmem:[%s5702_s2 + $0xc8] sm:$0xff]   ;;  %v4301_v10 = vld [vmem:[%s5702_s2 + $0xd0] sm:$0xff]   ;;  %v590_v32 = vshrl.u32 %v589_v27, 7 }
   0x6   :  { %v4294_v3 = vld [vmem:[%s5702_s2 + $0x80] sm:$0xff]   ;;  %3845 = vmatprep.subr.bf16.mxu1 %v4293_v2  ;;  %3825 = vmatprep.subr.bf16.mxu0 %v4295_v4  ;;  %v4298_v7 = vld [vmem:[%s5702_s2 + $0x88] sm:$0xff]   ;;  %v4302_v11 = vld [vmem:[%s5702_s2 + $0x90] sm:$0xff]   ;;  %v588_v39 = vunpack.c.0.s8 %v587_v36 }
   0x7   :  { %3846 = vmatpush3.bf16.msra.mxu1 %v4294_v3  ;;  %v4303_v12 = vld [vmem:[%s5702_s2 + $0x58] sm:$0xff]   ;;  %v4307_v16 = vld [vmem:[%s5702_s2 + $0x60] sm:$0xff]   ;;  %v4311_v20 = vld [vmem:[%s5702_s2 + $0x68] sm:$0xff]  }
   0x8   :  { %3847 = vmatprep.subr.bf16.mxu1 %v4297_v6  ;;  %v4304_v13 = vld [vmem:[%s5702_s2 + $0x18] sm:$0xff]   ;;  %v4308_v17 = vld [vmem:[%s5702_s2 + $0x20] sm:$0xff]   ;;  %v4312_v21 = vld [vmem:[%s5702_s2 + $0x28] sm:$0xff]   ;;  %v4807_v41 = vsub.s32 %v588_v39, %v590_v32 }
   0x9   :  { %3826 = vmatpush3.bf16.msra.mxu0 %v4296_v5  ;;  %v4305_v14 = vld [vmem:[%s5702_s2 + $0xd8] sm:$0xff]   ;;  %v4309_v18 = vld [vmem:[%s5702_s2 + $0xe0] sm:$0xff]   ;;  %v4313_v22 = vld [vmem:[%s5702_s2 + $0xe8] sm:$0xff]  }
   0xa   :  { %3827 = vmatprep.subr.bf16.mxu0 %v4299_v8  ;;  %v4306_v15 = vld [vmem:[%s5702_s2 + $0x98] sm:$0xff]   ;;  %v4310_v19 = vld [vmem:[%s5702_s2 + $0xa0] sm:$0xff]   ;;  %v4314_v23 = vld [vmem:[%s5702_s2 + $0xa8] sm:$0xff]  }
   0xb   :  { %3848 = vmatpush3.bf16.msra.mxu1 %v4298_v7  ;;  %v4315_v24 = vld [vmem:[%s5702_s2 + $0x70] sm:$0xff]   ;;  %v4319_v29 = vld [vmem:[%s5702_s2 + $0x78] sm:$0xff]   ;;  %v58_v33 = vld [vmem:[%s5721_s28] sm:$0xff] }
   0xc   :  { %3849 = vmatprep.subr.bf16.mxu1 %v4301_v10  ;;  %v4316_v25 = vld [vmem:[%s5702_s2 + $0x30] sm:$0xff]   ;;  %v4320_v30 = vld [vmem:[%s5702_s2 + $0x38] sm:$0xff]   ;;  %v4324_v37 = vld [vmem:[%s5702_s2 + $0x140] sm:$0xff]   ;;  %v585_v38 = vcombine.high %v58_v33, %v58_v33  ;;  %v592_v42 = vrot.slane %v58_v33, %v4807_v41 }
   0xd   :  { %3828 = vmatpush3.bf16.msra.mxu0 %v4300_v9  ;;  %v4317_v26 = vld [vmem:[%s5702_s2 + $0xf0] sm:$0xff]   ;;  %v4321_v31 = vld [vmem:[%s5702_s2 + $0xf8] sm:$0xff]   ;;  %v4326_v40 = vld [vmem:[%s5702_s2 + $0x1c0] sm:$0xff]  }
   0xe   :  { %3829 = vmatprep.subr.bf16.mxu0 %v4303_v12  ;;  %v4318_v28 = vld [vmem:[%s5702_s2 + $0xb0] sm:$0xff]   ;;  %v4323_v34 = vld [vmem:[%s5702_s2 + $0xb8] sm:$0xff]   ;;  %v4811_v43 = vrot.slane %v585_v38, %v4807_v41  ;;  %v600_v44 = vcombine.high %v592_v42, %v592_v42  ;;  %v608_v45 = vrot.slane %v592_v42, %v4807_v41  ;;  %v4325_v47 = vld [vmem:[%s5702_s2 + $0x100] sm:$0xff]  }
   0xf   :  { %3850 = vmatpush3.bf16.msra.mxu1 %v4302_v11  ;;  %v4327_v49 = vld [vmem:[%s5702_s2 + $0x180] sm:$0xff]   ;;  %v4328_v52 = vld [vmem:[%s5702_s2 + $0x148] sm:$0xff]   ;;  %v4332_v58 = vld [vmem:[%s5702_s2 + $0x150] sm:$0xff]  }
  0x10   :  { %3851 = vmatprep.subr.bf16.mxu1 %v4305_v14  ;;  %v601_v46 = vcombine.high %v4811_v43, %v4811_v43  ;;  %v622_v48 = vrot.slane %v600_v44, %v4807_v41  ;;  %v630_v51 = vcombine.high %v608_v45, %v608_v45  ;;  %v4329_v54 = vld [vmem:[%s5702_s2 + $0x108] sm:$0xff]   ;;  %v4333_v59 = vld [vmem:[%s5702_s2 + $0x110] sm:$0xff]   ;;  %v4336_v62 = vld [vmem:[%s5702_s2 + $0x158] sm:$0xff]  }
  0x11   :  { %3830 = vmatpush3.bf16.msra.mxu0 %v4304_v13  ;;  %v4330_v55 = vld [vmem:[%s5702_s2 + $0x1c8] sm:$0xff]   ;;  %v4334_v60 = vld [vmem:[%s5702_s2 + $0x1d0] sm:$0xff]   ;;  %v4337_v63 = vld [vmem:[%s5702_s2 + $0x118] sm:$0xff]  }
  0x12   :  { %3831 = vmatprep.subr.bf16.mxu0 %v4307_v16  ;;  %v629_v50 = vrot.slane %v601_v46, %v4807_v41  ;;  %2381 = vmatprep.mubr.bf16.mxu0 %v622_v48  ;;  %v632_v53 = vcombine.high %v622_v48, %v622_v48  ;;  %v4331_v57 = vld [vmem:[%s5702_s2 + $0x188] sm:$0xff]   ;;  %v4335_v61 = vld [vmem:[%s5702_s2 + $0x190] sm:$0xff]   ;;  %v4338_v0 = vld [vmem:[%s5702_s2 + $0x1d8] sm:$0xff]  }
  0x13   :  { %3852 = vmatpush3.bf16.msra.mxu1 %v4306_v15  ;;  %v4339_v1 = vld [vmem:[%s5702_s2 + $0x198] sm:$0xff]   ;;  %v4340_v2 = vld [vmem:[%s5702_s2 + $0x160] sm:$0xff]   ;;  %v4344_v6 = vld [vmem:[%s5702_s2 + $0x168] sm:$0xff]  }
  0x14   :  { %3853 = vmatprep.subr.bf16.mxu1 %v4309_v18  ;;  %v633_v56 = vcombine.high %v629_v50, %v629_v50  ;;  %2421 = vmatprep.mubr.bf16.mxu1 %v632_v53  ;;  %v4341_v3 = vld [vmem:[%s5702_s2 + $0x120] sm:$0xff]   ;;  %v4345_v7 = vld [vmem:[%s5702_s2 + $0x128] sm:$0xff]   ;;  %v4348_v10 = vld [vmem:[%s5702_s2 + $0x170] sm:$0xff]   ;;  %v615_v18 = vrot.slane %v4811_v43, %v4807_v41 }
  0x15   :  { %3832 = vmatpush3.bf16.msra.mxu0 %v4308_v17  ;;  %v4342_v4 = vld [vmem:[%s5702_s2 + $0x1e0] sm:$0xff]   ;;  %v4346_v8 = vld [vmem:[%s5702_s2 + $0x1e8] sm:$0xff]   ;;  %v4349_v11 = vld [vmem:[%s5702_s2 + $0x130] sm:$0xff]  }
  0x16   :  { %3833 = vmatprep.subr.bf16.mxu0 %v4311_v20  ;;  %v4343_v5 = vld [vmem:[%s5702_s2 + $0x1a0] sm:$0xff]   ;;  %v4347_v9 = vld [vmem:[%s5702_s2 + $0x1a8] sm:$0xff]   ;;  %v4350_v12 = vld [vmem:[%s5702_s2 + $0x1f0] sm:$0xff]  }
  0x17   :  { %3854 = vmatpush3.bf16.msra.mxu1 %v4310_v19  ;;  %v4351_v13 = vld [vmem:[%s5702_s2 + $0x1b0] sm:$0xff]   ;;  %v4352_v14 = vld [vmem:[%s5702_s2 + $0x178] sm:$0xff]   ;;  %v4356_v19 = vld [vmem:[%s5702_s2 + $0x240] sm:$0xff]  }
  0x18   :  { %3855 = vmatprep.subr.bf16.mxu1 %v4313_v22  ;;  %v4353_v15 = vld [vmem:[%s5702_s2 + $0x138] sm:$0xff]   ;;  %v4357_v20 = vld [vmem:[%s5702_s2 + $0x200] sm:$0xff]   ;;  %v4363_v27 = vld [vmem:[%s5702_s2 + $0x288] sm:$0xff]  }
  0x19   :  { %3834 = vmatpush3.bf16.msra.mxu0 %v4312_v21  ;;  %v4354_v16 = vld [vmem:[%s5702_s2 + $0x1f8] sm:$0xff]   ;;  %v4358_v21 = vld [vmem:[%s5702_s2 + $0x2c0] sm:$0xff]   ;;  %v4377_v42 = vld [vmem:[%s5702_s2 + $0x228] sm:$0xff]  }
  0x1a   :  { %3835 = vmatprep.subr.bf16.mxu0 %v4315_v24  ;;  %v4355_v17 = vld [vmem:[%s5702_s2 + $0x1b8] sm:$0xff]   ;;  %v4359_v22 = vld [vmem:[%s5702_s2 + $0x280] sm:$0xff]   ;;  %v4360_v24 = vld [vmem:[%s5702_s2 + $0x248] sm:$0xff]  }
  0x1b   :  { %3856 = vmatpush3.bf16.msra.mxu1 %v4314_v23  ;;  %v631_v23 = vcombine.high %v615_v18, %v615_v18  ;;  %v4368_v32 = vld [vmem:[%s5702_s2 + $0x258] sm:$0xff]   ;;  %v4372_v36 = vld [vmem:[%s5702_s2 + $0x260] sm:$0xff]   ;;  %v4378_v43 = vld [vmem:[%s5702_s2 + $0x2e8] sm:$0xff]  }
  0x1c   :  { %3857 = vmatprep.subr.bf16.mxu1 %v4317_v26  ;;  %v4362_v26 = vld [vmem:[%s5702_s2 + $0x2c8] sm:$0xff]   ;;  %v4369_v33 = vld [vmem:[%s5702_s2 + $0x218] sm:$0xff]   ;;  %v4374_v38 = vld [vmem:[%s5702_s2 + $0x2e0] sm:$0xff]  }
  0x1d   :  { %3836 = vmatpush3.bf16.msra.mxu0 %v4316_v25  ;;  %v4361_v25 = vld [vmem:[%s5702_s2 + $0x208] sm:$0xff]   ;;  %v4371_v35 = vld [vmem:[%s5702_s2 + $0x298] sm:$0xff]   ;;  %v4375_v39 = vld [vmem:[%s5702_s2 + $0x2a0] sm:$0xff]  }
  0x1e   :  { %3837 = vmatprep.subr.bf16.mxu0 %v4319_v29  ;;  %v4365_v29 = vld [vmem:[%s5702_s2 + $0x210] sm:$0xff]   ;;  %v4379_v44 = vld [vmem:[%s5702_s2 + $0x2a8] sm:$0xff]  }
  0x1f   :  { %3858 = vmatpush3.bf16.msra.mxu1 %v4318_v28  ;;  %v4364_v28 = vld [vmem:[%s5702_s2 + $0x250] sm:$0xff]   ;;  %v59_v46 = vld [vmem:[%s5721_s28 + $0x8] sm:$0xff] }
  0x20   :  { %3859 = vmatprep.subr.bf16.mxu1 %v4321_v31  ;;  %v4367_v31 = vld [vmem:[%s5702_s2 + $0x290] sm:$0xff]   ;;  %v641_v48 = vrot.slane %v59_v46, %v4807_v41 }
  0x21   :  { %3838 = vmatpush3.bf16.msra.mxu0 %v4320_v30  ;;  %v4366_v30 = vld [vmem:[%s5702_s2 + $0x2d0] sm:$0xff]  }
  0x22   :  { %3867 = vmatprep.subr.bf16.mxu0 %v4324_v37  ;;  %v4373_v37 = vld [vmem:[%s5702_s2 + $0x220] sm:$0xff]  }
  0x23   :  { %3860 = vmatpush3.bf16.msra.mxu1 %v4323_v34  ;;  %v4370_v34 = vld [vmem:[%s5702_s2 + $0x2d8] sm:$0xff]  }
  0x24   :  { %3889 = vmatprep.subr.bf16.mxu1 %v4326_v40  ;;  %2382 = vmatmul.mubr.bf16.vlgmr.msra.gmra.mrb[0].mxu0 %v608_v45  ;;  %v4376_v40 = vld [vmem:[%s5702_s2 + $0x268] sm:$0xff]   ;;  %v4380_v45 = vld [vmem:[%s5702_s2 + $0x270] sm:$0xff]  }
  0x25   :  { %3868 = vmatpush3.bf16.msra.mxu0 %v4325_v47  ;;  %2461 = vmatprep.mubr.bf16.mxu0 %v629_v50  ;;  %v4381_v47 = vld [vmem:[%s5702_s2 + $0x230] sm:$0xff]  }
  0x26   :  { %2422 = vmatmul.mubr.bf16.vlgmr.msra.gmra.mrb[0].mxu1 %v630_v51  ;;  %3869 = vmatprep.subr.bf16.mxu0 %v4328_v52  ;;  %v4382_v50 = vld [vmem:[%s5702_s2 + $0x2f0] sm:$0xff]   ;;  %v649_v52 = vcombine.high %v641_v48, %v641_v48 }
  0x27   :  { %3890 = vmatpush3.bf16.msra.mxu1 %v4327_v49  ;;  %2501 = vmatprep.mubr.bf16.mxu1 %v633_v56  ;;  %v634_v49 = vcombine.high %v59_v46, %v59_v46  ;;  %v4383_v51 = vld [vmem:[%s5702_s2 + $0x2b0] sm:$0xff]  }
  0x28   :  { %3891 = vmatprep.subr.bf16.mxu1 %v4330_v55  ;;  %v4385_v55 = vld [vmem:[%s5702_s2 + $0x238] sm:$0xff]   ;;  %v671_v56 = vrot.slane %v649_v52, %v4807_v41  ;;  %v4431_v46 = vld [vmem:[%s5702_s2 + $0x4d0] sm:$0xff]   ;;  %v4437_v52 = vld [vmem:[%s5702_s2 + $0x460] sm:$0xff]  }
  0x29   :  { %3870 = vmatpush3.bf16.msra.mxu0 %v4329_v54  ;;  %v4999_v53 = vrot.slane %v634_v49, %v4807_v41  ;;  %v4384_v54 = vld [vmem:[%s5702_s2 + $0x278] sm:$0xff]  }
  0x2a   :  { %3871 = vmatprep.subr.bf16.mxu0 %v4332_v58  ;;  %v4386_v58 = vld [vmem:[%s5702_s2 + $0x2f8] sm:$0xff]  }
  0x2b   :  { %3892 = vmatpush3.bf16.msra.mxu1 %v4331_v57  ;;  %v650_v57 = vcombine.high %v4999_v53, %v4999_v53  ;;  %v4434_v49 = vld [vmem:[%s5702_s2 + $0x418] sm:$0xff]  }
  0x2c   :  { %3893 = vmatprep.subr.bf16.mxu1 %v4334_v60  ;;  %v681_v60 = vcombine.high %v671_v56, %v671_v56 }
  0x2d   :  { %3872 = vmatpush3.bf16.msra.mxu0 %v4333_v59  ;;  %v4387_v59 = vld [vmem:[%s5702_s2 + $0x2b8] sm:$0xff]  }
  0x2e   :  { %3873 = vmatprep.subr.bf16.mxu0 %v4336_v62  ;;  %v4388_v62 = vld [vmem:[%s5702_s2 + $0x340] sm:$0xff]  }
  0x2f   :  { %3894 = vmatpush3.bf16.msra.mxu1 %v4335_v61  ;;  %v657_v61 = vrot.slane %v641_v48, %v4807_v41  ;;  %v4433_v48 = vld [vmem:[%s5702_s2 + $0x458] sm:$0xff]  }
  0x30   :  { %3895 = vmatprep.subr.bf16.mxu1 %v4338_v0  ;;  %v678_v0 = vrot.slane %v650_v57, %v4807_v41  ;;  %v4442_v57 = vld [vmem:[%s5702_s2 + $0x428] sm:$0xff]  }
  0x31   :  { %3874 = vmatpush3.bf16.msra.mxu0 %v4337_v63  ;;  %v4389_v63 = vld [vmem:[%s5702_s2 + $0x300] sm:$0xff]  }
  0x32   :  { %3875 = vmatprep.subr.bf16.mxu0 %v4340_v2  ;;  %v4391_v2 = vld [vmem:[%s5702_s2 + $0x380] sm:$0xff]  }
  0x33   :  { %3896 = vmatpush3.bf16.msra.mxu1 %v4339_v1  ;;  %v4390_v1 = vld [vmem:[%s5702_s2 + $0x3c0] sm:$0xff]  }
  0x34   :  { %3897 = vmatprep.subr.bf16.mxu1 %v4342_v4  ;;  %v4392_v4 = vld [vmem:[%s5702_s2 + $0x348] sm:$0xff]  }
  0x35   :  { %3876 = vmatpush3.bf16.msra.mxu0 %v4341_v3  ;;  %v679_v3 = vcombine.high %v657_v61, %v657_v61 }
  0x36   :  { %3877 = vmatprep.subr.bf16.mxu0 %v4344_v6  ;;  %v682_v6 = vcombine.high %v678_v0, %v678_v0 }
  0x37   :  { %3898 = vmatpush3.bf16.msra.mxu1 %v4343_v5  ;;  %v4393_v5 = vld [vmem:[%s5702_s2 + $0x308] sm:$0xff]  }
  0x38   :  { %3899 = vmatprep.subr.bf16.mxu1 %v4346_v8  ;;  %v4395_v8 = vld [vmem:[%s5702_s2 + $0x388] sm:$0xff]  }
  0x39   :  { %3878 = vmatpush3.bf16.msra.mxu0 %v4345_v7  ;;  %v4394_v7 = vld [vmem:[%s5702_s2 + $0x3c8] sm:$0xff]  }
  0x3a   :  { %3879 = vmatprep.subr.bf16.mxu0 %v4348_v10  ;;  %v4397_v10 = vld [vmem:[%s5702_s2 + $0x310] sm:$0xff]  }
  0x3b   :  { %3900 = vmatpush3.bf16.msra.mxu1 %v4347_v9  ;;  %v4396_v9 = vld [vmem:[%s5702_s2 + $0x350] sm:$0xff]  }
  0x3c   :  { %3901 = vmatprep.subr.bf16.mxu1 %v4350_v12  ;;  %v4399_v12 = vld [vmem:[%s5702_s2 + $0x390] sm:$0xff]  }
  0x3d   :  { %3880 = vmatpush3.bf16.msra.mxu0 %v4349_v11  ;;  %v4398_v11 = vld [vmem:[%s5702_s2 + $0x3d0] sm:$0xff]  }
  0x3e   :  { %3881 = vmatprep.subr.bf16.mxu0 %v4352_v14  ;;  %v4401_v14 = vld [vmem:[%s5702_s2 + $0x318] sm:$0xff]  }
  0x3f   :  { %3902 = vmatpush3.bf16.msra.mxu1 %v4351_v13  ;;  %v4400_v13 = vld [vmem:[%s5702_s2 + $0x358] sm:$0xff]  }
  0x40   :  { %3903 = vmatprep.subr.bf16.mxu1 %v4354_v16  ;;  %v4403_v16 = vld [vmem:[%s5702_s2 + $0x398] sm:$0xff]  }
  0x41   :  { %3882 = vmatpush3.bf16.msra.mxu0 %v4353_v15  ;;  %v4402_v15 = vld [vmem:[%s5702_s2 + $0x3d8] sm:$0xff]  }
  0x42   :  { %3911 = vmatprep.subr.bf16.mxu0 %v4356_v19  ;;  %v4406_v19 = vld [vmem:[%s5702_s2 + $0x3e0] sm:$0xff]  }
  0x43   :  { %3904 = vmatpush3.bf16.msra.mxu1 %v4355_v17  ;;  %v4404_v17 = vld [vmem:[%s5702_s2 + $0x360] sm:$0xff]  }
  0x44   :  { %2462 = vmatmul.mubr.bf16.vlgmr.msra.gmra.mrb[4].mxu0 %v615_v18  ;;  %3933 = vmatprep.subr.bf16.mxu1 %v4358_v21  ;;  %v4405_v18 = vld [vmem:[%s5702_s2 + $0x320] sm:$0xff]   ;;  %v4408_v21 = vld [vmem:[%s5702_s2 + $0x368] sm:$0xff]  }
  0x45   :  { %3912 = vmatpush3.bf16.msra.mxu0 %v4357_v20  ;;  %2541 = vmatprep.mubr.bf16.mxu0 %v671_v56  ;;  %v4407_v20 = vld [vmem:[%s5702_s2 + $0x3a0] sm:$0xff]   ;;  %v4441_v56 = vld [vmem:[%s5702_s2 + $0x468] sm:$0xff]  }
  0x46   :  { %2502 = vmatmul.mubr.bf16.vlgmr.msra.gmra.mrb[4].mxu1 %v631_v23  ;;  %3913 = vmatprep.subr.bf16.mxu0 %v4360_v24  ;;  %v4410_v23 = vld [vmem:[%s5702_s2 + $0x3e8] sm:$0xff]  }
  0x47   :  { %3934 = vmatpush3.bf16.msra.mxu1 %v4359_v22  ;;  %2581 = vmatprep.mubr.bf16.mxu1 %v681_v60  ;;  %v4409_v22 = vld [vmem:[%s5702_s2 + $0x328] sm:$0xff]   ;;  %v4445_v60 = vld [vmem:[%s5702_s2 + $0x470] sm:$0xff]  }
  0x48   :  { %3935 = vmatprep.subr.bf16.mxu1 %v4362_v26  ;;  %v4411_v24 = vld [vmem:[%s5702_s2 + $0x3a8] sm:$0xff]   ;;  %v4413_v26 = vld [vmem:[%s5702_s2 + $0x330] sm:$0xff]  }
  0x49   :  { %3914 = vmatpush3.bf16.msra.mxu0 %v4361_v25  ;;  %v4412_v25 = vld [vmem:[%s5702_s2 + $0x370] sm:$0xff]  }
  0x4a   :  { %3915 = vmatprep.subr.bf16.mxu0 %v4364_v28  ;;  %v4415_v28 = vld [vmem:[%s5702_s2 + $0x3b0] sm:$0xff]  }
  0x4b   :  { %3936 = vmatpush3.bf16.msra.mxu1 %v4363_v27  ;;  %v4414_v27 = vld [vmem:[%s5702_s2 + $0x3f0] sm:$0xff]  }
  0x4c   :  { %3937 = vmatprep.subr.bf16.mxu1 %v4366_v30  ;;  %v4417_v30 = vld [vmem:[%s5702_s2 + $0x338] sm:$0xff]  }
  0x4d   :  { %3916 = vmatpush3.bf16.msra.mxu0 %v4365_v29  ;;  %v4416_v29 = vld [vmem:[%s5702_s2 + $0x378] sm:$0xff]  }
  0x4e   :  { %3917 = vmatprep.subr.bf16.mxu0 %v4368_v32  ;;  %v4420_v32 = vld [vmem:[%s5702_s2 + $0x3b8] sm:$0xff]  }
  0x4f   :  { %3938 = vmatpush3.bf16.msra.mxu1 %v4367_v31  ;;  %v4418_v31 = vld [vmem:[%s5702_s2 + $0x3f8] sm:$0xff]  }
  0x50   :  { %3939 = vmatprep.subr.bf16.mxu1 %v4370_v34  ;;  %v4421_v34 = vld [vmem:[%s5702_s2 + $0x440] sm:$0xff]  }
  0x51   :  { %3918 = vmatpush3.bf16.msra.mxu0 %v4369_v33  ;;  %v664_v33 = vrot.slane %v4999_v53, %v4807_v41  ;;  %v4438_v53 = vld [vmem:[%s5702_s2 + $0x420] sm:$0xff]  }
  0x52   :  { %3919 = vmatprep.subr.bf16.mxu0 %v4372_v36  ;;  %v4423_v36 = vld [vmem:[%s5702_s2 + $0x4c0] sm:$0xff]  }
  0x53   :  { %3940 = vmatpush3.bf16.msra.mxu1 %v4371_v35  ;;  %v4422_v35 = vld [vmem:[%s5702_s2 + $0x400] sm:$0xff]  }
  0x54   :  { %3941 = vmatprep.subr.bf16.mxu1 %v4374_v38  ;;  %v680_v38 = vcombine.high %v664_v33, %v664_v33 }
  0x55   :  { %3920 = vmatpush3.bf16.msra.mxu0 %v4373_v37  ;;  %v4424_v37 = vld [vmem:[%s5702_s2 + $0x480] sm:$0xff]  }
  0x56   :  { %3921 = vmatprep.subr.bf16.mxu0 %v4376_v40  ;;  %v4426_v40 = vld [vmem:[%s5702_s2 + $0x408] sm:$0xff]  }
  0x57   :  { %3942 = vmatpush3.bf16.msra.mxu1 %v4375_v39  ;;  %v4425_v39 = vld [vmem:[%s5702_s2 + $0x448] sm:$0xff]  }
  0x58   :  { %3943 = vmatprep.subr.bf16.mxu1 %v4378_v43  ;;  %v4428_v43 = vld [vmem:[%s5702_s2 + $0x488] sm:$0xff]  }
  0x59   :  { %3922 = vmatpush3.bf16.msra.mxu0 %v4377_v42  ;;  %v4427_v42 = vld [vmem:[%s5702_s2 + $0x4c8] sm:$0xff]  }
  0x5a   :  { %3923 = vmatprep.subr.bf16.mxu0 %v4380_v45  ;;  %v4430_v45 = vld [vmem:[%s5702_s2 + $0x410] sm:$0xff]  }
  0x5b   :  { %3944 = vmatpush3.bf16.msra.mxu1 %v4379_v44  ;;  %v4429_v44 = vld [vmem:[%s5702_s2 + $0x450] sm:$0xff]  }
  0x5c   :  { %3945 = vmatprep.subr.bf16.mxu1 %v4382_v50  ;;  %v4435_v50 = vld [vmem:[%s5702_s2 + $0x4d8] sm:$0xff]  }
  0x5d   :  { %3924 = vmatpush3.bf16.msra.mxu0 %v4381_v47  ;;  %v4432_v47 = vld [vmem:[%s5702_s2 + $0x490] sm:$0xff]  }
  0x5e   :  { %3925 = vmatprep.subr.bf16.mxu0 %v4384_v54  ;;  %v4439_v54 = vld [vmem:[%s5702_s2 + $0x4e0] sm:$0xff]  }
  0x5f   :  { %3946 = vmatpush3.bf16.msra.mxu1 %v4383_v51  ;;  %v4436_v51 = vld [vmem:[%s5702_s2 + $0x498] sm:$0xff]  }
  0x60   :  { %3947 = vmatprep.subr.bf16.mxu1 %v4386_v58  ;;  %v4443_v58 = vld [vmem:[%s5702_s2 + $0x4e8] sm:$0xff]  }
  0x61   :  { %3926 = vmatpush3.bf16.msra.mxu0 %v4385_v55  ;;  %v4440_v55 = vld [vmem:[%s5702_s2 + $0x4a0] sm:$0xff]  }
  0x62   :  { %3955 = vmatprep.subr.bf16.mxu0 %v4388_v62  ;;  %v4446_v62 = vld [vmem:[%s5702_s2 + $0x430] sm:$0xff]  }
  0x63   :  { %3948 = vmatpush3.bf16.msra.mxu1 %v4387_v59  ;;  %v4444_v59 = vld [vmem:[%s5702_s2 + $0x4a8] sm:$0xff]  }
  0x64   :  { %2542 = vmatmul.mubr.bf16.vlgmr.msra.gmra.mrb[8].mxu0 %v657_v61  ;;  %3977 = vmatprep.subr.bf16.mxu1 %v4390_v1  ;;  %v60_v61 = vld [vmem:[%s5721_s28 + $0x10] sm:$0xff] }
  0x65   :  { %3956 = vmatpush3.bf16.msra.mxu0 %v4389_v63  ;;  %2621 = vmatprep.mubr.bf16.mxu0 %v678_v0  ;;  %v690_v63 = vrot.slane %v60_v61, %v4807_v41  ;;  %v683_v0 = vcombine.high %v60_v61, %v60_v61  ;;  %v4447_v1 = vld [vmem:[%s5702_s2 + $0x4f0] sm:$0xff]  }
  0x66   :  { %2582 = vmatmul.mubr.bf16.vlgmr.msra.gmra.mrb[8].mxu1 %v679_v3  ;;  %3957 = vmatprep.subr.bf16.mxu0 %v4392_v4  ;;  %v4496_v61 = vld [vmem:[%s5702_s2 + $0x6d0] sm:$0xff]  }
  0x67   :  { %3978 = vmatpush3.bf16.msra.mxu1 %v4391_v2  ;;  %2661 = vmatprep.mubr.bf16.mxu1 %v682_v6  ;;  %v4448_v2 = vld [vmem:[%s5702_s2 + $0x4b0] sm:$0xff]   ;;  %v698_v3 = vcombine.high %v690_v63, %v690_v63  ;;  %v5205_v4 = vrot.slane %v683_v0, %v4807_v41  ;;  %v4450_v6 = vld [vmem:[%s5702_s2 + $0x438] sm:$0xff]  }
  0x68   :  { %3979 = vmatprep.subr.bf16.mxu1 %v4394_v7  ;;  %v4499_v0 = vld [vmem:[%s5702_s2 + $0x618] sm:$0xff]  }
  0x69   :  { %3958 = vmatpush3.bf16.msra.mxu0 %v4393_v5  ;;  %v4449_v5 = vld [vmem:[%s5702_s2 + $0x478] sm:$0xff]   ;;  %v720_v7 = vrot.slane %v698_v3, %v4807_v41  ;;  %v4502_v3 = vld [vmem:[%s5702_s2 + $0x660] sm:$0xff]  }
  0x6a   :  { %3959 = vmatprep.subr.bf16.mxu0 %v4396_v9  ;;  %v4451_v9 = vld [vmem:[%s5702_s2 + $0x4f8] sm:$0xff]  }
  0x6b   :  { %3980 = vmatpush3.bf16.msra.mxu1 %v4395_v8  ;;  %v699_v8 = vcombine.high %v5205_v4, %v5205_v4 }
  0x6c   :  { %3981 = vmatprep.subr.bf16.mxu1 %v4398_v11  ;;  %v730_v11 = vcombine.high %v720_v7, %v720_v7 }
  0x6d   :  { %3960 = vmatpush3.bf16.msra.mxu0 %v4397_v10  ;;  %v4452_v10 = vld [vmem:[%s5702_s2 + $0x4b8] sm:$0xff]  }
  0x6e   :  { %3961 = vmatprep.subr.bf16.mxu0 %v4400_v13  ;;  %v4453_v13 = vld [vmem:[%s5702_s2 + $0x540] sm:$0xff]  }
  0x6f   :  { %3982 = vmatpush3.bf16.msra.mxu1 %v4399_v12  ;;  %v706_v12 = vrot.slane %v690_v63, %v4807_v41  ;;  %v4498_v63 = vld [vmem:[%s5702_s2 + $0x658] sm:$0xff]  }
  0x70   :  { %3983 = vmatprep.subr.bf16.mxu1 %v4402_v15  ;;  %v727_v15 = vrot.slane %v699_v8, %v4807_v41  ;;  %v4507_v8 = vld [vmem:[%s5702_s2 + $0x628] sm:$0xff]  }
  0x71   :  { %3962 = vmatpush3.bf16.msra.mxu0 %v4401_v14  ;;  %v4454_v14 = vld [vmem:[%s5702_s2 + $0x500] sm:$0xff]  }
  0x72   :  { %3963 = vmatprep.subr.bf16.mxu0 %v4404_v17  ;;  %v4456_v17 = vld [vmem:[%s5702_s2 + $0x580] sm:$0xff]  }
  0x73   :  { %3984 = vmatpush3.bf16.msra.mxu1 %v4403_v16  ;;  %v4455_v16 = vld [vmem:[%s5702_s2 + $0x5c0] sm:$0xff]  }
  0x74   :  { %3985 = vmatprep.subr.bf16.mxu1 %v4406_v19  ;;  %v4457_v19 = vld [vmem:[%s5702_s2 + $0x548] sm:$0xff]  }
  0x75   :  { %3964 = vmatpush3.bf16.msra.mxu0 %v4405_v18  ;;  %v728_v18 = vcombine.high %v706_v12, %v706_v12 }
  0x76   :  { %3965 = vmatprep.subr.bf16.mxu0 %v4408_v21  ;;  %v731_v21 = vcombine.high %v727_v15, %v727_v15 }
  0x77   :  { %3986 = vmatpush3.bf16.msra.mxu1 %v4407_v20  ;;  %v4458_v20 = vld [vmem:[%s5702_s2 + $0x508] sm:$0xff]  }
  0x78   :  { %3987 = vmatprep.subr.bf16.mxu1 %v4410_v23  ;;  %v4460_v23 = vld [vmem:[%s5702_s2 + $0x588] sm:$0xff]  }
  0x79   :  { %3966 = vmatpush3.bf16.msra.mxu0 %v4409_v22  ;;  %v4459_v22 = vld [vmem:[%s5702_s2 + $0x5c8] sm:$0xff]  }
  0x7a   :  { %3967 = vmatprep.subr.bf16.mxu0 %v4412_v25  ;;  %v4462_v25 = vld [vmem:[%s5702_s2 + $0x510] sm:$0xff]  }
  0x7b   :  { %3988 = vmatpush3.bf16.msra.mxu1 %v4411_v24  ;;  %v4461_v24 = vld [vmem:[%s5702_s2 + $0x550] sm:$0xff]  }
  0x7c   :  { %3989 = vmatprep.subr.bf16.mxu1 %v4414_v27  ;;  %v4464_v27 = vld [vmem:[%s5702_s2 + $0x590] sm:$0xff]  }
  0x7d   :  { %3968 = vmatpush3.bf16.msra.mxu0 %v4413_v26  ;;  %v4463_v26 = vld [vmem:[%s5702_s2 + $0x5d0] sm:$0xff]  }
  0x7e   :  { %3969 = vmatprep.subr.bf16.mxu0 %v4416_v29  ;;  %v4466_v29 = vld [vmem:[%s5702_s2 + $0x518] sm:$0xff]  }
  0x7f   :  { %3990 = vmatpush3.bf16.msra.mxu1 %v4415_v28  ;;  %v4465_v28 = vld [vmem:[%s5702_s2 + $0x558] sm:$0xff]  }
  0x80   :  { %3991 = vmatprep.subr.bf16.mxu1 %v4418_v31  ;;  %v4468_v31 = vld [vmem:[%s5702_s2 + $0x598] sm:$0xff]  }
  0x81   :  { %3970 = vmatpush3.bf16.msra.mxu0 %v4417_v30  ;;  %v4467_v30 = vld [vmem:[%s5702_s2 + $0x5d8] sm:$0xff]  }
  0x82   :  { %3999 = vmatprep.subr.bf16.mxu0 %v4421_v34  ;;  %v4471_v34 = vld [vmem:[%s5702_s2 + $0x5e0] sm:$0xff]  }
  0x83   :  { %3992 = vmatpush3.bf16.msra.mxu1 %v4420_v32  ;;  %v4469_v32 = vld [vmem:[%s5702_s2 + $0x560] sm:$0xff]  }
  0x84   :  { %2622 = vmatmul.mubr.bf16.vlgmr.msra.gmra.mrb[12].mxu0 %v664_v33  ;;  %4021 = vmatprep.subr.bf16.mxu1 %v4423_v36  ;;  %v4470_v33 = vld [vmem:[%s5702_s2 + $0x520] sm:$0xff]   ;;  %v4473_v36 = vld [vmem:[%s5702_s2 + $0x568] sm:$0xff]  }
  0x85   :  { %4000 = vmatpush3.bf16.msra.mxu0 %v4422_v35  ;;  %2701 = vmatprep.mubr.bf16.mxu0 %v720_v7  ;;  %v4472_v35 = vld [vmem:[%s5702_s2 + $0x5a0] sm:$0xff]   ;;  %v4506_v7 = vld [vmem:[%s5702_s2 + $0x668] sm:$0xff]  }
  0x86   :  { %2662 = vmatmul.mubr.bf16.vlgmr.msra.gmra.mrb[12].mxu1 %v680_v38  ;;  %4001 = vmatprep.subr.bf16.mxu0 %v4425_v39  ;;  %v4475_v38 = vld [vmem:[%s5702_s2 + $0x5e8] sm:$0xff]  }
  0x87   :  { %4022 = vmatpush3.bf16.msra.mxu1 %v4424_v37  ;;  %2741 = vmatprep.mubr.bf16.mxu1 %v730_v11  ;;  %v4474_v37 = vld [vmem:[%s5702_s2 + $0x528] sm:$0xff]   ;;  %v4510_v11 = vld [vmem:[%s5702_s2 + $0x670] sm:$0xff]  }
  0x88   :  { %4023 = vmatprep.subr.bf16.mxu1 %v4427_v42  ;;  %v4476_v39 = vld [vmem:[%s5702_s2 + $0x5a8] sm:$0xff]   ;;  %v4478_v42 = vld [vmem:[%s5702_s2 + $0x530] sm:$0xff]  }
  0x89   :  { %4002 = vmatpush3.bf16.msra.mxu0 %v4426_v40  ;;  %v4477_v40 = vld [vmem:[%s5702_s2 + $0x570] sm:$0xff]  }
  0x8a   :  { %4003 = vmatprep.subr.bf16.mxu0 %v4429_v44  ;;  %v4480_v44 = vld [vmem:[%s5702_s2 + $0x5b0] sm:$0xff]  }
  0x8b   :  { %4024 = vmatpush3.bf16.msra.mxu1 %v4428_v43  ;;  %v4479_v43 = vld [vmem:[%s5702_s2 + $0x5f0] sm:$0xff]  }
  0x8c   :  { %4025 = vmatprep.subr.bf16.mxu1 %v4431_v46  ;;  %v4482_v46 = vld [vmem:[%s5702_s2 + $0x538] sm:$0xff]  }
  0x8d   :  { %4004 = vmatpush3.bf16.msra.mxu0 %v4430_v45  ;;  %v4481_v45 = vld [vmem:[%s5702_s2 + $0x578] sm:$0xff]  }
  0x8e   :  { %4005 = vmatprep.subr.bf16.mxu0 %v4433_v48  ;;  %v4485_v48 = vld [vmem:[%s5702_s2 + $0x5b8] sm:$0xff]  }
  0x8f   :  { %4026 = vmatpush3.bf16.msra.mxu1 %v4432_v47  ;;  %v4483_v47 = vld [vmem:[%s5702_s2 + $0x5f8] sm:$0xff]  }
  0x90   :  { %4027 = vmatprep.subr.bf16.mxu1 %v4435_v50  ;;  %v4486_v50 = vld [vmem:[%s5702_s2 + $0x640] sm:$0xff]  }
  0x91   :  { %4006 = vmatpush3.bf16.msra.mxu0 %v4434_v49  ;;  %v713_v49 = vrot.slane %v5205_v4, %v4807_v41  ;;  %v4503_v4 = vld [vmem:[%s5702_s2 + $0x620] sm:$0xff]  }
  0x92   :  { %4007 = vmatprep.subr.bf16.mxu0 %v4437_v52  ;;  %v4488_v52 = vld [vmem:[%s5702_s2 + $0x6c0] sm:$0xff]  }
  0x93   :  { %4028 = vmatpush3.bf16.msra.mxu1 %v4436_v51  ;;  %v4487_v51 = vld [vmem:[%s5702_s2 + $0x600] sm:$0xff]  }
  0x94   :  { %4029 = vmatprep.subr.bf16.mxu1 %v4439_v54  ;;  %v729_v54 = vcombine.high %v713_v49, %v713_v49 }
  0x95   :  { %4008 = vmatpush3.bf16.msra.mxu0 %v4438_v53  ;;  %v4489_v53 = vld [vmem:[%s5702_s2 + $0x680] sm:$0xff]  }
  0x96   :  { %4009 = vmatprep.subr.bf16.mxu0 %v4441_v56  ;;  %v4491_v56 = vld [vmem:[%s5702_s2 + $0x608] sm:$0xff]  }
  0x97   :  { %4030 = vmatpush3.bf16.msra.mxu1 %v4440_v55  ;;  %v4490_v55 = vld [vmem:[%s5702_s2 + $0x648] sm:$0xff]  }
  0x98   :  { %4031 = vmatprep.subr.bf16.mxu1 %v4443_v58  ;;  %v4493_v58 = vld [vmem:[%s5702_s2 + $0x688] sm:$0xff]  }
  0x99   :  { %4010 = vmatpush3.bf16.msra.mxu0 %v4442_v57  ;;  %v4492_v57 = vld [vmem:[%s5702_s2 + $0x6c8] sm:$0xff]  }
  0x9a   :  { %4011 = vmatprep.subr.bf16.mxu0 %v4445_v60  ;;  %v4495_v60 = vld [vmem:[%s5702_s2 + $0x610] sm:$0xff]  }
  0x9b   :  { %4032 = vmatpush3.bf16.msra.mxu1 %v4444_v59  ;;  %v4494_v59 = vld [vmem:[%s5702_s2 + $0x650] sm:$0xff]  }
  0x9c   :  { %4033 = vmatprep.subr.bf16.mxu1 %v4447_v1  ;;  %v4500_v1 = vld [vmem:[%s5702_s2 + $0x6d8] sm:$0xff]  }
  0x9d   :  { %4012 = vmatpush3.bf16.msra.mxu0 %v4446_v62  ;;  %v4497_v62 = vld [vmem:[%s5702_s2 + $0x690] sm:$0xff]  }
  0x9e   :  { %4013 = vmatprep.subr.bf16.mxu0 %v4449_v5  ;;  %v4504_v5 = vld [vmem:[%s5702_s2 + $0x6e0] sm:$0xff]  }
  0x9f   :  { %4034 = vmatpush3.bf16.msra.mxu1 %v4448_v2  ;;  %v4501_v2 = vld [vmem:[%s5702_s2 + $0x698] sm:$0xff]  }
  0xa0   :  { %4035 = vmatprep.subr.bf16.mxu1 %v4451_v9  ;;  %v4508_v9 = vld [vmem:[%s5702_s2 + $0x6e8] sm:$0xff]  }
  0xa1   :  { %4014 = vmatpush3.bf16.msra.mxu0 %v4450_v6  ;;  %v4505_v6 = vld [vmem:[%s5702_s2 + $0x6a0] sm:$0xff]  }
  0xa2   :  { %4043 = vmatprep.subr.bf16.mxu0 %v4453_v13  ;;  %v4512_v13 = vld [vmem:[%s5702_s2 + $0x6f0] sm:$0xff]  }
  0xa3   :  { %4036 = vmatpush3.bf16.msra.mxu1 %v4452_v10  ;;  %v4509_v10 = vld [vmem:[%s5702_s2 + $0x6a8] sm:$0xff]  }
  0xa4   :  { %2702 = vmatmul.mubr.bf16.vlgmr.msra.gmra.mrb[16].mxu0 %v706_v12  ;;  %4065 = vmatprep.subr.bf16.mxu1 %v4455_v16  ;;  %v61_v12 = vld [vmem:[%s5721_s28 + $0x18] sm:$0xff]  ;;  %v4511_v16 = vld [vmem:[%s5702_s2 + $0x630] sm:$0xff]   ;;  %s5722_s28 = sld [smem:[#allocation6_spill]] }
  0xa5   :  { %4044 = vmatpush3.bf16.msra.mxu0 %v4454_v14  ;;  %2781 = vmatprep.mubr.bf16.mxu0 %v727_v15  ;;  %v739_v14 = vrot.slane %v61_v12, %v4807_v41  ;;  %v732_v15 = vcombine.high %v61_v12, %v61_v12 }
  0xa6   :  { %2742 = vmatmul.mubr.bf16.vlgmr.msra.gmra.mrb[16].mxu1 %v728_v18  ;;  %4045 = vmatprep.subr.bf16.mxu0 %v4457_v19 }
  0xa7   :  { %4066 = vmatpush3.bf16.msra.mxu1 %v4456_v17  ;;  %2821 = vmatprep.mubr.bf16.mxu1 %v731_v21  ;;  %v4514_v17 = vld [vmem:[%s5702_s2 + $0x678] sm:$0xff]   ;;  %v747_v18 = vcombine.high %v739_v14, %v739_v14  ;;  %v5411_v19 = vrot.slane %v732_v15, %v4807_v41 }
  0xa8   :  { %4067 = vmatprep.subr.bf16.mxu1 %v4459_v22  ;;  %v4516_v21 = vld [vmem:[%s5702_s2 + $0x6f8] sm:$0xff]  }
  0xa9   :  { %4046 = vmatpush3.bf16.msra.mxu0 %v4458_v20  ;;  %v4513_v20 = vld [vmem:[%s5702_s2 + $0x6b0] sm:$0xff]   ;;  %v769_v22 = vrot.slane %v747_v18, %v4807_v41  ;;  %v762_v15 = vrot.slane %v5411_v19, %v4807_v41 }
  0xaa   :  { %4047 = vmatprep.subr.bf16.mxu0 %v4461_v24  ;;  %v4515_v24 = vld [vmem:[%s5702_s2 + $0x638] sm:$0xff]  }
  0xab   :  { %4068 = vmatpush3.bf16.msra.mxu1 %v4460_v23  ;;  %v748_v23 = vcombine.high %v5411_v19, %v5411_v19 }
  0xac   :  { %4069 = vmatprep.subr.bf16.mxu1 %v4463_v26  ;;  %v4518_v26 = vld [vmem:[%s5702_s2 + $0x740] sm:$0xff]  }
  0xad   :  { %4048 = vmatpush3.bf16.msra.mxu0 %v4462_v25  ;;  %v755_v25 = vrot.slane %v739_v14, %v4807_v41  ;;  %v4550_v14 = vld [vmem:[%s5702_s2 + $0x7b8] sm:$0xff]  }
  0xae   :  { %4049 = vmatprep.subr.bf16.mxu0 %v4465_v28  ;;  %v4517_v28 = vld [vmem:[%s5702_s2 + $0x6b8] sm:$0xff]  }
  0xaf   :  { %4070 = vmatpush3.bf16.msra.mxu1 %v4464_v27  ;;  %v779_v27 = vcombine.high %v769_v22, %v769_v22 }
  0xb0   :  { %4071 = vmatprep.subr.bf16.mxu1 %v4467_v30  ;;  %v4520_v30 = vld [vmem:[%s5702_s2 + $0x7c0] sm:$0xff]  }
  0xb1   :  { %4050 = vmatpush3.bf16.msra.mxu0 %v4466_v29  ;;  %v776_v29 = vrot.slane %v748_v23, %v4807_v41  ;;  %v2989_v41 = vld [vmem:[%s5722_s28] sm:$0x1] }
  0xb2   :  { %4051 = vmatprep.subr.bf16.mxu0 %v4469_v32  ;;  %v777_v32 = vcombine.high %v755_v25, %v755_v25 }
  0xb3   :  { %4072 = vmatpush3.bf16.msra.mxu1 %v4468_v31  ;;  %v4519_v31 = vld [vmem:[%s5702_s2 + $0x700] sm:$0xff]  }
  0xb4   :  { %4073 = vmatprep.subr.bf16.mxu1 %v4471_v34  ;;  %v4521_v34 = vld [vmem:[%s5702_s2 + $0x780] sm:$0xff]  }
  0xb5   :  { %4052 = vmatpush3.bf16.msra.mxu0 %v4470_v33  ;;  %v4522_v33 = vld [vmem:[%s5702_s2 + $0x748] sm:$0xff]  }
  0xb6   :  { %4053 = vmatprep.subr.bf16.mxu0 %v4473_v36  ;;  %v4524_v36 = vld [vmem:[%s5702_s2 + $0x7c8] sm:$0xff]  }
  0xb7   :  { %4074 = vmatpush3.bf16.msra.mxu1 %v4472_v35  ;;  %v780_v35 = vcombine.high %v776_v29, %v776_v29 }
  0xb8   :  { %4075 = vmatprep.subr.bf16.mxu1 %v4475_v38  ;;  %v4526_v38 = vld [vmem:[%s5702_s2 + $0x750] sm:$0xff]  }
  0xb9   :  { %4054 = vmatpush3.bf16.msra.mxu0 %v4474_v37  ;;  %v4523_v37 = vld [vmem:[%s5702_s2 + $0x708] sm:$0xff]  }
  0xba   :  { %4055 = vmatprep.subr.bf16.mxu0 %v4477_v40  ;;  %v4528_v40 = vld [vmem:[%s5702_s2 + $0x7d0] sm:$0xff]  }
  0xbb   :  { %4076 = vmatpush3.bf16.msra.mxu1 %v4476_v39  ;;  %v4525_v39 = vld [vmem:[%s5702_s2 + $0x788] sm:$0xff]  }
  0xbc   :  { %4077 = vmatprep.subr.bf16.mxu1 %v4479_v43  ;;  %v4530_v43 = vld [vmem:[%s5702_s2 + $0x758] sm:$0xff]  }
  0xbd   :  { %4056 = vmatpush3.bf16.msra.mxu0 %v4478_v42  ;;  %v4527_v42 = vld [vmem:[%s5702_s2 + $0x710] sm:$0xff]  }
  0xbe   :  { %4057 = vmatprep.subr.bf16.mxu0 %v4481_v45  ;;  %v4531_v45 = vld [vmem:[%s5702_s2 + $0x718] sm:$0xff]  }
  0xbf   :  { %4078 = vmatpush3.bf16.msra.mxu1 %v4480_v44  ;;  %v4529_v44 = vld [vmem:[%s5702_s2 + $0x790] sm:$0xff]  }
  0xc0   :  { %4079 = vmatprep.subr.bf16.mxu1 %v4483_v47  ;;  %v4533_v47 = vld [vmem:[%s5702_s2 + $0x798] sm:$0xff]  }
  0xc1   :  { %4058 = vmatpush3.bf16.msra.mxu0 %v4482_v46  ;;  %v4532_v46 = vld [vmem:[%s5702_s2 + $0x7d8] sm:$0xff]  }
  0xc2   :  { %4087 = vmatprep.subr.bf16.mxu0 %v4486_v50  ;;  %v4536_v50 = vld [vmem:[%s5702_s2 + $0x7e0] sm:$0xff]  }
  0xc3   :  { %4080 = vmatpush3.bf16.msra.mxu1 %v4485_v48  ;;  %v4534_v48 = vld [vmem:[%s5702_s2 + $0x760] sm:$0xff]  }
  0xc4   :  { %2782 = vmatmul.mubr.bf16.vlgmr.msra.gmra.mrb[20].mxu0 %v713_v49  ;;  %4109 = vmatprep.subr.bf16.mxu1 %v4488_v52  ;;  %v4535_v49 = vld [vmem:[%s5702_s2 + $0x720] sm:$0xff]   ;;  %v4538_v52 = vld [vmem:[%s5702_s2 + $0x768] sm:$0xff]  }
  0xc5   :  { %4088 = vmatpush3.bf16.msra.mxu0 %v4487_v51  ;;  %2861 = vmatprep.mubr.bf16.mxu0 %v769_v22  ;;  %v4537_v51 = vld [vmem:[%s5702_s2 + $0x7a0] sm:$0xff]  }
  0xc6   :  { %2822 = vmatmul.mubr.bf16.vlgmr.msra.gmra.mrb[20].mxu1 %v729_v54  ;;  %4089 = vmatprep.subr.bf16.mxu0 %v4490_v55  ;;  %v4540_v54 = vld [vmem:[%s5702_s2 + $0x7e8] sm:$0xff]  }
  0xc7   :  { %4110 = vmatpush3.bf16.msra.mxu1 %v4489_v53  ;;  %2901 = vmatprep.mubr.bf16.mxu1 %v779_v27  ;;  %v4539_v53 = vld [vmem:[%s5702_s2 + $0x728] sm:$0xff]  }
  0xc8   :  { %4111 = vmatprep.subr.bf16.mxu1 %v4492_v57  ;;  %v4541_v55 = vld [vmem:[%s5702_s2 + $0x7a8] sm:$0xff]   ;;  %v4542_v57 = vld [vmem:[%s5702_s2 + $0x770] sm:$0xff]  }
  0xc9   :  { %4090 = vmatpush3.bf16.msra.mxu0 %v4491_v56  ;;  %v3527_v56 = vld [vmem:[%s5703_s3] ss:$0 sm:$0xff] }
  0xca   :  { %4091 = vmatprep.subr.bf16.mxu0 %v4494_v59  ;;  %v4543_v59 = vld [vmem:[%s5702_s2 + $0x730] sm:$0xff]  }
  0xcb   :  { %4112 = vmatpush3.bf16.msra.mxu1 %v4493_v58 }
  0xcc   :  { %4113 = vmatprep.subr.bf16.mxu1 %v4496_v61  ;;  %v4544_v61 = vld [vmem:[%s5702_s2 + $0x7f0] sm:$0xff]  }
  0xcd   :  { %4092 = vmatpush3.bf16.msra.mxu0 %v4495_v60 }
  0xce   :  { %4093 = vmatprep.subr.bf16.mxu0 %v4498_v63 }
  0xcf   :  { %4114 = vmatpush3.bf16.msra.mxu1 %v4497_v62 }
  0xd0   :  { %4115 = vmatprep.subr.bf16.mxu1 %v4500_v1  ;;  %v4551_v1 = vld [vmem:[%s5704_s4] sm:$0x1f]  }
  0xd1   :  { %4094 = vmatpush3.bf16.msra.mxu0 %v4499_v0  ;;  %v3010_v12 = vsel %vm3008_vm0, %v4551_v1, 0 }
  0xd2   :  { %4095 = vmatprep.subr.bf16.mxu0 %v4502_v3 }
  0xd3   :  { %4116 = vmatpush3.bf16.msra.mxu1 %v4501_v2 }
  0xd4   :  { %4117 = vmatprep.subr.bf16.mxu1 %v4504_v5  ;;  %v4546_v5 = vld [vmem:[%s5702_s2 + $0x778] sm:$0xff]  }
  0xd5   :  { %4096 = vmatpush3.bf16.msra.mxu0 %v4503_v4  ;;  %v4545_v4 = vld [vmem:[%s5702_s2 + $0x7b0] sm:$0xff]  }
  0xd6   :  { %4097 = vmatprep.subr.bf16.mxu0 %v4506_v7 }
  0xd7   :  { %4118 = vmatpush3.bf16.msra.mxu1 %v4505_v6 }
  0xd8   :  { %4119 = vmatprep.subr.bf16.mxu1 %v4508_v9  ;;  %v4547_v9 = vld [vmem:[%s5702_s2 + $0x738] sm:$0xff]  }
  0xd9   :  { %4098 = vmatpush3.bf16.msra.mxu0 %v4507_v8 }
  0xda   :  { %4099 = vmatprep.subr.bf16.mxu0 %v4510_v11 }
  0xdb   :  { %4120 = vmatpush3.bf16.msra.mxu1 %v4509_v10  ;;  %v4548_v10 = vld [vmem:[%s5702_s2 + $0x7f8] sm:$0xff]  }
  0xdc   :  { %4121 = vmatprep.subr.bf16.mxu1 %v4512_v13 }
  0xdd   :  { %4100 = vmatpush3.bf16.msra.mxu0 %v4511_v16  ;;  %v4609_v16 = vmov 0.0  }
  0xde   :  { %4101 = vmatprep.subr.bf16.mxu0 %v4514_v17  ;;  %v778_v17 = vcombine.high %v762_v15, %v762_v15 }
  0xdf   :  { %4122 = vmatpush3.bf16.msra.mxu1 %v4513_v20 }
  0xe0   :  { %4123 = vmatprep.subr.bf16.mxu1 %v4516_v21 }
  0xe1   :  { %4102 = vmatpush3.bf16.msra.mxu0 %v4515_v24 }
  0xe2   :  { %4131 = vmatprep.subr.bf16.mxu0 %v4518_v26 }
  0xe3   :  { %4124 = vmatpush3.bf16.msra.mxu1 %v4517_v28 }
  0xe4   :  { %2862 = vmatmul.mubr.bf16.vlgmr.msra.gmra.mrb[24].mxu0 %v755_v25  ;;  %4153 = vmatprep.subr.bf16.mxu1 %v4520_v30 }
  0xe5   :  { %4132 = vmatpush3.bf16.msra.mxu0 %v4519_v31  ;;  %2941 = vmatprep.mubr.bf16.mxu0 %v776_v29 }
  0xe6   :  { %2902 = vmatmul.mubr.bf16.vlgmr.msra.gmra.mrb[24].mxu1 %v777_v32  ;;  %4133 = vmatprep.subr.bf16.mxu0 %v4522_v33 }
  0xe7   :  { %4154 = vmatpush3.bf16.msra.mxu1 %v4521_v34  ;;  %2981 = vmatprep.mubr.bf16.mxu1 %v780_v35 }
  0xe8   :  { %4155 = vmatprep.subr.bf16.mxu1 %v4524_v36 }
  0xe9   :  { %4134 = vmatpush3.bf16.msra.mxu0 %v4523_v37 }
  0xea   :  { %4135 = vmatprep.subr.bf16.mxu0 %v4526_v38 }
  0xeb   :  { %4156 = vmatpush3.bf16.msra.mxu1 %v4525_v39 }
  0xec   :  { %4157 = vmatprep.subr.bf16.mxu1 %v4528_v40 }
  0xed   :  { %4136 = vmatpush3.bf16.msra.mxu0 %v4527_v42 }
  0xee   :  { %4137 = vmatprep.subr.bf16.mxu0 %v4530_v43 }
  0xef   :  { %4158 = vmatpush3.bf16.msra.mxu1 %v4529_v44 }
  0xf0   :  { %4159 = vmatprep.subr.bf16.mxu1 %v4532_v46 }
  0xf1   :  { %4138 = vmatpush3.bf16.msra.mxu0 %v4531_v45 }
  0xf2   :  { %4139 = vmatprep.subr.bf16.mxu0 %v4534_v48 }
  0xf3   :  { %4160 = vmatpush3.bf16.msra.mxu1 %v4533_v47 }
  0xf4   :  { %4161 = vmatprep.subr.bf16.mxu1 %v4536_v50 }
  0xf5   :  { %4140 = vmatpush3.bf16.msra.mxu0 %v4535_v49 }
  0xf6   :  { %4141 = vmatprep.subr.bf16.mxu0 %v4538_v52 }
  0xf7   :  { %v3839_v58 = vpop.f32.mrb[0].mxu0  ;;  %4162 = vmatpush3.bf16.msra.mxu1 %v4537_v51 }
  0xf8   :  { %v3840_v60 = vpop.f32.mrb[1].mxu0  ;;  %4163 = vmatprep.subr.bf16.mxu1 %v4540_v54 }
  0xf9   :  { %v3841_v62 = vadd.f32 %v3840_v60, %v3839_v58  ;;  %v3842_v63 = vpop.f32.mrb[2].mxu0  ;;  %v3861_v0 = vpop.f32.mrb[0].mxu1  ;;  %4142 = vmatpush3.bf16.msra.mxu0 %v4539_v53 }
  0xfa   :  { %v3843_v2 = vpop.f32.mrb[3].mxu0  ;;  %v3862_v3 = vpop.f32.mrb[1].mxu1  ;;  %4143 = vmatprep.subr.bf16.mxu0 %v4542_v57 }
  0xfb   :  { %v2384_v6 = vadd.f32 %v3841_v62, %v3527_v56  ;;  %v3863_v7 = vadd.f32 %v3862_v3, %v3861_v0  ;;  %4164 = vmatpush3.bf16.msra.mxu1 %v4541_v55  ;;  %v3864_v8 = vpop.f32.mrb[2].mxu1 }
  0xfc   :  { %v3865_v11 = vpop.f32.mrb[3].mxu1  ;;  %4165 = vmatprep.subr.bf16.mxu1 %v4544_v61 }
  0xfd   :  { %v2424_v13 = vadd.f32 %v3863_v7, %v2384_v6  ;;  %4144 = vmatpush3.bf16.msra.mxu0 %v4543_v59 }
  0xfe   :  { %4145 = vmatprep.subr.bf16.mxu0 %v4546_v5 }
  0xff   :  { %4166 = vmatpush3.bf16.msra.mxu1 %v4545_v4 }
 0x100   :  { %4167 = vmatprep.subr.bf16.mxu1 %v4548_v10 }
 0x101   :  { %4146 = vmatpush3.bf16.msra.mxu0 %v4547_v9 }
 0x102   :  { %4209 = vmatprep.subr.bf16.mxu0 %v4609_v16 }
 0x103   :  { %4168 = vmatpush3.bf16.msra.mxu1 %v4550_v14 }
 0x104   :  { %2942 = vmatmul.mubr.bf16.vlgmr.msra.gmra.mrb[28].mxu0 %v762_v15  ;;  %4215 = vmatprep.subr.bf16.mxu1 %v4609_v16 }
 0x105   :  { %4210 = vmatpush3.bf16.msra.mxu0 %v3010_v12  ;;  %4211 = vmatprep.mubr.msk.bf16.mxu0 %vm4610_vm2, %v4609_v16 }
 0x106   :  { %2982 = vmatmul.mubr.bf16.vlgmr.msra.gmra.mrb[28].mxu1 %v778_v17  ;;  %4235 = vmatprep.subr.bf16.mxu0 %v4609_v16 }
 0x107   :  { %4231 = vmatprep.mubr.msk.bf16.mxu1 %vm4610_vm2, %v4609_v16 }
 0x10c   :  { %4212 = vmatmul.mubr.msk.bf16.vlgmr.msra.gmra.mrb[32].mxu0 %vm3004_vm1, %v2989_v41 }
 0x10d   :  { %4251 = vmatprep.mubr.msk.bf16.mxu0 %vm4610_vm2, %v4609_v16 }
 0x10e   :  { %22 = vsyncpa [#allocation3], 0  ;;  %v4552_v43 = vld [vmem:[%s5706_s6] sm:$0xff]   ;;  %v4554_v45 = vld [vmem:[%s5706_s6 + $0x8] sm:$0xff]   ;;  %vm3456_vm3 = vcmask 523264   ;;  %vm3500_vm4 = vcmask 74752  }
 0x10f   :  { %v4553_v44 = vld [vmem:[%s5707_s7] sm:$0xff]   ;;  %4236 = vmatpush3.bf16.msra.mxu0 %v4552_v43  ;;  %v4555_v46 = vld [vmem:[%s5707_s7 + $0x8] sm:$0xff]   ;;  %v4556_v47 = vld [vmem:[%s5706_s6 + $0x10] sm:$0xff]  }
 0x110   :  { %4216 = vmatpush3.bf16.msra.mxu1 %v4553_v44  ;;  %4237 = vmatprep.subr.bf16.mxu0 %v4609_v16  ;;  %v4557_v48 = vld [vmem:[%s5707_s7 + $0x10] sm:$0xff]   ;;  %v4558_v49 = vld [vmem:[%s5706_s6 + $0x18] sm:$0xff]   ;;  %v4560_v51 = vld [vmem:[%s5706_s6 + $0x20] sm:$0xff]  }
 0x111   :  { %4217 = vmatprep.subr.bf16.mxu1 %v4609_v16  ;;  %v4559_v50 = vld [vmem:[%s5707_s7 + $0x18] sm:$0xff]   ;;  %v4561_v52 = vld [vmem:[%s5707_s7 + $0x20] sm:$0xff]   ;;  %v4562_v53 = vld [vmem:[%s5706_s6 + $0x28] sm:$0xff]  }
 0x112   :  { %v4563_v55 = vld [vmem:[%s5707_s7 + $0x28] sm:$0xff]   ;;  %v4564_v57 = vld [vmem:[%s5706_s6 + $0x30] sm:$0xff]   ;;  %v4566_v4 = vld [vmem:[%s5706_s6 + $0x38] sm:$0xff]  }
 0x113   :  { %4238 = vmatpush3.bf16.msra.mxu0 %v4554_v45  ;;  %v4565_v2 = vld [vmem:[%s5707_s7 + $0x30] sm:$0xff]   ;;  %v4567_v6 = vld [vmem:[%s5707_s7 + $0x38] sm:$0xff]  }
 0x114   :  { %4218 = vmatpush3.bf16.msra.mxu1 %v4555_v46  ;;  %4239 = vmatprep.subr.bf16.mxu0 %v4609_v16 }
 0x115   :  { %4219 = vmatprep.subr.bf16.mxu1 %v4609_v16 }
 0x117   :  { %v3883_v18 = vpop.f32.mrb[4].mxu0  ;;  %4240 = vmatpush3.bf16.msra.mxu0 %v4556_v47 }
 0x118   :  { %v3884_v19 = vpop.f32.mrb[5].mxu0  ;;  %4220 = vmatpush3.bf16.msra.mxu1 %v4557_v48  ;;  %4241 = vmatprep.subr.bf16.mxu0 %v4609_v16 }
 0x119   :  { %v3885_v20 = vadd.f32 %v3884_v19, %v3883_v18  ;;  %v3886_v21 = vpop.f32.mrb[6].mxu0  ;;  %v3905_v22 = vpop.f32.mrb[4].mxu1  ;;  %4221 = vmatprep.subr.bf16.mxu1 %v4609_v16 }
 0x11a   :  { %v3887_v23 = vpop.f32.mrb[7].mxu0  ;;  %v3906_v24 = vpop.f32.mrb[5].mxu1 }
 0x11b   :  { %v2464_v25 = vadd.f32 %v3885_v20, %v2424_v13  ;;  %v3907_v26 = vadd.f32 %v3906_v24, %v3905_v22  ;;  %v3908_v27 = vpop.f32.mrb[6].mxu1  ;;  %4242 = vmatpush3.bf16.msra.mxu0 %v4558_v49 }
 0x11c   :  { %v3909_v28 = vpop.f32.mrb[7].mxu1  ;;  %4222 = vmatpush3.bf16.msra.mxu1 %v4559_v50  ;;  %4243 = vmatprep.subr.bf16.mxu0 %v4609_v16 }
 0x11d   :  { %v2504_v29 = vadd.f32 %v3907_v26, %v2464_v25  ;;  %4223 = vmatprep.subr.bf16.mxu1 %v4609_v16 }
 0x11f   :  { %4244 = vmatpush3.bf16.msra.mxu0 %v4560_v51 }
 0x120   :  { %4224 = vmatpush3.bf16.msra.mxu1 %v4561_v52  ;;  %4245 = vmatprep.subr.bf16.mxu0 %v4609_v16 }
 0x121   :  { %4225 = vmatprep.subr.bf16.mxu1 %v4609_v16 }
 0x123   :  { %4246 = vmatpush3.bf16.msra.mxu0 %v4562_v53 }
 0x124   :  { %4247 = vmatprep.subr.bf16.mxu0 %v4609_v16  ;;  %4226 = vmatpush3.bf16.msra.mxu1 %v4563_v55 }
 0x125   :  { %4227 = vmatprep.subr.bf16.mxu1 %v4609_v16 }
 0x127   :  { %4248 = vmatpush3.bf16.msra.mxu0 %v4564_v57 }
 0x128   :  { %4249 = vmatprep.subr.bf16.mxu0 %v4609_v16  ;;  %4228 = vmatpush3.bf16.msra.mxu1 %v4565_v2  ;;  %v4570_v2 = vld [vmem:[%s5711_s11 + $0x10] sm:$0xff]  }
 0x129   :  { %4229 = vmatprep.subr.bf16.mxu1 %v4609_v16 }
 0x12b   :  { %4250 = vmatpush3.bf16.msra.mxu0 %v4566_v4  ;;  %v4572_v4 = vld [vmem:[%s5711_s11 + $0x20] sm:$0xff]  }
 0x12c   :  { %4275 = vmatprep.subr.bf16.mxu0 %v4609_v16  ;;  %4230 = vmatpush3.bf16.msra.mxu1 %v4567_v6  ;;  %v4574_v6 = vld [vmem:[%s5711_s11 + $0x30] sm:$0xff]  }
 0x12d   :  { %4255 = vmatprep.subr.bf16.mxu1 %v4609_v16 }
 0x137   :  { %v3927_v30 = vpop.f32.mrb[8].mxu0 }
 0x138   :  { %v3928_v31 = vpop.f32.mrb[9].mxu0 }
 0x139   :  { %v3929_v32 = vadd.f32 %v3928_v31, %v3927_v30  ;;  %v3930_v33 = vpop.f32.mrb[10].mxu0  ;;  %v3949_v34 = vpop.f32.mrb[8].mxu1 }
 0x13a   :  { %v3931_v35 = vpop.f32.mrb[11].mxu0  ;;  %v3950_v36 = vpop.f32.mrb[9].mxu1 }
 0x13b   :  { %v2544_v37 = vadd.f32 %v3929_v32, %v2504_v29  ;;  %v3951_v38 = vadd.f32 %v3950_v36, %v3949_v34  ;;  %v3952_v39 = vpop.f32.mrb[10].mxu1 }
 0x13c   :  { %v3953_v40 = vpop.f32.mrb[11].mxu1 }
 0x13d   :  { %v2584_v42 = vadd.f32 %v3951_v38, %v2544_v37 }
 0x157   :  { %v3971_v54 = vpop.f32.mrb[12].mxu0 }
 0x158   :  { %v3972_v56 = vpop.f32.mrb[13].mxu0 }
 0x159   :  { %v3973_v58 = vadd.f32 %v3972_v56, %v3971_v54  ;;  %v3974_v59 = vpop.f32.mrb[14].mxu0  ;;  %v3993_v60 = vpop.f32.mrb[12].mxu1  ;;  %v3784_v56 = vld [vmem:[%s5705_s5] ss:$0 sm:$0xff] }
 0x15a   :  { %v3975_v61 = vpop.f32.mrb[15].mxu0  ;;  %v3994_v62 = vpop.f32.mrb[13].mxu1 }
 0x15b   :  { %v2624_v63 = vadd.f32 %v3973_v58, %v2584_v42  ;;  %v3995_v0 = vadd.f32 %v3994_v62, %v3993_v60  ;;  %v3996_v1 = vpop.f32.mrb[14].mxu1  ;;  %v4568_v62 = vld [vmem:[%s5711_s11] sm:$0xff]  }
 0x15c   :  { %v3997_v3 = vpop.f32.mrb[15].mxu1  ;;  %v4569_v1 = vld [vmem:[%s5711_s11 + $0x8] sm:$0xff]  }
 0x15d   :  { %v2664_v5 = vadd.f32 %v3995_v0, %v2624_v63  ;;  %v4571_v3 = vld [vmem:[%s5711_s11 + $0x18] sm:$0xff]  }
 0x177   :  { %v4015_v7 = vpop.f32.mrb[16].mxu0 }
 0x178   :  { %v4016_v8 = vpop.f32.mrb[17].mxu0 }
 0x179   :  { %v4017_v9 = vadd.f32 %v4016_v8, %v4015_v7  ;;  %v4018_v10 = vpop.f32.mrb[18].mxu0  ;;  %v4037_v11 = vpop.f32.mrb[16].mxu1  ;;  %v4575_v7 = vld [vmem:[%s5711_s11 + $0x38] sm:$0xff]   ;;  %v4576_v8 = vld [vmem:[%s5715_s15] sm:$0xff]  }
 0x17a   :  { %v4019_v12 = vpop.f32.mrb[19].mxu0  ;;  %v4038_v13 = vpop.f32.mrb[17].mxu1 }
 0x17b   :  { %v2704_v14 = vadd.f32 %v4017_v9, %v2664_v5  ;;  %v4039_v15 = vadd.f32 %v4038_v13, %v4037_v11  ;;  %v4040_v17 = vpop.f32.mrb[18].mxu1  ;;  %v4573_v5 = vld [vmem:[%s5711_s11 + $0x28] sm:$0xff]   ;;  %v3803_v13 = vld [vmem:[%s5708_s8] ss:$0 sm:$0xff] }
 0x17c   :  { %v4041_v41 = vpop.f32.mrb[19].mxu1 }
 0x17d   :  { %v2744_v18 = vadd.f32 %v4039_v15, %v2704_v14 }
 0x197   :  { %v4059_v19 = vpop.f32.mrb[20].mxu0 }
 0x198   :  { %v4060_v20 = vpop.f32.mrb[21].mxu0 }
 0x199   :  { %v4061_v21 = vadd.f32 %v4060_v20, %v4059_v19  ;;  %v4062_v22 = vpop.f32.mrb[22].mxu0  ;;  %v4081_v23 = vpop.f32.mrb[20].mxu1  ;;  %v3804_v20 = vld [vmem:[%s5709_s9] ss:$0 sm:$0xff] }
 0x19a   :  { %v4063_v24 = vpop.f32.mrb[23].mxu0  ;;  %v4082_v25 = vpop.f32.mrb[21].mxu1  ;;  %v3805_v22 = vld [vmem:[%s5710_s10] ss:$0 sm:$0xff] }
 0x19b   :  { %v2784_v26 = vadd.f32 %v4061_v21, %v2744_v18  ;;  %v4083_v27 = vadd.f32 %v4082_v25, %v4081_v23  ;;  %v4084_v28 = vpop.f32.mrb[22].mxu1 }
 0x19c   :  { %v4085_v29 = vpop.f32.mrb[23].mxu1  ;;  %v4579_v28 = vld [vmem:[%s5715_s15 + $0x18] sm:$0xff]  }
 0x19d   :  { %v2824_v30 = vadd.f32 %v4083_v27, %v2784_v26  ;;  %v4577_v26 = vld [vmem:[%s5715_s15 + $0x8] sm:$0xff]   ;;  %v4578_v27 = vld [vmem:[%s5715_s15 + $0x10] sm:$0xff]   ;;  %v3806_v29 = vld [vmem:[%s5712_s12] ss:$0 sm:$0xff] }
 0x1b7   :  { %v4103_v31 = vpop.f32.mrb[24].mxu0 }
 0x1b8   :  { %v4104_v32 = vpop.f32.mrb[25].mxu0 }
 0x1b9   :  { %v4105_v33 = vadd.f32 %v4104_v32, %v4103_v31  ;;  %v4106_v34 = vpop.f32.mrb[26].mxu0  ;;  %v4125_v35 = vpop.f32.mrb[24].mxu1 }
 0x1ba   :  { %v4107_v36 = vpop.f32.mrb[27].mxu0  ;;  %v4126_v37 = vpop.f32.mrb[25].mxu1 }
 0x1bb   :  { %v2864_v38 = vadd.f32 %v4105_v33, %v2824_v30  ;;  %v4127_v39 = vadd.f32 %v4126_v37, %v4125_v35  ;;  %v4128_v40 = vpop.f32.mrb[26].mxu1  ;;  %v3815_v33 = vld [vmem:[%s5713_s13] ss:$0 sm:$0xff]  ;;  %s4611_s13 = smov [#allocation2]  }
 0x1bc   :  { %v4129_v42 = vpop.f32.mrb[27].mxu1  ;;  %v3817_v40 = vld [vmem:[%s5716_s16] ss:$0 sm:$0xff] }
 0x1bd   :  { %v2904_v43 = vadd.f32 %v4127_v39, %v2864_v38 }
 0x1d7   :  { %v4147_v44 = vpop.f32.mrb[28].mxu0 }
 0x1d8   :  { %v4148_v45 = vpop.f32.mrb[29].mxu0 }
 0x1d9   :  { %v4149_v46 = vadd.f32 %v4148_v45, %v4147_v44  ;;  %v4150_v47 = vpop.f32.mrb[30].mxu0  ;;  %v4169_v48 = vpop.f32.mrb[28].mxu1 }
 0x1da   :  { %v4151_v49 = vpop.f32.mrb[31].mxu0  ;;  %v4170_v50 = vpop.f32.mrb[29].mxu1 }
 0x1db   :  { %v2944_v51 = vadd.f32 %v4149_v46, %v2904_v43  ;;  %v4171_v52 = vadd.f32 %v4170_v50, %v4169_v48  ;;  %v4172_v53 = vpop.f32.mrb[30].mxu1 }
 0x1dc   :  { %v4173_v54 = vpop.f32.mrb[31].mxu1 }
 0x1dd   :  { %v2984_v55 = vadd.f32 %v4171_v52, %v2944_v51 }
 0x1df   :  { %v3052_v57 = vpack.c.bf16 %v2984_v55, %v2984_v55  ;;  %v3046_v58 = vpop.f32.mrb[32].mxu0 }
 0x1e0   :  { %v3047_v59 = vadd.f32 %v3784_v56, %v3046_v58  ;;  %v4213_v60 = vpop.f32.mrb[33].mxu0 }
 0x1e1   :  { %v3049_v61 = vpop.f32.mrb[34].mxu0  ;;  %4252 = vmatmul.mubr.bf16.vlgmr.msra.gmra.mrb[36].mxu0 %v3052_v57 }
 0x1e2   :  { %v3069_v63 = vpack.c.bf16 %v3047_v59, %v3047_v59  ;;  %v4214_v0 = vpop.f32.mrb[35].mxu0  ;;  %4283 = vmatprep.mubr.msk.bf16.mxu0 %vm4610_vm2, %v4609_v16  ;;  %4276 = vmatpush3.bf16.msra.mxu0 %v4576_v8 }
 0x1e3   :  { %4277 = vmatprep.subr.bf16.mxu0 %v4609_v16 }
 0x1e4   :  { %4232 = vmatmul.mubr.bf16.vlgmr.msra.gmra.mrb[32].mxu1 %v3069_v63 }
 0x1e5   :  { %4256 = vmatpush3.bf16.msra.mxu1 %v4568_v62  ;;  %4271 = vmatprep.mubr.msk.bf16.mxu1 %vm4610_vm2, %v4609_v16 }
 0x1e6   :  { %4257 = vmatprep.subr.bf16.mxu1 %v4609_v16  ;;  %4278 = vmatpush3.bf16.msra.mxu0 %v4577_v26 }
 0x1e7   :  { %4279 = vmatprep.subr.bf16.mxu0 %v4609_v16 }
 0x1e9   :  { %4258 = vmatpush3.bf16.msra.mxu1 %v4569_v1 }
 0x1ea   :  { %4259 = vmatprep.subr.bf16.mxu1 %v4609_v16  ;;  %4280 = vmatpush3.bf16.msra.mxu0 %v4578_v27 }
 0x1eb   :  { %4281 = vmatprep.subr.bf16.mxu0 %v4609_v16 }
 0x1ed   :  { %4260 = vmatpush3.bf16.msra.mxu1 %v4570_v2 }
 0x1ee   :  { %4261 = vmatprep.subr.bf16.mxu1 %v4609_v16  ;;  %4282 = vmatpush3.bf16.msra.mxu0 %v4579_v28 }
 0x1f1   :  { %4262 = vmatpush3.bf16.msra.mxu1 %v4571_v3 }
 0x1f2   :  { %4263 = vmatprep.subr.bf16.mxu1 %v4609_v16 }
 0x1f5   :  { %4264 = vmatpush3.bf16.msra.mxu1 %v4572_v4 }
 0x1f6   :  { %4265 = vmatprep.subr.bf16.mxu1 %v4609_v16 }
 0x1f9   :  { %4266 = vmatpush3.bf16.msra.mxu1 %v4573_v5 }
 0x1fa   :  { %4267 = vmatprep.subr.bf16.mxu1 %v4609_v16 }
 0x1fd   :  { %4268 = vmatpush3.bf16.msra.mxu1 %v4574_v6 }
 0x1fe   :  { %4269 = vmatprep.subr.bf16.mxu1 %v4609_v16  ;;  %v3816_v16 = vld [vmem:[%s5714_s14] ss:$0 sm:$0xff]  ;;  %s3519_s14 = sshll.u32 %s4611_s13, 4  ;;  %s3520_s14 = int_to_ptr.vmem [resolvable:$true] %s3519_s14 }
 0x1ff   :  { %s4584_s16 = scalar_lea.vmem %s3520_s14, 32  ;;  %p4589_p1 = scmp.lt.s32.totalorder %s3520_s14, %s3520_s14 }
 0x200   :  { %p4585_p0 = scmp.ne.s32.totalorder %s3520_s14, %s4584_s16  ;;  %p4590_p2 = scmp.lt.s32.totalorder %s4584_s16, %s4584_s16 }
 0x201   :  { %4270 = vmatpush3.bf16.msra.mxu1 %v4575_v7 }
 0x202   :  { %p4591_p3 = por %p4590_p2, %p4589_p1 }
 0x204   :  { %p4592_p4 = pnand %p4591_p3, %p4585_p0 }
 0x2b4   :  { %v3256_v9 = vpop.f32.mrb[36].mxu0 }
 0x2b5   :  { %v4253_v10 = vpop.f32.mrb[37].mxu0 }
 0x2b6   :  { %v3259_v11 = vpop.f32.mrb[38].mxu0 }
 0x2b7   :  { %v3168_v12 = vpop.f32.mrb[32].mxu1  ;;  %v4254_v14 = vpop.f32.mrb[39].mxu0 }
 0x2b8   :  { %v3257_v15 = vadd.f32 %v3256_v9, %v3168_v12  ;;  %v4233_v17 = vpop.f32.mrb[33].mxu1 }
 0x2b9   :  { %v3171_v41 = vpop.f32.mrb[34].mxu1 }
 0x2ba   :  { %v3269_v18 = vadd.f32 %v3803_v13, %v3257_v15  ;;  %v4234_v19 = vpop.f32.mrb[35].mxu1 }
 0x2bc   :  { %v3270_v21 = vmax.f32 %v3269_v18, 0.0 }
 0x2be   :  { %v3278_v23 = vmul.f32 %v3804_v20, %v3270_v21 }
 0x2c0   :  { %v3286_v24 = vadd.f32 %v3805_v22, %v3278_v23 }
 0x2c2   :  { %v3287_v25 = vpack.c.bf16 %v3286_v24, %v3286_v24 }
 0x2c4   :  { %4272 = vmatmul.mubr.bf16.vlgmr.msra.gmra.mrb[36].mxu1 %v3287_v25 }
 0x397   :  { %v3393_v30 = vpop.f32.mrb[36].mxu1 }
 0x398   :  { %v3394_v31 = vadd.f32 %v3806_v29, %v3393_v30  ;;  %v4273_v32 = vpop.f32.mrb[37].mxu1 }
 0x399   :  { %v3396_v34 = vpop.f32.mrb[38].mxu1 }
 0x39a   :  { %v3399_v35 = vmax.f32 %v3394_v31, 0.0  ;;  %v4274_v36 = vpop.f32.mrb[39].mxu1 }
 0x39c   :  { %v3407_v37 = vmul.f32 %v3815_v33, %v3399_v35 }
 0x39e   :  { %v3415_v38 = vadd.f32 %v3816_v16, %v3407_v37 }
 0x3a0   :  { %v3416_v39 = vpack.c.bf16 %v3415_v38, %v3415_v38 }
 0x3a2   :  { %4284 = vmatmul.mubr.msk.bf16.vlgmr.msra.gmra.mrb[40].mxu0 %vm3456_vm3, %v3416_v39 }
 0x475   :  { %v3494_v42 = vpop.f32.mrb[40].mxu0 }
 0x476   :  { %v3495_v43 = vadd.f32 %v3817_v40, %v3494_v42  ;;  %v4285_v44 = vpop.f32.mrb[41].mxu0 }
 0x477   :  { %v3497_v45 = vpop.f32.mrb[42].mxu0 }
 0x478   :  { %v4286_v46 = vpop.f32.mrb[43].mxu0  ;;  %v3501_v47 = vsel %vm3500_vm4, %v3495_v43, -inf }
 0x479   :  { %3502 = vmax.xlane.f32.xlu0 %v3501_v47 }
 0x506   :  { %v3503_v48 = vpop.xlane.xlu0 %3502 }
 0x507   :  { %v3504_v49 = vsub.f32 %v3495_v43, %v3503_v48 }
 0x509   :  { %v3505_v50 = vmul.f32 1.442695, %v3504_v49 }
 0x50b   :  { %4580 = vpow2.f32 %v3505_v50 }
 0x515   :  { %v4581_v51 = vpop.eup %4580 }
 0x516   :  { %v3507_v52 = vsel %vm3500_vm4, %v4581_v51, 0.0 }
 0x517   :  { %3508 = vadd.xlane.f32.xlu0 %v3507_v52 }
 0x5a4   :  { %v3509_v53 = vpop.xlane.xlu0 %3508 }
 0x5a5   :  { %4582 = vrcp.f32 %v3509_v53 }
 0x5af   :  { %v4583_v54 = vpop.eup %4582 }
 0x5b0   :  { %v3511_v55 = vmul.f32 %v4583_v54, %v4581_v51 }
 0x5b2   :  { %3512 = vst.msk [vmem:[#allocation2] sm:$0x3] %vm3500_vm4, %v3511_v55 }
 0x5b3   :  { %4595 = shalt.err (!%p4592_p4)
}
 0x5b4   :  { %s4596_s27 = scalar_lea.hbm %s5717_s17, 32 }
 0x5b5   :  { %p4597_p5 = scmp.ne.s32.totalorder %s5717_s17, %s4596_s27  ;;  %p4600_p6 = scmp.lt.u32.totalorder %s4596_s27, %s5717_s17 }
 0x5b7   :  { %p4602_p7 = pnand %p4600_p6, %p4597_p5 }
 0x5b9   :  { %4605 = shalt.err (!%p4602_p7)
}
 0x5ba   :  { %3522 = dma.vmem_to_hbm [thread:$0]  %s3520_s14, 32, %s5717_s17, [#allocation3]  }
 0x5bb   :  { %4606 = dma.done.wait [#allocation3], 32  }
 0x5bc   :  { %4607 = vsyncadd [#allocation3], 4294967264 }
 0x5bd   :  { %3526 = vsyncpa [#allocation3], 1 }

</bundles_post_ra>
